<compile_context>
chip_gen: v5e
topology: v5e:2x2
jax: 0.10.0
libtpu: 0.0.40
codegen_flags: <defaults>
</compile_context>

<pallas_src>
import functools

import jax
import jax.numpy as jnp
import numpy as np
from jax.experimental import pallas as pl
from jax.experimental.pallas import tpu as pltpu


def _round_up(v, m):
    return (v + m - 1) // m * m


def _apply_activation(y, activation):
    if activation == 'relu':
        return jnp.maximum(y, 0.0)
    if activation == 'lrelu':
        return jnp.where(y >= 0, y, 0.2 * y)
    if activation == 'tanh':
        return jnp.tanh(y)
    if activation == 'selu':
        alpha, scale = 1.6732632423543772, 1.0507009873554805
        # exp() only ever sees non-positive inputs -> no spurious overflow on
        # the discarded branch.
        return scale * jnp.where(y > 0, y,
                                 alpha * (jnp.exp(jnp.minimum(y, 0.0)) - 1.0))
    if activation == 'none':
        return y
    # TODO(synk): 'prelu' needs a learned per-channel slope parameter.
    raise NotImplementedError(activation)


def _conv2d_block_kernel(x_ref, w_ref, b_ref, o_ref, xflat_ref, acc_ref, *,
                         nb, h, w, kh, kw, stride, padding, ho, wo,
                         ha, wrow, activation, compute_dtype):
    """One batch-group (nb images) per grid step.

    x_ref     : (nb, Cin, H*W)       lane-dense flattened NCHW input block
    w_ref     : (KH*KW, Cout, Cin)   per-tap weight, pre-cast to compute_dtype
    b_ref     : (Cout, 1)            f32 bias column
    o_ref     : (nb, Cout, Ho*Wo)    lane-dense flattened-spatial output
    xflat_ref : (nb, Cin, L)         zero-padded row-flattened input scratch
                                     (padded row r lives at lane offset r*wrow)
    acc_ref   : (nb, Cout, ha*wrow)  f32 accumulator (full stride-1
                                     correlation rows; decimated at the end)
    """
    cout = o_ref.shape[1]
    mfull = ha * wrow

    # --- zero-pad into the flat scratch: one memset + one interior copy ------
    xflat_ref[...] = jnp.zeros(xflat_ref.shape, xflat_ref.dtype)
    if padding == 0 and wrow == w:
        xflat_ref[:, :, :h * w] = x_ref[...].astype(compute_dtype)
    else:
        for r in range(h):
            d0 = (r + padding) * wrow + padding
            xflat_ref[:, :, d0:d0 + w] = (
                x_ref[:, :, r * w:(r + 1) * w].astype(compute_dtype))

    # --- per-tap MXU accumulation into a single f32 acc ----------------------
    # acc[o, y*wrow + x] += sum_c W[o, c, i, j] * xpad[c, y+i, x+j]
    # The (i, j) shift is a static lane offset into the flat scratch, so each
    # tap is: contiguous ref slice -> jnp.dot -> accumulate.  No im2col.
    for t in range(kh * kw):
        i, j = divmod(t, kw)
        off = i * wrow + j
        w_tap = w_ref[t]                                    # (Cout, Cin)
        for img in range(nb):
            rhs = xflat_ref[img, :, off:off + mfull]        # (Cin, ha*wrow)
            p = jnp.dot(w_tap, rhs, preferred_element_type=jnp.float32)
            if t == 0:
                acc_ref[img] = p                            # no memset needed
            else:
                acc_ref[img] = acc_ref[img] + p             # f32 accumulate

    # --- finalize: crop / decimate, bias, activation, lane-dense store -------
    for img in range(nb):
        a = acc_ref[img].reshape(cout, ha, wrow)            # (Cout, ha, wrow)
        if stride == 1:
            a = a[:, :, :wo]                                # (Cout, Ho, Wo)
        else:
            # TODO(synk): stride>1 computes the full stride-1 correlation and
            # decimates here (s^2 extra MXU work); a phase-decomposed scratch
            # fill would avoid that if strided Conv2dBlocks become hot.
            a = a.reshape(cout, ho, stride, wrow)[:, :, 0, :]
            a = a[:, :, :wo * stride].reshape(cout, ho, wo, stride)[:, :, :, 0]
        y = a.reshape(cout, ho * wo) + b_ref[...]           # f32 bias add
        y = _apply_activation(y, activation)
        o_ref[img] = y.astype(o_ref.dtype)


def conv2d_block(x_nchw, weight_oihw, bias, *, stride=1, padding=0,
                 norm='none', activation='relu', pad_type='zero',
                 compute_dtype=jnp.bfloat16, block_n=None,
                 vmem_limit_bytes=32 * 1024 * 1024):
    """Forward pass of Conv2dBlock. x is NCHW, weight is OIHW (PyTorch)."""
    # TODO(synk): norm='bn'/'in' not implemented (module default is 'none').
    assert norm == 'none'
    # TODO(synk): reflect/replicate padding not implemented (default 'zero').
    assert pad_type == 'zero'

    n, cin, h, w = x_nchw.shape
    cout, cin_w, kh, kw = weight_oihw.shape
    assert cin_w == cin

    hp, wp = h + 2 * padding, w + 2 * padding
    ho = (hp - kh) // stride + 1
    wo = (wp - kw) // stride + 1

    # Geometry of the full stride-1 correlation used by the shift-and-
    # accumulate formulation (reduces to (ho, wp) when stride == 1).
    ha = ho * stride
    wrow = max(wp, wo * stride)
    l_flat = _round_up((kh - 1) * wrow + (kw - 1) + ha * wrow, 128)

    # One-time parameter prep (wrapper side): per-tap layout + compute-dtype
    # cast, so the kernel never re-casts the weight each grid step.
    w_taps = jnp.transpose(weight_oihw, (2, 3, 0, 1)).reshape(
        kh * kw, cout, cin).astype(compute_dtype)
    b_col = bias.reshape(cout, 1).astype(jnp.float32)

    # Lane-dense input view (free metadata reshape of the NCHW array).
    x_flat = x_nchw.reshape(n, cin, h * w)

    # Batch several images per grid step while the per-step working set is
    # small (amortizes pipeline overhead and constant-weight traffic).
    if block_n is None:
        per_image = (2 * cin * h * w * x_nchw.dtype.itemsize
                     + cin * l_flat * jnp.dtype(compute_dtype).itemsize
                     + cout * ha * wrow * 4
                     + 2 * cout * ho * wo * x_nchw.dtype.itemsize)
        block_n = 1
        for cand in range(1, n + 1):
            if n % cand == 0 and cand * per_image <= 4 * 1024 * 1024:
                block_n = cand
    nb = block_n
    assert n % nb == 0

    kernel = functools.partial(
        _conv2d_block_kernel, nb=nb, h=h, w=w, kh=kh, kw=kw, stride=stride,
        padding=padding, ho=ho, wo=wo, ha=ha, wrow=wrow,
        activation=activation, compute_dtype=compute_dtype)

    itemsize = x_nchw.dtype.itemsize
    cost = pl.CostEstimate(
        flops=2 * n * cout * cin * kh * kw * ha * wrow,
        transcendentals=(n * cout * ho * wo
                         if activation in ('tanh', 'selu') else 0),
        bytes_accessed=(x_nchw.size * itemsize
                        + w_taps.size * w_taps.dtype.itemsize
                        + b_col.size * 4
                        + n * cout * ho * wo * itemsize))

    out_flat = pl.pallas_call(
        kernel,
        out_shape=jax.ShapeDtypeStruct((n, cout, ho * wo), x_nchw.dtype),
        grid=(n // nb,),
        in_specs=[
            pl.BlockSpec((nb, cin, h * w), lambda g: (g, 0, 0)),
            pl.BlockSpec((kh * kw, cout, cin), lambda g: (0, 0, 0)),
            pl.BlockSpec((cout, 1), lambda g: (0, 0)),
        ],
        out_specs=pl.BlockSpec((nb, cout, ho * wo), lambda g: (g, 0, 0)),
        scratch_shapes=[
            pltpu.VMEM((nb, cin, l_flat), compute_dtype),   # padded flat input
            pltpu.VMEM((nb, cout, ha * wrow), jnp.float32), # f32 accumulator
        ],
        compiler_params=pltpu.CompilerParams(
            dimension_semantics=("parallel",),
            vmem_limit_bytes=vmem_limit_bytes),
        cost_estimate=cost,
    )(x_flat, w_taps, b_col)

    # Contiguous reshape straight to NCHW (free -- no transpose).
    return out_flat.reshape(n, cout, ho, wo)


if __name__ == "__main__":
    def reference(x, weight, bias, stride, padding, activation):
        out = jax.lax.conv_general_dilated(
            x, weight, window_strides=(stride, stride),
            padding=[(padding, padding), (padding, padding)],
            dimension_numbers=('NCHW', 'OIHW', 'NCHW'))
        out = out + bias[None, :, None, None]
        if activation == 'relu':
            out = jnp.maximum(out, 0.0)
        elif activation == 'lrelu':
            out = jnp.where(out >= 0, out, 0.2 * out)
        elif activation == 'tanh':
            out = jnp.tanh(out)
        elif activation == 'selu':
            out = jax.nn.selu(out)
        return out

    # Module config: Conv2dBlock(input_dim=4, output_dim=8, kernel_size=3, ...)
    N, CIN, H, W = 2, 4, 16, 16
    COUT, K = 8, 3

    key = jax.random.PRNGKey(0)
    kx, kw_, kb = jax.random.split(key, 3)
    x = jax.random.normal(kx, (N, CIN, H, W), dtype=jnp.float32)

    # Deterministic params, mimicking PyTorch Conv2d default uniform init.
    fan_in = CIN * K * K
    bound = 1.0 / np.sqrt(fan_in)
    weight = jax.random.uniform(kw_, (COUT, CIN, K, K), jnp.float32,
                                minval=-bound, maxval=bound)
    bias = jax.random.uniform(kb, (COUT,), jnp.float32,
                              minval=-bound, maxval=bound)

    cases = [
        # (stride, padding, activation, compute_dtype, rtol, atol)
        (1, 1, 'relu', jnp.float32, 1e-5, 1e-5),    # module default, exact f32
        (1, 1, 'relu', jnp.bfloat16, 5e-2, 5e-2),   # bf16-MXU production path
        (1, 1, 'tanh', jnp.float32, 1e-4, 1e-4),    # non-relu activation
        (2, 1, 'lrelu', jnp.float32, 1e-5, 1e-5),   # strided conv path
    ]
    for stride, pad, act, cdt, rtol, atol in cases:
        out = conv2d_block(x, weight, bias, stride=stride, padding=pad,
                           norm='none', activation=act, pad_type='zero',
                           compute_dtype=cdt)
        out = jax.block_until_ready(out)
        ref = reference(x, weight, bias, stride, pad, act)
        ho = (H + 2 * pad - K) // stride + 1
        assert out.shape == (N, COUT, ho, ho), (out.shape, act, stride)
        np.testing.assert_allclose(
            np.asarray(out), np.asarray(ref), rtol=rtol, atol=atol,
            err_msg=f"stride={stride} act={act} compute_dtype={cdt}")

    print("KERNEL_OK")
</pallas_src>

<mosaic_0001>
module attributes {stable_mosaic.version = 11 : i64} {
  func.func @_conv2d_block_kernel(%arg0: i32, %arg1: memref<2x4x256xf32, #tpu.memory_space<vmem>>, %arg2: memref<9x8x4xf32, #tpu.memory_space<vmem>>, %arg3: memref<8x1xf32, #tpu.memory_space<vmem>>, %arg4: memref<2x8x256xf32, #tpu.memory_space<vmem>>, %arg5: memref<2x4x384xf32, #tpu.memory_space<vmem>>, %arg6: memref<2x8x288xf32, #tpu.memory_space<vmem>>) attributes {dimension_semantics = [#tpu.dimension_semantics<parallel>], iteration_bounds = array<i64: 1>, scalar_prefetch = 0 : i64, scratch_operands = 2 : i64, tpu.core_type = #tpu.core_type<tc>, window_params = [{transform_indices = @transform_0, window_bounds = array<i64: 2, 4, 256>}, {pipeline_mode = #tpu.pipeline_mode<synchronous>, transform_indices = @transform_1, window_bounds = array<i64: 9, 8, 4>}, {pipeline_mode = #tpu.pipeline_mode<synchronous>, transform_indices = @transform_2, window_bounds = array<i64: 8, 1>}, {transform_indices = @transform_3, window_bounds = array<i64: 2, 8, 256>}]} {
    %cst = arith.constant 0.000000e+00 : f32
    %0 = vector.broadcast %cst : f32 to vector<2x4x384xf32>
    %c0 = arith.constant 0 : index
    %c0_0 = arith.constant 0 : index
    %c0_1 = arith.constant 0 : index
    %1 = vector.load %arg5[%c0, %c0_0, %c0_1] : memref<2x4x384xf32, #tpu.memory_space<vmem>>, vector<2x4x384xf32>
    tpu.vector_store %arg5[%c0, %c0_0, %c0_1], %0 {strides = array<i32>} : memref<2x4x384xf32, #tpu.memory_space<vmem>>, vector<2x4x384xf32>,
    %c0_2 = arith.constant 0 : index
    %c0_3 = arith.constant 0 : index
    %c0_4 = arith.constant 0 : index
    %2 = vector.load %arg1[%c0_2, %c0_3, %c0_4] : memref<2x4x256xf32, #tpu.memory_space<vmem>>, vector<2x4x16xf32>
    %c0_5 = arith.constant 0 : index
    %c0_6 = arith.constant 0 : index
    %c19 = arith.constant 19 : index
    %3 = vector.load %arg5[%c0_5, %c0_6, %c19] : memref<2x4x384xf32, #tpu.memory_space<vmem>>, vector<2x4x16xf32>
    tpu.vector_store %arg5[%c0_5, %c0_6, %c19], %2 {strides = array<i32>} : memref<2x4x384xf32, #tpu.memory_space<vmem>>, vector<2x4x16xf32>,
    %c0_7 = arith.constant 0 : index
    %c0_8 = arith.constant 0 : index
    %c16 = arith.constant 16 : index
    %4 = vector.load %arg1[%c0_7, %c0_8, %c16] : memref<2x4x256xf32, #tpu.memory_space<vmem>>, vector<2x4x16xf32>
    %c0_9 = arith.constant 0 : index
    %c0_10 = arith.constant 0 : index
    %c37 = arith.constant 37 : index
    %5 = vector.load %arg5[%c0_9, %c0_10, %c37] : memref<2x4x384xf32, #tpu.memory_space<vmem>>, vector<2x4x16xf32>
    tpu.vector_store %arg5[%c0_9, %c0_10, %c37], %4 {strides = array<i32>} : memref<2x4x384xf32, #tpu.memory_space<vmem>>, vector<2x4x16xf32>,
    %c0_11 = arith.constant 0 : index
    %c0_12 = arith.constant 0 : index
    %c32 = arith.constant 32 : index
    %6 = vector.load %arg1[%c0_11, %c0_12, %c32] : memref<2x4x256xf32, #tpu.memory_space<vmem>>, vector<2x4x16xf32>
    %c0_13 = arith.constant 0 : index
    %c0_14 = arith.constant 0 : index
    %c55 = arith.constant 55 : index
    %7 = vector.load %arg5[%c0_13, %c0_14, %c55] : memref<2x4x384xf32, #tpu.memory_space<vmem>>, vector<2x4x16xf32>
    tpu.vector_store %arg5[%c0_13, %c0_14, %c55], %6 {strides = array<i32>} : memref<2x4x384xf32, #tpu.memory_space<vmem>>, vector<2x4x16xf32>,
    %c0_15 = arith.constant 0 : index
    %c0_16 = arith.constant 0 : index
    %c48 = arith.constant 48 : index
    %8 = vector.load %arg1[%c0_15, %c0_16, %c48] : memref<2x4x256xf32, #tpu.memory_space<vmem>>, vector<2x4x16xf32>
    %c0_17 = arith.constant 0 : index
    %c0_18 = arith.constant 0 : index
    %c73 = arith.constant 73 : index
    %9 = vector.load %arg5[%c0_17, %c0_18, %c73] : memref<2x4x384xf32, #tpu.memory_space<vmem>>, vector<2x4x16xf32>
    tpu.vector_store %arg5[%c0_17, %c0_18, %c73], %8 {strides = array<i32>} : memref<2x4x384xf32, #tpu.memory_space<vmem>>, vector<2x4x16xf32>,
    %c0_19 = arith.constant 0 : index
    %c0_20 = arith.constant 0 : index
    %c64 = arith.constant 64 : index
    %10 = vector.load %arg1[%c0_19, %c0_20, %c64] : memref<2x4x256xf32, #tpu.memory_space<vmem>>, vector<2x4x16xf32>
    %c0_21 = arith.constant 0 : index
    %c0_22 = arith.constant 0 : index
    %c91 = arith.constant 91 : index
    %11 = vector.load %arg5[%c0_21, %c0_22, %c91] : memref<2x4x384xf32, #tpu.memory_space<vmem>>, vector<2x4x16xf32>
    tpu.vector_store %arg5[%c0_21, %c0_22, %c91], %10 {strides = array<i32>} : memref<2x4x384xf32, #tpu.memory_space<vmem>>, vector<2x4x16xf32>,
    %c0_23 = arith.constant 0 : index
    %c0_24 = arith.constant 0 : index
    %c80 = arith.constant 80 : index
    %12 = vector.load %arg1[%c0_23, %c0_24, %c80] : memref<2x4x256xf32, #tpu.memory_space<vmem>>, vector<2x4x16xf32>
    %c0_25 = arith.constant 0 : index
    %c0_26 = arith.constant 0 : index
    %c109 = arith.constant 109 : index
    %13 = vector.load %arg5[%c0_25, %c0_26, %c109] : memref<2x4x384xf32, #tpu.memory_space<vmem>>, vector<2x4x16xf32>
    tpu.vector_store %arg5[%c0_25, %c0_26, %c109], %12 {strides = array<i32>} : memref<2x4x384xf32, #tpu.memory_space<vmem>>, vector<2x4x16xf32>,
    %c0_27 = arith.constant 0 : index
    %c0_28 = arith.constant 0 : index
    %c96 = arith.constant 96 : index
    %14 = vector.load %arg1[%c0_27, %c0_28, %c96] : memref<2x4x256xf32, #tpu.memory_space<vmem>>, vector<2x4x16xf32>
    %c0_29 = arith.constant 0 : index
    %c0_30 = arith.constant 0 : index
    %c127 = arith.constant 127 : index
    %15 = vector.load %arg5[%c0_29, %c0_30, %c127] : memref<2x4x384xf32, #tpu.memory_space<vmem>>, vector<2x4x16xf32>
    tpu.vector_store %arg5[%c0_29, %c0_30, %c127], %14 {strides = array<i32>} : memref<2x4x384xf32, #tpu.memory_space<vmem>>, vector<2x4x16xf32>,
    %c0_31 = arith.constant 0 : index
    %c0_32 = arith.constant 0 : index
    %c112 = arith.constant 112 : index
    %16 = vector.load %arg1[%c0_31, %c0_32, %c112] : memref<2x4x256xf32, #tpu.memory_space<vmem>>, vector<2x4x16xf32>
    %c0_33 = arith.constant 0 : index
    %c0_34 = arith.constant 0 : index
    %c145 = arith.constant 145 : index
    %17 = vector.load %arg5[%c0_33, %c0_34, %c145] : memref<2x4x384xf32, #tpu.memory_space<vmem>>, vector<2x4x16xf32>
    tpu.vector_store %arg5[%c0_33, %c0_34, %c145], %16 {strides = array<i32>} : memref<2x4x384xf32, #tpu.memory_space<vmem>>, vector<2x4x16xf32>,
    %c0_35 = arith.constant 0 : index
    %c0_36 = arith.constant 0 : index
    %c128 = arith.constant 128 : index
    %18 = vector.load %arg1[%c0_35, %c0_36, %c128] : memref<2x4x256xf32, #tpu.memory_space<vmem>>, vector<2x4x16xf32>
    %c0_37 = arith.constant 0 : index
    %c0_38 = arith.constant 0 : index
    %c163 = arith.constant 163 : index
    %19 = vector.load %arg5[%c0_37, %c0_38, %c163] : memref<2x4x384xf32, #tpu.memory_space<vmem>>, vector<2x4x16xf32>
    tpu.vector_store %arg5[%c0_37, %c0_38, %c163], %18 {strides = array<i32>} : memref<2x4x384xf32, #tpu.memory_space<vmem>>, vector<2x4x16xf32>,
    %c0_39 = arith.constant 0 : index
    %c0_40 = arith.constant 0 : index
    %c144 = arith.constant 144 : index
    %20 = vector.load %arg1[%c0_39, %c0_40, %c144] : memref<2x4x256xf32, #tpu.memory_space<vmem>>, vector<2x4x16xf32>
    %c0_41 = arith.constant 0 : index
    %c0_42 = arith.constant 0 : index
    %c181 = arith.constant 181 : index
    %21 = vector.load %arg5[%c0_41, %c0_42, %c181] : memref<2x4x384xf32, #tpu.memory_space<vmem>>, vector<2x4x16xf32>
    tpu.vector_store %arg5[%c0_41, %c0_42, %c181], %20 {strides = array<i32>} : memref<2x4x384xf32, #tpu.memory_space<vmem>>, vector<2x4x16xf32>,
    %c0_43 = arith.constant 0 : index
    %c0_44 = arith.constant 0 : index
    %c160 = arith.constant 160 : index
    %22 = vector.load %arg1[%c0_43, %c0_44, %c160] : memref<2x4x256xf32, #tpu.memory_space<vmem>>, vector<2x4x16xf32>
    %c0_45 = arith.constant 0 : index
    %c0_46 = arith.constant 0 : index
    %c199 = arith.constant 199 : index
    %23 = vector.load %arg5[%c0_45, %c0_46, %c199] : memref<2x4x384xf32, #tpu.memory_space<vmem>>, vector<2x4x16xf32>
    tpu.vector_store %arg5[%c0_45, %c0_46, %c199], %22 {strides = array<i32>} : memref<2x4x384xf32, #tpu.memory_space<vmem>>, vector<2x4x16xf32>,
    %c0_47 = arith.constant 0 : index
    %c0_48 = arith.constant 0 : index
    %c176 = arith.constant 176 : index
    %24 = vector.load %arg1[%c0_47, %c0_48, %c176] : memref<2x4x256xf32, #tpu.memory_space<vmem>>, vector<2x4x16xf32>
    %c0_49 = arith.constant 0 : index
    %c0_50 = arith.constant 0 : index
    %c217 = arith.constant 217 : index
    %25 = vector.load %arg5[%c0_49, %c0_50, %c217] : memref<2x4x384xf32, #tpu.memory_space<vmem>>, vector<2x4x16xf32>
    tpu.vector_store %arg5[%c0_49, %c0_50, %c217], %24 {strides = array<i32>} : memref<2x4x384xf32, #tpu.memory_space<vmem>>, vector<2x4x16xf32>,
    %c0_51 = arith.constant 0 : index
    %c0_52 = arith.constant 0 : index
    %c192 = arith.constant 192 : index
    %26 = vector.load %arg1[%c0_51, %c0_52, %c192] : memref<2x4x256xf32, #tpu.memory_space<vmem>>, vector<2x4x16xf32>
    %c0_53 = arith.constant 0 : index
    %c0_54 = arith.constant 0 : index
    %c235 = arith.constant 235 : index
    %27 = vector.load %arg5[%c0_53, %c0_54, %c235] : memref<2x4x384xf32, #tpu.memory_space<vmem>>, vector<2x4x16xf32>
    tpu.vector_store %arg5[%c0_53, %c0_54, %c235], %26 {strides = array<i32>} : memref<2x4x384xf32, #tpu.memory_space<vmem>>, vector<2x4x16xf32>,
    %c0_55 = arith.constant 0 : index
    %c0_56 = arith.constant 0 : index
    %c208 = arith.constant 208 : index
    %28 = vector.load %arg1[%c0_55, %c0_56, %c208] : memref<2x4x256xf32, #tpu.memory_space<vmem>>, vector<2x4x16xf32>
    %c0_57 = arith.constant 0 : index
    %c0_58 = arith.constant 0 : index
    %c253 = arith.constant 253 : index
    %29 = vector.load %arg5[%c0_57, %c0_58, %c253] : memref<2x4x384xf32, #tpu.memory_space<vmem>>, vector<2x4x16xf32>
    tpu.vector_store %arg5[%c0_57, %c0_58, %c253], %28 {strides = array<i32>} : memref<2x4x384xf32, #tpu.memory_space<vmem>>, vector<2x4x16xf32>,
    %c0_59 = arith.constant 0 : index
    %c0_60 = arith.constant 0 : index
    %c224 = arith.constant 224 : index
    %30 = vector.load %arg1[%c0_59, %c0_60, %c224] : memref<2x4x256xf32, #tpu.memory_space<vmem>>, vector<2x4x16xf32>
    %c0_61 = arith.constant 0 : index
    %c0_62 = arith.constant 0 : index
    %c271 = arith.constant 271 : index
    %31 = vector.load %arg5[%c0_61, %c0_62, %c271] : memref<2x4x384xf32, #tpu.memory_space<vmem>>, vector<2x4x16xf32>
    tpu.vector_store %arg5[%c0_61, %c0_62, %c271], %30 {strides = array<i32>} : memref<2x4x384xf32, #tpu.memory_space<vmem>>, vector<2x4x16xf32>,
    %c0_63 = arith.constant 0 : index
    %c0_64 = arith.constant 0 : index
    %c240 = arith.constant 240 : index
    %32 = vector.load %arg1[%c0_63, %c0_64, %c240] : memref<2x4x256xf32, #tpu.memory_space<vmem>>, vector<2x4x16xf32>
    %c0_65 = arith.constant 0 : index
    %c0_66 = arith.constant 0 : index
    %c289 = arith.constant 289 : index
    %33 = vector.load %arg5[%c0_65, %c0_66, %c289] : memref<2x4x384xf32, #tpu.memory_space<vmem>>, vector<2x4x16xf32>
    tpu.vector_store %arg5[%c0_65, %c0_66, %c289], %32 {strides = array<i32>} : memref<2x4x384xf32, #tpu.memory_space<vmem>>, vector<2x4x16xf32>,
    %c0_67 = arith.constant 0 : index
    %c0_68 = arith.constant 0 : index
    %c0_69 = arith.constant 0 : index
    %34 = vector.load %arg2[%c0_67, %c0_68, %c0_69] : memref<9x8x4xf32, #tpu.memory_space<vmem>>, vector<1x8x4xf32>
    %35 = vector.shape_cast %34 : vector<1x8x4xf32> to vector<8x4xf32>
    %c0_70 = arith.constant 0 : index
    %c0_71 = arith.constant 0 : index
    %c0_72 = arith.constant 0 : index
    %36 = vector.load %arg5[%c0_70, %c0_71, %c0_72] : memref<2x4x384xf32, #tpu.memory_space<vmem>>, vector<1x4x288xf32>
    %37 = vector.shape_cast %36 : vector<1x4x288xf32> to vector<4x288xf32>
    %cst_73 = arith.constant dense<0.000000e+00> : vector<8x288xf32>
    %38 = tpu.matmul %35, %37, %cst_73 {dimension_numbers = #tpu.dot_dimension_numbers<[1], [0], [0], [1], [0, 0, 1, 1], [], []>} : vector<8x4xf32>, vector<4x288xf32>, vector<8x288xf32> -> vector<8x288xf32>
    %c0_74 = arith.constant 0 : index
    %c0_75 = arith.constant 0 : index
    %c0_76 = arith.constant 0 : index
    %39 = vector.load %arg6[%c0_74, %c0_75, %c0_76] : memref<2x8x288xf32, #tpu.memory_space<vmem>>, vector<1x8x288xf32>
    %40 = vector.shape_cast %39 : vector<1x8x288xf32> to vector<8x288xf32>
    %41 = vector.shape_cast %38 : vector<8x288xf32> to vector<1x8x288xf32>
    tpu.vector_store %arg6[%c0_74, %c0_75, %c0_76], %41 {strides = array<i32>} : memref<2x8x288xf32, #tpu.memory_space<vmem>>, vector<1x8x288xf32>,
    %c1 = arith.constant 1 : index
    %c0_77 = arith.constant 0 : index
    %c0_78 = arith.constant 0 : index
    %42 = vector.load %arg5[%c1, %c0_77, %c0_78] : memref<2x4x384xf32, #tpu.memory_space<vmem>>, vector<1x4x288xf32>
    %43 = vector.shape_cast %42 : vector<1x4x288xf32> to vector<4x288xf32>
    %cst_79 = arith.constant dense<0.000000e+00> : vector<8x288xf32>
    %44 = tpu.matmul %35, %43, %cst_79 {dimension_numbers = #tpu.dot_dimension_numbers<[1], [0], [0], [1], [0, 0, 1, 1], [], []>} : vector<8x4xf32>, vector<4x288xf32>, vector<8x288xf32> -> vector<8x288xf32>
    %c1_80 = arith.constant 1 : index
    %c0_81 = arith.constant 0 : index
    %c0_82 = arith.constant 0 : index
    %45 = vector.load %arg6[%c1_80, %c0_81, %c0_82] : memref<2x8x288xf32, #tpu.memory_space<vmem>>, vector<1x8x288xf32>
    %46 = vector.shape_cast %45 : vector<1x8x288xf32> to vector<8x288xf32>
    %47 = vector.shape_cast %44 : vector<8x288xf32> to vector<1x8x288xf32>
    tpu.vector_store %arg6[%c1_80, %c0_81, %c0_82], %47 {strides = array<i32>} : memref<2x8x288xf32, #tpu.memory_space<vmem>>, vector<1x8x288xf32>,
    %c1_83 = arith.constant 1 : index
    %c0_84 = arith.constant 0 : index
    %c0_85 = arith.constant 0 : index
    %48 = vector.load %arg2[%c1_83, %c0_84, %c0_85] : memref<9x8x4xf32, #tpu.memory_space<vmem>>, vector<1x8x4xf32>
    %49 = vector.shape_cast %48 : vector<1x8x4xf32> to vector<8x4xf32>
    %c0_86 = arith.constant 0 : index
    %c0_87 = arith.constant 0 : index
    %c1_88 = arith.constant 1 : index
    %50 = vector.load %arg5[%c0_86, %c0_87, %c1_88] : memref<2x4x384xf32, #tpu.memory_space<vmem>>, vector<1x4x288xf32>
    %51 = vector.shape_cast %50 : vector<1x4x288xf32> to vector<4x288xf32>
    %cst_89 = arith.constant dense<0.000000e+00> : vector<8x288xf32>
    %52 = tpu.matmul %49, %51, %cst_89 {dimension_numbers = #tpu.dot_dimension_numbers<[1], [0], [0], [1], [0, 0, 1, 1], [], []>} : vector<8x4xf32>, vector<4x288xf32>, vector<8x288xf32> -> vector<8x288xf32>
    %c0_90 = arith.constant 0 : index
    %c0_91 = arith.constant 0 : index
    %c0_92 = arith.constant 0 : index
    %53 = vector.load %arg6[%c0_90, %c0_91, %c0_92] : memref<2x8x288xf32, #tpu.memory_space<vmem>>, vector<1x8x288xf32>
    %54 = vector.shape_cast %53 : vector<1x8x288xf32> to vector<8x288xf32>
    %55 = arith.addf %54, %52 : vector<8x288xf32>
    %c0_93 = arith.constant 0 : index
    %c0_94 = arith.constant 0 : index
    %c0_95 = arith.constant 0 : index
    %56 = vector.load %arg6[%c0_93, %c0_94, %c0_95] : memref<2x8x288xf32, #tpu.memory_space<vmem>>, vector<1x8x288xf32>
    %57 = vector.shape_cast %56 : vector<1x8x288xf32> to vector<8x288xf32>
    %58 = vector.shape_cast %55 : vector<8x288xf32> to vector<1x8x288xf32>
    tpu.vector_store %arg6[%c0_93, %c0_94, %c0_95], %58 {strides = array<i32>} : memref<2x8x288xf32, #tpu.memory_space<vmem>>, vector<1x8x288xf32>,
    %c1_96 = arith.constant 1 : index
    %c0_97 = arith.constant 0 : index
    %c1_98 = arith.constant 1 : index
    %59 = vector.load %arg5[%c1_96, %c0_97, %c1_98] : memref<2x4x384xf32, #tpu.memory_space<vmem>>, vector<1x4x288xf32>
    %60 = vector.shape_cast %59 : vector<1x4x288xf32> to vector<4x288xf32>
    %cst_99 = arith.constant dense<0.000000e+00> : vector<8x288xf32>
    %61 = tpu.matmul %49, %60, %cst_99 {dimension_numbers = #tpu.dot_dimension_numbers<[1], [0], [0], [1], [0, 0, 1, 1], [], []>} : vector<8x4xf32>, vector<4x288xf32>, vector<8x288xf32> -> vector<8x288xf32>
    %c1_100 = arith.constant 1 : index
    %c0_101 = arith.constant 0 : index
    %c0_102 = arith.constant 0 : index
    %62 = vector.load %arg6[%c1_100, %c0_101, %c0_102] : memref<2x8x288xf32, #tpu.memory_space<vmem>>, vector<1x8x288xf32>
    %63 = vector.shape_cast %62 : vector<1x8x288xf32> to vector<8x288xf32>
    %64 = arith.addf %63, %61 : vector<8x288xf32>
    %c1_103 = arith.constant 1 : index
    %c0_104 = arith.constant 0 : index
    %c0_105 = arith.constant 0 : index
    %65 = vector.load %arg6[%c1_103, %c0_104, %c0_105] : memref<2x8x288xf32, #tpu.memory_space<vmem>>, vector<1x8x288xf32>
    %66 = vector.shape_cast %65 : vector<1x8x288xf32> to vector<8x288xf32>
    %67 = vector.shape_cast %64 : vector<8x288xf32> to vector<1x8x288xf32>
    tpu.vector_store %arg6[%c1_103, %c0_104, %c0_105], %67 {strides = array<i32>} : memref<2x8x288xf32, #tpu.memory_space<vmem>>, vector<1x8x288xf32>,
    %c2 = arith.constant 2 : index
    %c0_106 = arith.constant 0 : index
    %c0_107 = arith.constant 0 : index
    %68 = vector.load %arg2[%c2, %c0_106, %c0_107] : memref<9x8x4xf32, #tpu.memory_space<vmem>>, vector<1x8x4xf32>
    %69 = vector.shape_cast %68 : vector<1x8x4xf32> to vector<8x4xf32>
    %c0_108 = arith.constant 0 : index
    %c0_109 = arith.constant 0 : index
    %c2_110 = arith.constant 2 : index
    %70 = vector.load %arg5[%c0_108, %c0_109, %c2_110] : memref<2x4x384xf32, #tpu.memory_space<vmem>>, vector<1x4x288xf32>
    %71 = vector.shape_cast %70 : vector<1x4x288xf32> to vector<4x288xf32>
    %cst_111 = arith.constant dense<0.000000e+00> : vector<8x288xf32>
    %72 = tpu.matmul %69, %71, %cst_111 {dimension_numbers = #tpu.dot_dimension_numbers<[1], [0], [0], [1], [0, 0, 1, 1], [], []>} : vector<8x4xf32>, vector<4x288xf32>, vector<8x288xf32> -> vector<8x288xf32>
    %c0_112 = arith.constant 0 : index
    %c0_113 = arith.constant 0 : index
    %c0_114 = arith.constant 0 : index
    %73 = vector.load %arg6[%c0_112, %c0_113, %c0_114] : memref<2x8x288xf32, #tpu.memory_space<vmem>>, vector<1x8x288xf32>
    %74 = vector.shape_cast %73 : vector<1x8x288xf32> to vector<8x288xf32>
    %75 = arith.addf %74, %72 : vector<8x288xf32>
    %c0_115 = arith.constant 0 : index
    %c0_116 = arith.constant 0 : index
    %c0_117 = arith.constant 0 : index
    %76 = vector.load %arg6[%c0_115, %c0_116, %c0_117] : memref<2x8x288xf32, #tpu.memory_space<vmem>>, vector<1x8x288xf32>
    %77 = vector.shape_cast %76 : vector<1x8x288xf32> to vector<8x288xf32>
    %78 = vector.shape_cast %75 : vector<8x288xf32> to vector<1x8x288xf32>
    tpu.vector_store %arg6[%c0_115, %c0_116, %c0_117], %78 {strides = array<i32>} : memref<2x8x288xf32, #tpu.memory_space<vmem>>, vector<1x8x288xf32>,
    %c1_118 = arith.constant 1 : index
    %c0_119 = arith.constant 0 : index
    %c2_120 = arith.constant 2 : index
    %79 = vector.load %arg5[%c1_118, %c0_119, %c2_120] : memref<2x4x384xf32, #tpu.memory_space<vmem>>, vector<1x4x288xf32>
    %80 = vector.shape_cast %79 : vector<1x4x288xf32> to vector<4x288xf32>
    %cst_121 = arith.constant dense<0.000000e+00> : vector<8x288xf32>
    %81 = tpu.matmul %69, %80, %cst_121 {dimension_numbers = #tpu.dot_dimension_numbers<[1], [0], [0], [1], [0, 0, 1, 1], [], []>} : vector<8x4xf32>, vector<4x288xf32>, vector<8x288xf32> -> vector<8x288xf32>
    %c1_122 = arith.constant 1 : index
    %c0_123 = arith.constant 0 : index
    %c0_124 = arith.constant 0 : index
    %82 = vector.load %arg6[%c1_122, %c0_123, %c0_124] : memref<2x8x288xf32, #tpu.memory_space<vmem>>, vector<1x8x288xf32>
    %83 = vector.shape_cast %82 : vector<1x8x288xf32> to vector<8x288xf32>
    %84 = arith.addf %83, %81 : vector<8x288xf32>
    %c1_125 = arith.constant 1 : index
    %c0_126 = arith.constant 0 : index
    %c0_127 = arith.constant 0 : index
    %85 = vector.load %arg6[%c1_125, %c0_126, %c0_127] : memref<2x8x288xf32, #tpu.memory_space<vmem>>, vector<1x8x288xf32>
    %86 = vector.shape_cast %85 : vector<1x8x288xf32> to vector<8x288xf32>
    %87 = vector.shape_cast %84 : vector<8x288xf32> to vector<1x8x288xf32>
    tpu.vector_store %arg6[%c1_125, %c0_126, %c0_127], %87 {strides = array<i32>} : memref<2x8x288xf32, #tpu.memory_space<vmem>>, vector<1x8x288xf32>,
    %c3 = arith.constant 3 : index
    %c0_128 = arith.constant 0 : index
    %c0_129 = arith.constant 0 : index
    %88 = vector.load %arg2[%c3, %c0_128, %c0_129] : memref<9x8x4xf32, #tpu.memory_space<vmem>>, vector<1x8x4xf32>
    %89 = vector.shape_cast %88 : vector<1x8x4xf32> to vector<8x4xf32>
    %c0_130 = arith.constant 0 : index
    %c0_131 = arith.constant 0 : index
    %c18 = arith.constant 18 : index
    %90 = vector.load %arg5[%c0_130, %c0_131, %c18] : memref<2x4x384xf32, #tpu.memory_space<vmem>>, vector<1x4x288xf32>
    %91 = vector.shape_cast %90 : vector<1x4x288xf32> to vector<4x288xf32>
    %cst_132 = arith.constant dense<0.000000e+00> : vector<8x288xf32>
    %92 = tpu.matmul %89, %91, %cst_132 {dimension_numbers = #tpu.dot_dimension_numbers<[1], [0], [0], [1], [0, 0, 1, 1], [], []>} : vector<8x4xf32>, vector<4x288xf32>, vector<8x288xf32> -> vector<8x288xf32>
    %c0_133 = arith.constant 0 : index
    %c0_134 = arith.constant 0 : index
    %c0_135 = arith.constant 0 : index
    %93 = vector.load %arg6[%c0_133, %c0_134, %c0_135] : memref<2x8x288xf32, #tpu.memory_space<vmem>>, vector<1x8x288xf32>
    %94 = vector.shape_cast %93 : vector<1x8x288xf32> to vector<8x288xf32>
    %95 = arith.addf %94, %92 : vector<8x288xf32>
    %c0_136 = arith.constant 0 : index
    %c0_137 = arith.constant 0 : index
    %c0_138 = arith.constant 0 : index
    %96 = vector.load %arg6[%c0_136, %c0_137, %c0_138] : memref<2x8x288xf32, #tpu.memory_space<vmem>>, vector<1x8x288xf32>
    %97 = vector.shape_cast %96 : vector<1x8x288xf32> to vector<8x288xf32>
    %98 = vector.shape_cast %95 : vector<8x288xf32> to vector<1x8x288xf32>
    tpu.vector_store %arg6[%c0_136, %c0_137, %c0_138], %98 {strides = array<i32>} : memref<2x8x288xf32, #tpu.memory_space<vmem>>, vector<1x8x288xf32>,
    %c1_139 = arith.constant 1 : index
    %c0_140 = arith.constant 0 : index
    %c18_141 = arith.constant 18 : index
    %99 = vector.load %arg5[%c1_139, %c0_140, %c18_141] : memref<2x4x384xf32, #tpu.memory_space<vmem>>, vector<1x4x288xf32>
    %100 = vector.shape_cast %99 : vector<1x4x288xf32> to vector<4x288xf32>
    %cst_142 = arith.constant dense<0.000000e+00> : vector<8x288xf32>
    %101 = tpu.matmul %89, %100, %cst_142 {dimension_numbers = #tpu.dot_dimension_numbers<[1], [0], [0], [1], [0, 0, 1, 1], [], []>} : vector<8x4xf32>, vector<4x288xf32>, vector<8x288xf32> -> vector<8x288xf32>
    %c1_143 = arith.constant 1 : index
    %c0_144 = arith.constant 0 : index
    %c0_145 = arith.constant 0 : index
    %102 = vector.load %arg6[%c1_143, %c0_144, %c0_145] : memref<2x8x288xf32, #tpu.memory_space<vmem>>, vector<1x8x288xf32>
    %103 = vector.shape_cast %102 : vector<1x8x288xf32> to vector<8x288xf32>
    %104 = arith.addf %103, %101 : vector<8x288xf32>
    %c1_146 = arith.constant 1 : index
    %c0_147 = arith.constant 0 : index
    %c0_148 = arith.constant 0 : index
    %105 = vector.load %arg6[%c1_146, %c0_147, %c0_148] : memref<2x8x288xf32, #tpu.memory_space<vmem>>, vector<1x8x288xf32>
    %106 = vector.shape_cast %105 : vector<1x8x288xf32> to vector<8x288xf32>
    %107 = vector.shape_cast %104 : vector<8x288xf32> to vector<1x8x288xf32>
    tpu.vector_store %arg6[%c1_146, %c0_147, %c0_148], %107 {strides = array<i32>} : memref<2x8x288xf32, #tpu.memory_space<vmem>>, vector<1x8x288xf32>,
    %c4 = arith.constant 4 : index
    %c0_149 = arith.constant 0 : index
    %c0_150 = arith.constant 0 : index
    %108 = vector.load %arg2[%c4, %c0_149, %c0_150] : memref<9x8x4xf32, #tpu.memory_space<vmem>>, vector<1x8x4xf32>
    %109 = vector.shape_cast %108 : vector<1x8x4xf32> to vector<8x4xf32>
    %c0_151 = arith.constant 0 : index
    %c0_152 = arith.constant 0 : index
    %c19_153 = arith.constant 19 : index
    %110 = vector.load %arg5[%c0_151, %c0_152, %c19_153] : memref<2x4x384xf32, #tpu.memory_space<vmem>>, vector<1x4x288xf32>
    %111 = vector.shape_cast %110 : vector<1x4x288xf32> to vector<4x288xf32>
    %cst_154 = arith.constant dense<0.000000e+00> : vector<8x288xf32>
    %112 = tpu.matmul %109, %111, %cst_154 {dimension_numbers = #tpu.dot_dimension_numbers<[1], [0], [0], [1], [0, 0, 1, 1], [], []>} : vector<8x4xf32>, vector<4x288xf32>, vector<8x288xf32> -> vector<8x288xf32>
    %c0_155 = arith.constant 0 : index
    %c0_156 = arith.constant 0 : index
    %c0_157 = arith.constant 0 : index
    %113 = vector.load %arg6[%c0_155, %c0_156, %c0_157] : memref<2x8x288xf32, #tpu.memory_space<vmem>>, vector<1x8x288xf32>
    %114 = vector.shape_cast %113 : vector<1x8x288xf32> to vector<8x288xf32>
    %115 = arith.addf %114, %112 : vector<8x288xf32>
    %c0_158 = arith.constant 0 : index
    %c0_159 = arith.constant 0 : index
    %c0_160 = arith.constant 0 : index
    %116 = vector.load %arg6[%c0_158, %c0_159, %c0_160] : memref<2x8x288xf32, #tpu.memory_space<vmem>>, vector<1x8x288xf32>
    %117 = vector.shape_cast %116 : vector<1x8x288xf32> to vector<8x288xf32>
    %118 = vector.shape_cast %115 : vector<8x288xf32> to vector<1x8x288xf32>
    tpu.vector_store %arg6[%c0_158, %c0_159, %c0_160], %118 {strides = array<i32>} : memref<2x8x288xf32, #tpu.memory_space<vmem>>, vector<1x8x288xf32>,
    %c1_161 = arith.constant 1 : index
    %c0_162 = arith.constant 0 : index
    %c19_163 = arith.constant 19 : index
    %119 = vector.load %arg5[%c1_161, %c0_162, %c19_163] : memref<2x4x384xf32, #tpu.memory_space<vmem>>, vector<1x4x288xf32>
    %120 = vector.shape_cast %119 : vector<1x4x288xf32> to vector<4x288xf32>
    %cst_164 = arith.constant dense<0.000000e+00> : vector<8x288xf32>
    %121 = tpu.matmul %109, %120, %cst_164 {dimension_numbers = #tpu.dot_dimension_numbers<[1], [0], [0], [1], [0, 0, 1, 1], [], []>} : vector<8x4xf32>, vector<4x288xf32>, vector<8x288xf32> -> vector<8x288xf32>
    %c1_165 = arith.constant 1 : index
    %c0_166 = arith.constant 0 : index
    %c0_167 = arith.constant 0 : index
    %122 = vector.load %arg6[%c1_165, %c0_166, %c0_167] : memref<2x8x288xf32, #tpu.memory_space<vmem>>, vector<1x8x288xf32>
    %123 = vector.shape_cast %122 : vector<1x8x288xf32> to vector<8x288xf32>
    %124 = arith.addf %123, %121 : vector<8x288xf32>
    %c1_168 = arith.constant 1 : index
    %c0_169 = arith.constant 0 : index
    %c0_170 = arith.constant 0 : index
    %125 = vector.load %arg6[%c1_168, %c0_169, %c0_170] : memref<2x8x288xf32, #tpu.memory_space<vmem>>, vector<1x8x288xf32>
    %126 = vector.shape_cast %125 : vector<1x8x288xf32> to vector<8x288xf32>
    %127 = vector.shape_cast %124 : vector<8x288xf32> to vector<1x8x288xf32>
    tpu.vector_store %arg6[%c1_168, %c0_169, %c0_170], %127 {strides = array<i32>} : memref<2x8x288xf32, #tpu.memory_space<vmem>>, vector<1x8x288xf32>,
    %c5 = arith.constant 5 : index
    %c0_171 = arith.constant 0 : index
    %c0_172 = arith.constant 0 : index
    %128 = vector.load %arg2[%c5, %c0_171, %c0_172] : memref<9x8x4xf32, #tpu.memory_space<vmem>>, vector<1x8x4xf32>
    %129 = vector.shape_cast %128 : vector<1x8x4xf32> to vector<8x4xf32>
    %c0_173 = arith.constant 0 : index
    %c0_174 = arith.constant 0 : index
    %c20 = arith.constant 20 : index
    %130 = vector.load %arg5[%c0_173, %c0_174, %c20] : memref<2x4x384xf32, #tpu.memory_space<vmem>>, vector<1x4x288xf32>
    %131 = vector.shape_cast %130 : vector<1x4x288xf32> to vector<4x288xf32>
    %cst_175 = arith.constant dense<0.000000e+00> : vector<8x288xf32>
    %132 = tpu.matmul %129, %131, %cst_175 {dimension_numbers = #tpu.dot_dimension_numbers<[1], [0], [0], [1], [0, 0, 1, 1], [], []>} : vector<8x4xf32>, vector<4x288xf32>, vector<8x288xf32> -> vector<8x288xf32>
    %c0_176 = arith.constant 0 : index
    %c0_177 = arith.constant 0 : index
    %c0_178 = arith.constant 0 : index
    %133 = vector.load %arg6[%c0_176, %c0_177, %c0_178] : memref<2x8x288xf32, #tpu.memory_space<vmem>>, vector<1x8x288xf32>
    %134 = vector.shape_cast %133 : vector<1x8x288xf32> to vector<8x288xf32>
    %135 = arith.addf %134, %132 : vector<8x288xf32>
    %c0_179 = arith.constant 0 : index
    %c0_180 = arith.constant 0 : index
    %c0_181 = arith.constant 0 : index
    %136 = vector.load %arg6[%c0_179, %c0_180, %c0_181] : memref<2x8x288xf32, #tpu.memory_space<vmem>>, vector<1x8x288xf32>
    %137 = vector.shape_cast %136 : vector<1x8x288xf32> to vector<8x288xf32>
    %138 = vector.shape_cast %135 : vector<8x288xf32> to vector<1x8x288xf32>
    tpu.vector_store %arg6[%c0_179, %c0_180, %c0_181], %138 {strides = array<i32>} : memref<2x8x288xf32, #tpu.memory_space<vmem>>, vector<1x8x288xf32>,
    %c1_182 = arith.constant 1 : index
    %c0_183 = arith.constant 0 : index
    %c20_184 = arith.constant 20 : index
    %139 = vector.load %arg5[%c1_182, %c0_183, %c20_184] : memref<2x4x384xf32, #tpu.memory_space<vmem>>, vector<1x4x288xf32>
    %140 = vector.shape_cast %139 : vector<1x4x288xf32> to vector<4x288xf32>
    %cst_185 = arith.constant dense<0.000000e+00> : vector<8x288xf32>
    %141 = tpu.matmul %129, %140, %cst_185 {dimension_numbers = #tpu.dot_dimension_numbers<[1], [0], [0], [1], [0, 0, 1, 1], [], []>} : vector<8x4xf32>, vector<4x288xf32>, vector<8x288xf32> -> vector<8x288xf32>
    %c1_186 = arith.constant 1 : index
    %c0_187 = arith.constant 0 : index
    %c0_188 = arith.constant 0 : index
    %142 = vector.load %arg6[%c1_186, %c0_187, %c0_188] : memref<2x8x288xf32, #tpu.memory_space<vmem>>, vector<1x8x288xf32>
    %143 = vector.shape_cast %142 : vector<1x8x288xf32> to vector<8x288xf32>
    %144 = arith.addf %143, %141 : vector<8x288xf32>
    %c1_189 = arith.constant 1 : index
    %c0_190 = arith.constant 0 : index
    %c0_191 = arith.constant 0 : index
    %145 = vector.load %arg6[%c1_189, %c0_190, %c0_191] : memref<2x8x288xf32, #tpu.memory_space<vmem>>, vector<1x8x288xf32>
    %146 = vector.shape_cast %145 : vector<1x8x288xf32> to vector<8x288xf32>
    %147 = vector.shape_cast %144 : vector<8x288xf32> to vector<1x8x288xf32>
    tpu.vector_store %arg6[%c1_189, %c0_190, %c0_191], %147 {strides = array<i32>} : memref<2x8x288xf32, #tpu.memory_space<vmem>>, vector<1x8x288xf32>,
    %c6 = arith.constant 6 : index
    %c0_192 = arith.constant 0 : index
    %c0_193 = arith.constant 0 : index
    %148 = vector.load %arg2[%c6, %c0_192, %c0_193] : memref<9x8x4xf32, #tpu.memory_space<vmem>>, vector<1x8x4xf32>
    %149 = vector.shape_cast %148 : vector<1x8x4xf32> to vector<8x4xf32>
    %c0_194 = arith.constant 0 : index
    %c0_195 = arith.constant 0 : index
    %c36 = arith.constant 36 : index
    %150 = vector.load %arg5[%c0_194, %c0_195, %c36] : memref<2x4x384xf32, #tpu.memory_space<vmem>>, vector<1x4x288xf32>
    %151 = vector.shape_cast %150 : vector<1x4x288xf32> to vector<4x288xf32>
    %cst_196 = arith.constant dense<0.000000e+00> : vector<8x288xf32>
    %152 = tpu.matmul %149, %151, %cst_196 {dimension_numbers = #tpu.dot_dimension_numbers<[1], [0], [0], [1], [0, 0, 1, 1], [], []>} : vector<8x4xf32>, vector<4x288xf32>, vector<8x288xf32> -> vector<8x288xf32>
    %c0_197 = arith.constant 0 : index
    %c0_198 = arith.constant 0 : index
    %c0_199 = arith.constant 0 : index
    %153 = vector.load %arg6[%c0_197, %c0_198, %c0_199] : memref<2x8x288xf32, #tpu.memory_space<vmem>>, vector<1x8x288xf32>
    %154 = vector.shape_cast %153 : vector<1x8x288xf32> to vector<8x288xf32>
    %155 = arith.addf %154, %152 : vector<8x288xf32>
    %c0_200 = arith.constant 0 : index
    %c0_201 = arith.constant 0 : index
    %c0_202 = arith.constant 0 : index
    %156 = vector.load %arg6[%c0_200, %c0_201, %c0_202] : memref<2x8x288xf32, #tpu.memory_space<vmem>>, vector<1x8x288xf32>
    %157 = vector.shape_cast %156 : vector<1x8x288xf32> to vector<8x288xf32>
    %158 = vector.shape_cast %155 : vector<8x288xf32> to vector<1x8x288xf32>
    tpu.vector_store %arg6[%c0_200, %c0_201, %c0_202], %158 {strides = array<i32>} : memref<2x8x288xf32, #tpu.memory_space<vmem>>, vector<1x8x288xf32>,
    %c1_203 = arith.constant 1 : index
    %c0_204 = arith.constant 0 : index
    %c36_205 = arith.constant 36 : index
    %159 = vector.load %arg5[%c1_203, %c0_204, %c36_205] : memref<2x4x384xf32, #tpu.memory_space<vmem>>, vector<1x4x288xf32>
    %160 = vector.shape_cast %159 : vector<1x4x288xf32> to vector<4x288xf32>
    %cst_206 = arith.constant dense<0.000000e+00> : vector<8x288xf32>
    %161 = tpu.matmul %149, %160, %cst_206 {dimension_numbers = #tpu.dot_dimension_numbers<[1], [0], [0], [1], [0, 0, 1, 1], [], []>} : vector<8x4xf32>, vector<4x288xf32>, vector<8x288xf32> -> vector<8x288xf32>
    %c1_207 = arith.constant 1 : index
    %c0_208 = arith.constant 0 : index
    %c0_209 = arith.constant 0 : index
    %162 = vector.load %arg6[%c1_207, %c0_208, %c0_209] : memref<2x8x288xf32, #tpu.memory_space<vmem>>, vector<1x8x288xf32>
    %163 = vector.shape_cast %162 : vector<1x8x288xf32> to vector<8x288xf32>
    %164 = arith.addf %163, %161 : vector<8x288xf32>
    %c1_210 = arith.constant 1 : index
    %c0_211 = arith.constant 0 : index
    %c0_212 = arith.constant 0 : index
    %165 = vector.load %arg6[%c1_210, %c0_211, %c0_212] : memref<2x8x288xf32, #tpu.memory_space<vmem>>, vector<1x8x288xf32>
    %166 = vector.shape_cast %165 : vector<1x8x288xf32> to vector<8x288xf32>
    %167 = vector.shape_cast %164 : vector<8x288xf32> to vector<1x8x288xf32>
    tpu.vector_store %arg6[%c1_210, %c0_211, %c0_212], %167 {strides = array<i32>} : memref<2x8x288xf32, #tpu.memory_space<vmem>>, vector<1x8x288xf32>,
    %c7 = arith.constant 7 : index
    %c0_213 = arith.constant 0 : index
    %c0_214 = arith.constant 0 : index
    %168 = vector.load %arg2[%c7, %c0_213, %c0_214] : memref<9x8x4xf32, #tpu.memory_space<vmem>>, vector<1x8x4xf32>
    %169 = vector.shape_cast %168 : vector<1x8x4xf32> to vector<8x4xf32>
    %c0_215 = arith.constant 0 : index
    %c0_216 = arith.constant 0 : index
    %c37_217 = arith.constant 37 : index
    %170 = vector.load %arg5[%c0_215, %c0_216, %c37_217] : memref<2x4x384xf32, #tpu.memory_space<vmem>>, vector<1x4x288xf32>
    %171 = vector.shape_cast %170 : vector<1x4x288xf32> to vector<4x288xf32>
    %cst_218 = arith.constant dense<0.000000e+00> : vector<8x288xf32>
    %172 = tpu.matmul %169, %171, %cst_218 {dimension_numbers = #tpu.dot_dimension_numbers<[1], [0], [0], [1], [0, 0, 1, 1], [], []>} : vector<8x4xf32>, vector<4x288xf32>, vector<8x288xf32> -> vector<8x288xf32>
    %c0_219 = arith.constant 0 : index
    %c0_220 = arith.constant 0 : index
    %c0_221 = arith.constant 0 : index
    %173 = vector.load %arg6[%c0_219, %c0_220, %c0_221] : memref<2x8x288xf32, #tpu.memory_space<vmem>>, vector<1x8x288xf32>
    %174 = vector.shape_cast %173 : vector<1x8x288xf32> to vector<8x288xf32>
    %175 = arith.addf %174, %172 : vector<8x288xf32>
    %c0_222 = arith.constant 0 : index
    %c0_223 = arith.constant 0 : index
    %c0_224 = arith.constant 0 : index
    %176 = vector.load %arg6[%c0_222, %c0_223, %c0_224] : memref<2x8x288xf32, #tpu.memory_space<vmem>>, vector<1x8x288xf32>
    %177 = vector.shape_cast %176 : vector<1x8x288xf32> to vector<8x288xf32>
    %178 = vector.shape_cast %175 : vector<8x288xf32> to vector<1x8x288xf32>
    tpu.vector_store %arg6[%c0_222, %c0_223, %c0_224], %178 {strides = array<i32>} : memref<2x8x288xf32, #tpu.memory_space<vmem>>, vector<1x8x288xf32>,
    %c1_225 = arith.constant 1 : index
    %c0_226 = arith.constant 0 : index
    %c37_227 = arith.constant 37 : index
    %179 = vector.load %arg5[%c1_225, %c0_226, %c37_227] : memref<2x4x384xf32, #tpu.memory_space<vmem>>, vector<1x4x288xf32>
    %180 = vector.shape_cast %179 : vector<1x4x288xf32> to vector<4x288xf32>
    %cst_228 = arith.constant dense<0.000000e+00> : vector<8x288xf32>
    %181 = tpu.matmul %169, %180, %cst_228 {dimension_numbers = #tpu.dot_dimension_numbers<[1], [0], [0], [1], [0, 0, 1, 1], [], []>} : vector<8x4xf32>, vector<4x288xf32>, vector<8x288xf32> -> vector<8x288xf32>
    %c1_229 = arith.constant 1 : index
    %c0_230 = arith.constant 0 : index
    %c0_231 = arith.constant 0 : index
    %182 = vector.load %arg6[%c1_229, %c0_230, %c0_231] : memref<2x8x288xf32, #tpu.memory_space<vmem>>, vector<1x8x288xf32>
    %183 = vector.shape_cast %182 : vector<1x8x288xf32> to vector<8x288xf32>
    %184 = arith.addf %183, %181 : vector<8x288xf32>
    %c1_232 = arith.constant 1 : index
    %c0_233 = arith.constant 0 : index
    %c0_234 = arith.constant 0 : index
    %185 = vector.load %arg6[%c1_232, %c0_233, %c0_234] : memref<2x8x288xf32, #tpu.memory_space<vmem>>, vector<1x8x288xf32>
    %186 = vector.shape_cast %185 : vector<1x8x288xf32> to vector<8x288xf32>
    %187 = vector.shape_cast %184 : vector<8x288xf32> to vector<1x8x288xf32>
    tpu.vector_store %arg6[%c1_232, %c0_233, %c0_234], %187 {strides = array<i32>} : memref<2x8x288xf32, #tpu.memory_space<vmem>>, vector<1x8x288xf32>,
    %c8 = arith.constant 8 : index
    %c0_235 = arith.constant 0 : index
    %c0_236 = arith.constant 0 : index
    %188 = vector.load %arg2[%c8, %c0_235, %c0_236] : memref<9x8x4xf32, #tpu.memory_space<vmem>>, vector<1x8x4xf32>
    %189 = vector.shape_cast %188 : vector<1x8x4xf32> to vector<8x4xf32>
    %c0_237 = arith.constant 0 : index
    %c0_238 = arith.constant 0 : index
    %c38 = arith.constant 38 : index
    %190 = vector.load %arg5[%c0_237, %c0_238, %c38] : memref<2x4x384xf32, #tpu.memory_space<vmem>>, vector<1x4x288xf32>
    %191 = vector.shape_cast %190 : vector<1x4x288xf32> to vector<4x288xf32>
    %cst_239 = arith.constant dense<0.000000e+00> : vector<8x288xf32>
    %192 = tpu.matmul %189, %191, %cst_239 {dimension_numbers = #tpu.dot_dimension_numbers<[1], [0], [0], [1], [0, 0, 1, 1], [], []>} : vector<8x4xf32>, vector<4x288xf32>, vector<8x288xf32> -> vector<8x288xf32>
    %c0_240 = arith.constant 0 : index
    %c0_241 = arith.constant 0 : index
    %c0_242 = arith.constant 0 : index
    %193 = vector.load %arg6[%c0_240, %c0_241, %c0_242] : memref<2x8x288xf32, #tpu.memory_space<vmem>>, vector<1x8x288xf32>
    %194 = vector.shape_cast %193 : vector<1x8x288xf32> to vector<8x288xf32>
    %195 = arith.addf %194, %192 : vector<8x288xf32>
    %c0_243 = arith.constant 0 : index
    %c0_244 = arith.constant 0 : index
    %c0_245 = arith.constant 0 : index
    %196 = vector.load %arg6[%c0_243, %c0_244, %c0_245] : memref<2x8x288xf32, #tpu.memory_space<vmem>>, vector<1x8x288xf32>
    %197 = vector.shape_cast %196 : vector<1x8x288xf32> to vector<8x288xf32>
    %198 = vector.shape_cast %195 : vector<8x288xf32> to vector<1x8x288xf32>
    tpu.vector_store %arg6[%c0_243, %c0_244, %c0_245], %198 {strides = array<i32>} : memref<2x8x288xf32, #tpu.memory_space<vmem>>, vector<1x8x288xf32>,
    %c1_246 = arith.constant 1 : index
    %c0_247 = arith.constant 0 : index
    %c38_248 = arith.constant 38 : index
    %199 = vector.load %arg5[%c1_246, %c0_247, %c38_248] : memref<2x4x384xf32, #tpu.memory_space<vmem>>, vector<1x4x288xf32>
    %200 = vector.shape_cast %199 : vector<1x4x288xf32> to vector<4x288xf32>
    %cst_249 = arith.constant dense<0.000000e+00> : vector<8x288xf32>
    %201 = tpu.matmul %189, %200, %cst_249 {dimension_numbers = #tpu.dot_dimension_numbers<[1], [0], [0], [1], [0, 0, 1, 1], [], []>} : vector<8x4xf32>, vector<4x288xf32>, vector<8x288xf32> -> vector<8x288xf32>
    %c1_250 = arith.constant 1 : index
    %c0_251 = arith.constant 0 : index
    %c0_252 = arith.constant 0 : index
    %202 = vector.load %arg6[%c1_250, %c0_251, %c0_252] : memref<2x8x288xf32, #tpu.memory_space<vmem>>, vector<1x8x288xf32>
    %203 = vector.shape_cast %202 : vector<1x8x288xf32> to vector<8x288xf32>
    %204 = arith.addf %203, %201 : vector<8x288xf32>
    %c1_253 = arith.constant 1 : index
    %c0_254 = arith.constant 0 : index
    %c0_255 = arith.constant 0 : index
    %205 = vector.load %arg6[%c1_253, %c0_254, %c0_255] : memref<2x8x288xf32, #tpu.memory_space<vmem>>, vector<1x8x288xf32>
    %206 = vector.shape_cast %205 : vector<1x8x288xf32> to vector<8x288xf32>
    %207 = vector.shape_cast %204 : vector<8x288xf32> to vector<1x8x288xf32>
    tpu.vector_store %arg6[%c1_253, %c0_254, %c0_255], %207 {strides = array<i32>} : memref<2x8x288xf32, #tpu.memory_space<vmem>>, vector<1x8x288xf32>,
    %c0_256 = arith.constant 0 : index
    %c0_257 = arith.constant 0 : index
    %c0_258 = arith.constant 0 : index
    %208 = vector.load %arg6[%c0_256, %c0_257, %c0_258] : memref<2x8x288xf32, #tpu.memory_space<vmem>>, vector<1x8x288xf32>
    %209 = vector.shape_cast %208 : vector<1x8x288xf32> to vector<8x288xf32>
    %210 = vector.shape_cast %209 : vector<8x288xf32> to vector<8x16x18xf32>
    %211 = vector.extract_strided_slice %210 {offsets = [0, 0, 0], sizes = [8, 16, 16], strides = [1, 1, 1]} : vector<8x16x18xf32> to vector<8x16x16xf32>
    %212 = vector.shape_cast %211 : vector<8x16x16xf32> to vector<8x256xf32>
    %c0_259 = arith.constant 0 : index
    %c0_260 = arith.constant 0 : index
    %213 = vector.load %arg3[%c0_259, %c0_260] : memref<8x1xf32, #tpu.memory_space<vmem>>, vector<8x1xf32>
    %214 = vector.broadcast %213 : vector<8x1xf32> to vector<8x256xf32>
    %215 = arith.addf %212, %214 : vector<8x256xf32>
    %cst_261 = arith.constant 0.000000e+00 : f32
    %216 = vector.broadcast %cst_261 : f32 to vector<8x256xf32>
    %217 = arith.maximumf %215, %216 : vector<8x256xf32>
    %c0_262 = arith.constant 0 : index
    %c0_263 = arith.constant 0 : index
    %c0_264 = arith.constant 0 : index
    %218 = vector.load %arg4[%c0_262, %c0_263, %c0_264] : memref<2x8x256xf32, #tpu.memory_space<vmem>>, vector<1x8x256xf32>
    %219 = vector.shape_cast %218 : vector<1x8x256xf32> to vector<8x256xf32>
    %220 = vector.shape_cast %217 : vector<8x256xf32> to vector<1x8x256xf32>
    tpu.vector_store %arg4[%c0_262, %c0_263, %c0_264], %220 {strides = array<i32>} : memref<2x8x256xf32, #tpu.memory_space<vmem>>, vector<1x8x256xf32>,
    %c1_265 = arith.constant 1 : index
    %c0_266 = arith.constant 0 : index
    %c0_267 = arith.constant 0 : index
    %221 = vector.load %arg6[%c1_265, %c0_266, %c0_267] : memref<2x8x288xf32, #tpu.memory_space<vmem>>, vector<1x8x288xf32>
    %222 = vector.shape_cast %221 : vector<1x8x288xf32> to vector<8x288xf32>
    %223 = vector.shape_cast %222 : vector<8x288xf32> to vector<8x16x18xf32>
    %224 = vector.extract_strided_slice %223 {offsets = [0, 0, 0], sizes = [8, 16, 16], strides = [1, 1, 1]} : vector<8x16x18xf32> to vector<8x16x16xf32>
    %225 = vector.shape_cast %224 : vector<8x16x16xf32> to vector<8x256xf32>
    %c0_268 = arith.constant 0 : index
    %c0_269 = arith.constant 0 : index
    %226 = vector.load %arg3[%c0_268, %c0_269] : memref<8x1xf32, #tpu.memory_space<vmem>>, vector<8x1xf32>
    %227 = vector.broadcast %226 : vector<8x1xf32> to vector<8x256xf32>
    %228 = arith.addf %225, %227 : vector<8x256xf32>
    %cst_270 = arith.constant 0.000000e+00 : f32
    %229 = vector.broadcast %cst_270 : f32 to vector<8x256xf32>
    %230 = arith.maximumf %228, %229 : vector<8x256xf32>
    %c1_271 = arith.constant 1 : index
    %c0_272 = arith.constant 0 : index
    %c0_273 = arith.constant 0 : index
    %231 = vector.load %arg4[%c1_271, %c0_272, %c0_273] : memref<2x8x256xf32, #tpu.memory_space<vmem>>, vector<1x8x256xf32>
    %232 = vector.shape_cast %231 : vector<1x8x256xf32> to vector<8x256xf32>
    %233 = vector.shape_cast %230 : vector<8x256xf32> to vector<1x8x256xf32>
    tpu.vector_store %arg4[%c1_271, %c0_272, %c0_273], %233 {strides = array<i32>} : memref<2x8x256xf32, #tpu.memory_space<vmem>>, vector<1x8x256xf32>,
    return
  }
  func.func @transform_0(%arg0: i32) -> (i32, i32, i32) {
    %c0_i32 = arith.constant 0 : i32
    %c0_i32_0 = arith.constant 0 : i32
    %c0_i32_1 = arith.constant 0 : i32
    return %arg0, %c0_i32, %c0_i32_0 : i32, i32, i32
  }
  func.func @transform_1(%arg0: i32) -> (i32, i32, i32) {
    %c0_i32 = arith.constant 0 : i32
    %c0_i32_0 = arith.constant 0 : i32
    %c0_i32_1 = arith.constant 0 : i32
    %c0_i32_2 = arith.constant 0 : i32
    return %c0_i32, %c0_i32_0, %c0_i32_1 : i32, i32, i32
  }
  func.func @transform_2(%arg0: i32) -> (i32, i32) {
    %c0_i32 = arith.constant 0 : i32
    %c0_i32_0 = arith.constant 0 : i32
    %c0_i32_1 = arith.constant 0 : i32
    return %c0_i32, %c0_i32_0 : i32, i32
  }
  func.func @transform_3(%arg0: i32) -> (i32, i32, i32) {
    %c0_i32 = arith.constant 0 : i32
    %c0_i32_0 = arith.constant 0 : i32
    %c0_i32_1 = arith.constant 0 : i32
    return %arg0, %c0_i32, %c0_i32_0 : i32, i32, i32
  }
}

</mosaic_0001>

<bundles_post_ra>
// kernel: tpu_custom_call.1
= control target key start
LH: loop header
LB: loop body
LE: loop exit
PB: predicated region body
PF: predicated region fallthrough
CT: control target
= control target key end

     0   :  { %s3338_s16 = smov 23   ;;  %s3339_s17 = smov 19   ;;  %s4541_s0 = inlined_call_operand.vmem [shape: f32[2,4,256], index: 0, kind: input, shape index: {}]   ;;  %s4542_s1 = inlined_call_operand.vmem [shape: f32[9,8,4], index: 1, kind: input, shape index: {}]   ;;  %s4543_s2 = inlined_call_operand.vmem [shape: f32[8,1], index: 2, kind: input, shape index: {}]   ;;  %s4544_s3 = inlined_call_operand.hbm [shape: f32[2,8,256], index: 3, kind: output, shape index: {}]  }
   0x1   :  { %v45_v0 = vld [vmem:[%s4541_s0] sm:$0xf]  ;;  %s3340_s22 = smov 31  }
   0x2   :  { %v19_v1 = vld [vmem:[%s4541_s0] sm:$0xf]  ;;  %49 = vrot.lane.b32.xlu1 %v45_v0, %s3338_s16 }
   0x3   :  { %23 = vrot.lane.b32.xlu0 %v19_v1, %s3339_s17  ;;  %v97_v2 = vld [vmem:[%s4541_s0] sm:$0xf] }
   0x4   :  { %v58_v3 = vld [vmem:[%s4541_s0] sm:$0xf]  ;;  %101 = vrot.lane.b32.xlu2 %v97_v2, %s3340_s22 }
   0x5   :  { %v32_v4 = vld [vmem:[%s4541_s0] sm:$0xf] }
   0x6   :  { %8 = vsyncpa [#allocation5], 0  ;;  %s3341_s25 = smov 25   ;;  %s3342_s26 = smov 21   ;;  %v71_v5 = vld [vmem:[%s4541_s0] sm:$0xf] }
   0x7   :  { %s3343_s29 = smov 27   ;;  %v117_v6 = vld [vmem:[%s4541_s0] sm:$0xf]  ;;  %s3344_s7 = smov 33   ;;  %v20_v8 = vld [vmem:[%s4541_s0 + $0x8] sm:$0xf] }
   0x8   :  { %v84_v7 = vld [vmem:[%s4541_s0] sm:$0xf]  ;;  %s3345_s8 = smov 29   ;;  %v33_v9 = vld [vmem:[%s4541_s0 + $0x8] sm:$0xf]  ;;  %s3346_s15 = smov 35  }
   0x9   :  { %v130_v10 = vld [vmem:[%s4541_s0 + $0x4] sm:$0xf]  ;;  %s3347_s20 = smov 37   ;;  %v46_v13 = vld [vmem:[%s4541_s0 + $0x8] sm:$0xf]  ;;  %s3348_s27 = smov 39  }
   0xa   :  { %62 = vrot.lane.b32.xlu1 %v58_v3, %s3341_s25  ;;  %v143_v11 = vld [vmem:[%s4541_s0 + $0x4] sm:$0xf]  ;;  %s3349_s30 = smov 45   ;;  %v98_v15 = vld [vmem:[%s4541_s0 + $0x8] sm:$0xf]  ;;  %s3350_s11 = smov 41  }
   0xb   :  { %36 = vrot.lane.b32.xlu0 %v32_v4, %s3342_s26  ;;  %v156_v12 = vld [vmem:[%s4541_s0 + $0x4] sm:$0xf]  ;;  %v59_v16 = vld [vmem:[%s4541_s0 + $0x8] sm:$0xf]  ;;  %s3351_s19 = smov 43   ;;  %s3353_s12 = smov 49  }
   0xc   :  { %75 = vrot.lane.b32.xlu2 %v71_v5, %s3343_s29  ;;  %v195_v14 = vld [vmem:[%s4541_s0 + $0x4] sm:$0xf]  ;;  %v72_v19 = vld [vmem:[%s4541_s0 + $0x8] sm:$0xf]  ;;  %v131_v21 = vld [vmem:[%s4541_s0 + $0xc] sm:$0xf] }
   0xd   :  { %v169_v17 = vld [vmem:[%s4541_s0 + $0x4] sm:$0xf]  ;;  %v85_v20 = vld [vmem:[%s4541_s0 + $0x8] sm:$0xf]  ;;  %v144_v23 = vld [vmem:[%s4541_s0 + $0xc] sm:$0xf] }
   0xe   :  { %v182_v18 = vld [vmem:[%s4541_s0 + $0x4] sm:$0xf]  ;;  %v118_v22 = vld [vmem:[%s4541_s0 + $0x8] sm:$0xf]  ;;  %v196_v24 = vld [vmem:[%s4541_s0 + $0xc] sm:$0xf] }
   0xf   :  { %v157_v25 = vld [vmem:[%s4541_s0 + $0xc] sm:$0xf]  ;;  %v215_v26 = vld [vmem:[%s4541_s0 + $0x4] sm:$0xf]  ;;  %v3354_v32 = vmov 0.0   ;;  %vm29_vm0 = vcmask 281752  }
  0x10   :  { %v170_v27 = vld [vmem:[%s4541_s0 + $0xc] sm:$0xf]  ;;  %v228_v28 = vld [vmem:[%s4541_s0 + $0x4] sm:$0xf]  ;;  %15 = vst [vmem:[#allocation2] sm:$0xff] %v3354_v32  ;;  %vm42_vm1 = vcmask 429352  }
  0x11   :  { %v183_v29 = vld [vmem:[%s4541_s0 + $0xc] sm:$0xf]  ;;  %16 = vst [vmem:[#allocation2 + $0x8] sm:$0xf] %v3354_v32  ;;  %vm55_vm2 = vcmask 576952   ;;  %vm68_vm3 = vcmask 724552  }
  0x12   :  { %121 = vrot.lane.b32.xlu1 %v117_v6, %s3344_s7  ;;  %v216_v30 = vld [vmem:[%s4541_s0 + $0xc] sm:$0xf]  ;;  %17 = vst [vmem:[#allocation2 + $0xc] sm:$0xff] %v3354_v32  ;;  %vm81_vm4 = vcmask 872152   ;;  %vm112_vm5 = vcmask 1044472   ;;  %vm113_vm6 = vcmask 121860  }
  0x13   :  { %88 = vrot.lane.b32.xlu0 %v84_v7, %s3345_s8  ;;  %v229_v31 = vld [vmem:[%s4541_s0 + $0xc] sm:$0xf]  ;;  %18 = vst [vmem:[#allocation2 + $0x14] sm:$0xf] %v3354_v32  ;;  %vm107_vm7 = vcmask 252928   ;;  %vm94_vm8 = vcmask 1019752   ;;  %vm3519_vm9 = vmor %vm113_vm6, %vm112_vm5 }
  0x14   :  { %25 = vrot.lane.b32.xlu2 %v20_v8, %s3339_s17  ;;  %vm127_vm10 = vcmask 265352   ;;  %vm140_vm11 = vcmask 412952   ;;  %vm153_vm12 = vcmask 560552   ;;  %vm166_vm13 = vcmask 708152   ;;  %s3355_s0 = smov 127   ;;  %s3359_s21 = smov 108  }
  0x15   :  { %vm179_vm14 = vcmask 855752   ;;  %vm210_vm15 = vcmask 1044456   ;;  %vm192_vm5 = vcmask 1003352   ;;  %s3360_s23 = smov 92   ;;  %s3362_s28 = smov 90  }
  0x16   :  { %s3369_s17 = smov 2   ;;  %s3370_s24 = smov 58  }
  0x17   :  { %s3374_s4 = smov 22   ;;  %s3376_s5 = smov 114  }
  0x18   :  { %s3381_s6 = smov 32   ;;  %s3382_s9 = smov 64  }
  0x19   :  { %s3385_s13 = smov [#allocation4]  }
  0x1a   :  { %38 = vrot.lane.b32.xlu1 %v33_v9, %s3342_s26  ;;  %s3361_s26 = smov 91  }
  0x1b   :  { %134 = vrot.lane.b32.xlu0 %v130_v10, %s3346_s15 }
  0x1c   :  { %147 = vrot.lane.b32.xlu2 %v143_v11, %s3347_s20 }
  0x22   :  { %160 = vrot.lane.b32.xlu1 %v156_v12, %s3348_s27 }
  0x23   :  { %51 = vrot.lane.b32.xlu0 %v46_v13, %s3338_s16 }
  0x24   :  { %199 = vrot.lane.b32.xlu2 %v195_v14, %s3349_s30 }
  0x2a   :  { %103 = vrot.lane.b32.xlu1 %v98_v15, %s3340_s22  ;;  %s3364_s22 = smov 74  }
  0x2b   :  { %64 = vrot.lane.b32.xlu0 %v59_v16, %s3341_s25  ;;  %s3358_s25 = smov 109  }
  0x2c   :  { %173 = vrot.lane.b32.xlu2 %v169_v17, %s3350_s11 }
  0x32   :  { %186 = vrot.lane.b32.xlu1 %v182_v18, %s3351_s19 }
  0x33   :  { %77 = vrot.lane.b32.xlu0 %v72_v19, %s3343_s29  ;;  %s3373_s29 = smov 4  }
  0x34   :  { %90 = vrot.lane.b32.xlu2 %v85_v20, %s3345_s8  ;;  %s3375_s8 = smov 40  }
  0x3a   :  { %136 = vrot.lane.b32.xlu1 %v131_v21, %s3346_s15  ;;  %s3384_s15 = smov 80  }
  0x3b   :  { %123 = vrot.lane.b32.xlu0 %v118_v22, %s3344_s7  ;;  %s3352_s7 = smov 47  }
  0x3c   :  { %149 = vrot.lane.b32.xlu2 %v144_v23, %s3347_s20 }
  0x42   :  { %201 = vrot.lane.b32.xlu1 %v196_v24, %s3349_s30  ;;  %s3131_s30 = sshll.u32 %s3385_s13, 4  ;;  %s3132_s30 = int_to_ptr.vmem [resolvable:$true] %s3131_s30 }
  0x43   :  { %162 = vrot.lane.b32.xlu0 %v157_v25, %s3348_s27  ;;  %s3386_s27 = smov 256  }
  0x44   :  { %219 = vrot.lane.b32.xlu2 %v215_v26, %s3352_s7 }
  0x4a   :  { %232 = vrot.lane.b32.xlu1 %v228_v28, %s3353_s12 }
  0x4b   :  { %175 = vrot.lane.b32.xlu0 %v170_v27, %s3350_s11  ;;  %s3356_s11 = smov 126  }
  0x4c   :  { %188 = vrot.lane.b32.xlu2 %v183_v29, %s3351_s19  ;;  %s3357_s19 = smov 110  }
  0x52   :  { %234 = vrot.lane.b32.xlu1 %v229_v31, %s3353_s12  ;;  %s3133_s12 = sshll.u32 %s4544_s3, 4  ;;  %s3134_s12 = int_to_ptr.hbm [resolvable:$true] %s3133_s12 }
  0x53   :  { %221 = vrot.lane.b32.xlu0 %v216_v30, %s3352_s7  ;;  %s3383_s7 = smov 96  }
  0x5e   :  { %v102_v33 = vpop.permute.xlu2 %101 }
  0x5f   :  { %v105_v41 = vrot.slane %v102_v33, 4 }
  0x61   :  { %v108_v46 = vsel %vm107_vm7, %v105_v41, %v102_v33 }
  0x66   :  { %v76_v34 = vpop.permute.xlu2 %75 }
  0x6e   :  { %v26_v35 = vpop.permute.xlu2 %25 }
  0x6f   :  { %31 = vst.msk [vmem:[#allocation2 + $0xc] sm:$0xf] %vm29_vm0, %v26_v35 }
  0x74   :  { %v50_v36 = vpop.permute.xlu1 %49 }
  0x75   :  { %v24_v37 = vpop.permute.xlu0 %23 }
  0x76   :  { %30 = vst.msk [vmem:[#allocation2] sm:$0xf] %vm29_vm0, %v24_v37  ;;  %v148_v38 = vpop.permute.xlu2 %147  ;;  %vm211_vm0 = vcmask 105476  }
  0x77   :  { %vm3535_vm6 = vmor %vm211_vm0, %vm210_vm15  ;;  %vm325_vm15 = vcmask 261120   ;;  %vm1770_vm0 = vcmask 736256  }
  0x7c   :  { %v63_v39 = vpop.permute.xlu1 %62 }
  0x7d   :  { %v37_v40 = vpop.permute.xlu0 %36 }
  0x7e   :  { %43 = vst.msk [vmem:[#allocation2] sm:$0xf] %vm42_vm1, %v37_v40  ;;  %v200_v42 = vpop.permute.xlu2 %199 }
  0x7f   :  { %56 = vst.msk [vmem:[#allocation2] sm:$0xf] %vm55_vm2, %v50_v36  ;;  %v203_v56 = vrot.slane %v200_v42, 4 }
  0x80   :  { %69 = vst.msk [vmem:[#allocation2] sm:$0xf] %vm68_vm3, %v63_v39 }
  0x81   :  { %82 = vst.msk [vmem:[#allocation2] sm:$0xf] %vm81_vm4, %v76_v34 }
  0x84   :  { %v122_v44 = vpop.permute.xlu1 %121 }
  0x85   :  { %v89_v45 = vpop.permute.xlu0 %88 }
  0x86   :  { %95 = vst.msk [vmem:[#allocation2] sm:$0xf] %vm94_vm8, %v89_v45  ;;  %v174_v47 = vpop.permute.xlu2 %173 }
  0x87   :  { %115 = vst.msk [vmem:[#allocation2] sm:$0xff] %vm3519_vm9, %v108_v46 }
  0x88   :  { %128 = vst.msk [vmem:[#allocation2 + $0x4] sm:$0xf] %vm127_vm10, %v122_v44 }
  0x8c   :  { %v39_v48 = vpop.permute.xlu1 %38 }
  0x8d   :  { %v135_v49 = vpop.permute.xlu0 %134  ;;  %44 = vst.msk [vmem:[#allocation2 + $0xc] sm:$0xf] %vm42_vm1, %v39_v48  ;;  %vm205_vm1 = vcmask 367616  }
  0x8e   :  { %141 = vst.msk [vmem:[#allocation2 + $0x4] sm:$0xf] %vm140_vm11, %v135_v49  ;;  %v91_v52 = vpop.permute.xlu2 %90  ;;  %v206_v61 = vsel %vm205_vm1, %v203_v56, %v200_v42 }
  0x8f   :  { %154 = vst.msk [vmem:[#allocation2 + $0x4] sm:$0xf] %vm153_vm12, %v148_v38 }
  0x94   :  { %v161_v50 = vpop.permute.xlu1 %160 }
  0x95   :  { %v52_v51 = vpop.permute.xlu0 %51  ;;  %167 = vst.msk [vmem:[#allocation2 + $0x4] sm:$0xf] %vm166_vm13, %v161_v50 }
  0x96   :  { %57 = vst.msk [vmem:[#allocation2 + $0xc] sm:$0xf] %vm55_vm2, %v52_v51  ;;  %v150_v55 = vpop.permute.xlu2 %149  ;;  %vm225_vm2 = vcmask 248952  }
  0x97   :  { %180 = vst.msk [vmem:[#allocation2 + $0x4] sm:$0xf] %vm179_vm14, %v174_v47 }
  0x9c   :  { %v104_v53 = vpop.permute.xlu1 %103 }
  0x9d   :  { %v65_v54 = vpop.permute.xlu0 %64  ;;  %v106_v58 = vrot.slane %v104_v53, 4 }
  0x9e   :  { %70 = vst.msk [vmem:[#allocation2 + $0xc] sm:$0xf] %vm68_vm3, %v65_v54  ;;  %v220_v63 = vpop.permute.xlu2 %219  ;;  %vm256_vm3 = vcmask 1043456  }
  0x9f   :  { %v109_v62 = vsel %vm107_vm7, %v106_v58, %v104_v53  ;;  %vm252_vm7 = vcmask 31744  }
  0xa4   :  { %v187_v59 = vpop.permute.xlu1 %186 }
  0xa5   :  { %v78_v60 = vpop.permute.xlu0 %77  ;;  %193 = vst.msk [vmem:[#allocation2 + $0x4] sm:$0xf] %vm192_vm5, %v187_v59 }
  0xa6   :  { %213 = vst.msk [vmem:[#allocation2 + $0x4] sm:$0xff] %vm3535_vm6, %v206_v61  ;;  %v189_v8 = vpop.permute.xlu2 %188 }
  0xa7   :  { %83 = vst.msk [vmem:[#allocation2 + $0xc] sm:$0xf] %vm81_vm4, %v78_v60  ;;  %vm238_vm4 = vcmask 396552  }
  0xa8   :  { %96 = vst.msk [vmem:[#allocation2 + $0xc] sm:$0xf] %vm94_vm8, %v91_v52  ;;  %vm426_vm8 = vcmask 1039360  }
  0xa9   :  { %116 = vst.msk [vmem:[#allocation2 + $0xc] sm:$0xff] %vm3519_vm9, %v109_v62  ;;  %vm618_vm9 = vcmask 1031168  }
  0xaa   :  { %226 = vst.msk [vmem:[#allocation2 + $0x8] sm:$0xf] %vm225_vm2, %v220_v63 }
  0xac   :  { %v137_v0 = vpop.permute.xlu1 %136 }
  0xad   :  { %v124_v1 = vpop.permute.xlu0 %123  ;;  %v3549_v2 = vld [vmem:[#allocation2] sm:$0xff] }
  0xae   :  { %129 = vst.msk [vmem:[#allocation2 + $0x10] sm:$0xf] %vm127_vm10, %v124_v1  ;;  %vm810_vm10 = vcmask 900096  }
  0xaf   :  { %246 = vst [vmem:[#allocation1] ss:$2 sm:$0xff] %v3549_v2 }
  0xb0   :  { %142 = vst.msk [vmem:[#allocation2 + $0x10] sm:$0xf] %vm140_vm11, %v137_v0  ;;  %vm1002_vm11 = vcmask 891904  }
  0xb1   :  { %155 = vst.msk [vmem:[#allocation2 + $0x10] sm:$0xf] %vm153_vm12, %v150_v55  ;;  %vm1194_vm12 = vcmask 883712  }
  0xb4   :  { %v202_v3 = vpop.permute.xlu1 %201 }
  0xb5   :  { %v163_v4 = vpop.permute.xlu0 %162  ;;  %v204_v7 = vrot.slane %v202_v3, 4 }
  0xb6   :  { %v249_v5 = vld.sshfl [vmem:[#allocation1] sm:$0xff pattern:$0x75316420]  ;;  %v250_v6 = vld.sshfl [vmem:[#allocation1 + $0x8] sm:$0xff pattern:$0x75316420] }
  0xb7   :  { %168 = vst.msk [vmem:[#allocation2 + $0x10] sm:$0xf] %vm166_vm13, %v163_v4  ;;  %3145 = vmatpush.msk.msra.mxu0 %vm256_vm3, %v249_v5  ;;  %3147 = vmatpush.msk.msra.mxu1 %vm256_vm3, %v250_v6  ;;  %v207_v11 = vsel %vm205_vm1, %v204_v7, %v202_v3  ;;  %v241_v5 = vld [vmem:[%s4542_s1] sm:$0xff]  ;;  %vm1386_vm13 = vcmask 752640   ;;  %vm2003_vm1 = vcmask 1047556  }
  0xb8   :  { %3146 = vmatmul.msk.f32.vlgmr.msra.gmra.mxu0 %vm252_vm7, %v241_v5  ;;  %3148 = vmatmul.msk.f32.vlgmr.msra.gmra.mxu1 %vm252_vm7, %v241_v5 }
  0xbc   :  { %v233_v10 = vpop.permute.xlu1 %232 }
  0xbd   :  { %v176_v9 = vpop.permute.xlu0 %175  ;;  %239 = vst.msk [vmem:[#allocation2 + $0x8] sm:$0xf] %vm238_vm4, %v233_v10 }
  0xbe   :  { %181 = vst.msk [vmem:[#allocation2 + $0x10] sm:$0xf] %vm179_vm14, %v176_v9  ;;  %vm1578_vm14 = vcmask 744448  }
  0xbf   :  { %194 = vst.msk [vmem:[#allocation2 + $0x10] sm:$0xf] %vm192_vm5, %v189_v8  ;;  %vm1971_vm5 = vcmask 15360  }
  0xc0   :  { %214 = vst.msk [vmem:[#allocation2 + $0x10] sm:$0xff] %vm3535_vm6, %v207_v11  ;;  %vm2507_vm6 = vcmask 130048  }
  0xc4   :  { %v243_v12 = vld [vmem:[#allocation2 + $0x8] sm:$0xf]  ;;  %v235_v14 = vpop.permute.xlu1 %234 }
  0xc5   :  { %v222_v13 = vpop.permute.xlu0 %221  ;;  %248 = vst [vmem:[#allocation1 + $0x10] ss:$2 sm:$0xff] %v243_v12  ;;  %v411_v20 = vld [vmem:[#allocation2 + $0x8] sm:$0xf] }
  0xc6   :  { %227 = vst.msk [vmem:[#allocation2 + $0x14] sm:$0xf] %vm225_vm2, %v222_v13  ;;  %v603_v28 = vld [vmem:[#allocation2 + $0x8] sm:$0xf]  ;;  %vm2510_vm2 = vcmask 392192  }
  0xc7   :  { %v3564_v15 = vld [vmem:[#allocation2 + $0xc] sm:$0xff]  ;;  %240 = vst.msk [vmem:[#allocation2 + $0x14] sm:$0xf] %vm238_vm4, %v235_v14  ;;  %v795_v36 = vld [vmem:[#allocation2 + $0x8] sm:$0xf]  ;;  %vm2514_vm4 = vcmask 654336  }
  0xc8   :  { %332 = vst [vmem:[#allocation1] ss:$2 sm:$0xff] %v3564_v15  ;;  %v987_v44 = vld [vmem:[#allocation2 + $0x8] sm:$0xf] }
  0xc9   :  { %v1179_v52 = vld [vmem:[#allocation2 + $0x8] sm:$0xf] }
  0xca   :  { %v1371_v60 = vld [vmem:[#allocation2 + $0x8] sm:$0xf] }
  0xcb   :  { %v1563_v7 = vld [vmem:[#allocation2 + $0x8] sm:$0xf] }
  0xcc   :  { %v251_v16 = vld.sshfl [vmem:[#allocation1 + $0x10] sm:$0xff pattern:$0x75316420] }
  0xcd   :  { %3149 = vmatpush.msk.msra.mxu2 %vm256_vm3, %v251_v16 }
  0xce   :  { %v329_v19 = vld [vmem:[#allocation2 + $0x14] sm:$0xf]  ;;  %3150 = vmatmul.msk.f32.vlgmr.msra.gmra.mxu2 %vm252_vm7, %v241_v5 }
  0xcf   :  { %v335_v17 = vld.sshfl [vmem:[#allocation1] sm:$0xff pattern:$0x75316420]  ;;  %v336_v18 = vld.sshfl [vmem:[#allocation1 + $0x8] sm:$0xff pattern:$0x75316420] }
  0xd0   :  { %414 = vst [vmem:[#allocation1] ss:$2 sm:$0xff] %v3549_v2  ;;  %3151 = vmatpush.msk.msra.mxu3 %vm256_vm3, %v335_v17  ;;  %3153 = vmatpush.msk.msrb.mxu0 %vm256_vm3, %v336_v18  ;;  %v508_v24 = vld [vmem:[#allocation2 + $0x14] sm:$0xf]  ;;  %v1755_v17 = vld [vmem:[#allocation2 + $0x8] sm:$0xf] }
  0xd1   :  { %334 = vst [vmem:[#allocation1 + $0x10] ss:$2 sm:$0xff] %v329_v19  ;;  %v700_v32 = vld [vmem:[#allocation2 + $0x14] sm:$0xf]  ;;  %3152 = vmatmul.msk.f32.vlgmr.msra.gmra.mxu3 %vm252_vm7, %v241_v5  ;;  %3154 = vmatmul.msk.f32.vlgmr.msrb.gmra.mxu0 %vm252_vm7, %v241_v5 }
  0xd2   :  { %v892_v40 = vld [vmem:[#allocation2 + $0x14] sm:$0xf] }
  0xd3   :  { %v1084_v48 = vld [vmem:[#allocation2 + $0x14] sm:$0xf] }
  0xd4   :  { %v1276_v56 = vld [vmem:[#allocation2 + $0x14] sm:$0xf] }
  0xd5   :  { %v1468_v0 = vld [vmem:[#allocation2 + $0x14] sm:$0xf] }
  0xd6   :  { %v1660_v11 = vld [vmem:[#allocation2 + $0x14] sm:$0xf] }
  0xd7   :  { %v417_v21 = vld.sshfl [vmem:[#allocation1] sm:$0xff pattern:$0x75316420]  ;;  %v418_v22 = vld.sshfl [vmem:[#allocation1 + $0x8] sm:$0xff pattern:$0x75316420] }
  0xd8   :  { %511 = vst [vmem:[#allocation1] ss:$2 sm:$0xff] %v3564_v15  ;;  %v337_v23 = vld.sshfl [vmem:[#allocation1 + $0x10] sm:$0xff pattern:$0x75316420]  ;;  %422 = vrot.lane.b32.xlu0 %v418_v22, %s3355_s0  ;;  %420 = vrot.lane.b32.xlu2 %v417_v21, %s3355_s0 }
  0xd9   :  { %416 = vst [vmem:[#allocation1 + $0x10] ss:$2 sm:$0xff] %v411_v20  ;;  %3155 = vmatpush.msk.msrb.mxu1 %vm256_vm3, %v337_v23 }
  0xda   :  { %3156 = vmatmul.msk.f32.vlgmr.msrb.gmra.mxu1 %vm252_vm7, %v241_v5 }
  0xdf   :  { %v515_v25 = vld.sshfl [vmem:[#allocation1 + $0x8] sm:$0xff pattern:$0x75316420]  ;;  %v514_v26 = vld.sshfl [vmem:[#allocation1] sm:$0xff pattern:$0x75316420] }
  0xe0   :  { %v419_v27 = vld.sshfl [vmem:[#allocation1 + $0x10] sm:$0xff pattern:$0x75316420]  ;;  %519 = vrot.lane.b32.xlu2 %v515_v25, %s3355_s0  ;;  %606 = vst [vmem:[#allocation1] ss:$2 sm:$0xff] %v3549_v2 }
  0xe1   :  { %513 = vst [vmem:[#allocation1 + $0x10] ss:$2 sm:$0xff] %v508_v24  ;;  %424 = vrot.lane.b32.xlu1 %v419_v27, %s3355_s0  ;;  %v1852_v25 = vld [vmem:[#allocation2 + $0x14] sm:$0xf] }
  0xe7   :  { %v609_v29 = vld.sshfl [vmem:[#allocation1] sm:$0xff pattern:$0x75316420]  ;;  %v610_v30 = vld.sshfl [vmem:[#allocation1 + $0x8] sm:$0xff pattern:$0x75316420] }
  0xe8   :  { %v516_v31 = vld.sshfl [vmem:[#allocation1 + $0x10] sm:$0xff pattern:$0x75316420]  ;;  %612 = vrot.lane.b32.xlu2 %v609_v29, %s3356_s11  ;;  %703 = vst [vmem:[#allocation1] ss:$2 sm:$0xff] %v3564_v15 }
  0xe9   :  { %608 = vst [vmem:[#allocation1 + $0x10] ss:$2 sm:$0xff] %v603_v28  ;;  %517 = vrot.lane.b32.xlu1 %v514_v26, %s3355_s0  ;;  %521 = vrot.lane.b32.xlu0 %v516_v31, %s3355_s0  ;;  %s3365_s0 = smov 20  }
  0xef   :  { %v706_v33 = vld.sshfl [vmem:[#allocation1] sm:$0xff pattern:$0x75316420]  ;;  %v707_v34 = vld.sshfl [vmem:[#allocation1 + $0x8] sm:$0xff pattern:$0x75316420] }
  0xf0   :  { %v611_v35 = vld.sshfl [vmem:[#allocation1 + $0x10] sm:$0xff pattern:$0x75316420]  ;;  %709 = vrot.lane.b32.xlu2 %v706_v33, %s3356_s11  ;;  %798 = vst [vmem:[#allocation1] ss:$2 sm:$0xff] %v3549_v2 }
  0xf1   :  { %705 = vst [vmem:[#allocation1 + $0x10] ss:$2 sm:$0xff] %v700_v32  ;;  %614 = vrot.lane.b32.xlu0 %v610_v30, %s3356_s11  ;;  %616 = vrot.lane.b32.xlu1 %v611_v35, %s3356_s11 }
  0xf7   :  { %v801_v37 = vld.sshfl [vmem:[#allocation1] sm:$0xff pattern:$0x75316420]  ;;  %v802_v38 = vld.sshfl [vmem:[#allocation1 + $0x8] sm:$0xff pattern:$0x75316420] }
  0xf8   :  { %v708_v39 = vld.sshfl [vmem:[#allocation1 + $0x10] sm:$0xff pattern:$0x75316420]  ;;  %804 = vrot.lane.b32.xlu2 %v801_v37, %s3357_s19  ;;  %895 = vst [vmem:[#allocation1] ss:$2 sm:$0xff] %v3564_v15 }
  0xf9   :  { %711 = vrot.lane.b32.xlu0 %v707_v34, %s3356_s11  ;;  %713 = vrot.lane.b32.xlu1 %v708_v39, %s3356_s11  ;;  %800 = vst [vmem:[#allocation1 + $0x10] ss:$2 sm:$0xff] %v795_v36  ;;  %s3366_s11 = smov 38  }
  0xff   :  { %v899_v41 = vld.sshfl [vmem:[#allocation1 + $0x8] sm:$0xff pattern:$0x75316420]  ;;  %v898_v42 = vld.sshfl [vmem:[#allocation1] sm:$0xff pattern:$0x75316420] }
 0x100   :  { %v803_v43 = vld.sshfl [vmem:[#allocation1 + $0x10] sm:$0xff pattern:$0x75316420]  ;;  %903 = vrot.lane.b32.xlu2 %v899_v41, %s3357_s19  ;;  %990 = vst [vmem:[#allocation1] ss:$2 sm:$0xff] %v3549_v2 }
 0x101   :  { %806 = vrot.lane.b32.xlu0 %v802_v38, %s3357_s19  ;;  %808 = vrot.lane.b32.xlu1 %v803_v43, %s3357_s19  ;;  %897 = vst [vmem:[#allocation1 + $0x10] ss:$2 sm:$0xff] %v892_v40  ;;  %v3170_v38 = vld [vmem:[%s4542_s1 + $0x10] sm:$0xff] }
 0x107   :  { %v993_v45 = vld.sshfl [vmem:[#allocation1] sm:$0xff pattern:$0x75316420]  ;;  %v994_v46 = vld.sshfl [vmem:[#allocation1 + $0x8] sm:$0xff pattern:$0x75316420] }
 0x108   :  { %v900_v47 = vld.sshfl [vmem:[#allocation1 + $0x10] sm:$0xff pattern:$0x75316420]  ;;  %996 = vrot.lane.b32.xlu2 %v993_v45, %s3358_s25  ;;  %1087 = vst [vmem:[#allocation1] ss:$2 sm:$0xff] %v3564_v15 }
 0x109   :  { %901 = vrot.lane.b32.xlu1 %v898_v42, %s3357_s19  ;;  %905 = vrot.lane.b32.xlu0 %v900_v47, %s3357_s19  ;;  %992 = vst [vmem:[#allocation1 + $0x10] ss:$2 sm:$0xff] %v987_v44 }
 0x10f   :  { %v1090_v49 = vld.sshfl [vmem:[#allocation1] sm:$0xff pattern:$0x75316420]  ;;  %v1091_v50 = vld.sshfl [vmem:[#allocation1 + $0x8] sm:$0xff pattern:$0x75316420] }
 0x110   :  { %v995_v51 = vld.sshfl [vmem:[#allocation1 + $0x10] sm:$0xff pattern:$0x75316420]  ;;  %1093 = vrot.lane.b32.xlu2 %v1090_v49, %s3358_s25  ;;  %1182 = vst [vmem:[#allocation1] ss:$2 sm:$0xff] %v3549_v2  ;;  %v3183_v49 = vld [vmem:[%s4542_s1 + $0x18] sm:$0xff] }
 0x111   :  { %998 = vrot.lane.b32.xlu0 %v994_v46, %s3358_s25  ;;  %1000 = vrot.lane.b32.xlu1 %v995_v51, %s3358_s25  ;;  %1089 = vst [vmem:[#allocation1 + $0x10] ss:$2 sm:$0xff] %v1084_v48 }
 0x117   :  { %v1185_v53 = vld.sshfl [vmem:[#allocation1] sm:$0xff pattern:$0x75316420]  ;;  %v1186_v54 = vld.sshfl [vmem:[#allocation1 + $0x8] sm:$0xff pattern:$0x75316420] }
 0x118   :  { %v1092_v55 = vld.sshfl [vmem:[#allocation1 + $0x10] sm:$0xff pattern:$0x75316420]  ;;  %1188 = vrot.lane.b32.xlu2 %v1185_v53, %s3359_s21  ;;  %1279 = vst [vmem:[#allocation1] ss:$2 sm:$0xff] %v3564_v15 }
 0x119   :  { %1095 = vrot.lane.b32.xlu0 %v1091_v50, %s3358_s25  ;;  %1097 = vrot.lane.b32.xlu1 %v1092_v55, %s3358_s25  ;;  %1184 = vst [vmem:[#allocation1 + $0x10] ss:$2 sm:$0xff] %v1179_v52  ;;  %s3367_s25 = smov 56  }
 0x11f   :  { %v1283_v57 = vld.sshfl [vmem:[#allocation1 + $0x8] sm:$0xff pattern:$0x75316420]  ;;  %v1282_v58 = vld.sshfl [vmem:[#allocation1] sm:$0xff pattern:$0x75316420] }
 0x120   :  { %v1187_v59 = vld.sshfl [vmem:[#allocation1 + $0x10] sm:$0xff pattern:$0x75316420]  ;;  %1287 = vrot.lane.b32.xlu2 %v1283_v57, %s3359_s21  ;;  %1374 = vst [vmem:[#allocation1] ss:$2 sm:$0xff] %v3549_v2 }
 0x121   :  { %1190 = vrot.lane.b32.xlu0 %v1186_v54, %s3359_s21  ;;  %1192 = vrot.lane.b32.xlu1 %v1187_v59, %s3359_s21  ;;  %1281 = vst [vmem:[#allocation1 + $0x10] ss:$2 sm:$0xff] %v1276_v56  ;;  %v3196_v59 = vld [vmem:[%s4542_s1 + $0x20] sm:$0xff] }
 0x127   :  { %v1377_v61 = vld.sshfl [vmem:[#allocation1] sm:$0xff pattern:$0x75316420]  ;;  %v1378_v62 = vld.sshfl [vmem:[#allocation1 + $0x8] sm:$0xff pattern:$0x75316420] }
 0x128   :  { %v1284_v63 = vld.sshfl [vmem:[#allocation1 + $0x10] sm:$0xff pattern:$0x75316420]  ;;  %1380 = vrot.lane.b32.xlu2 %v1377_v61, %s3360_s23  ;;  %1471 = vst [vmem:[#allocation1] ss:$2 sm:$0xff] %v3564_v15 }
 0x129   :  { %1285 = vrot.lane.b32.xlu1 %v1282_v58, %s3359_s21  ;;  %1289 = vrot.lane.b32.xlu0 %v1284_v63, %s3359_s21  ;;  %1376 = vst [vmem:[#allocation1 + $0x10] ss:$2 sm:$0xff] %v1371_v60  ;;  %s3368_s21 = smov 112  }
 0x12f   :  { %v1474_v1 = vld.sshfl [vmem:[#allocation1] sm:$0xff pattern:$0x75316420]  ;;  %v1475_v3 = vld.sshfl [vmem:[#allocation1 + $0x8] sm:$0xff pattern:$0x75316420] }
 0x130   :  { %v1379_v4 = vld.sshfl [vmem:[#allocation1 + $0x10] sm:$0xff pattern:$0x75316420]  ;;  %1477 = vrot.lane.b32.xlu2 %v1474_v1, %s3360_s23  ;;  %1566 = vst [vmem:[#allocation1] ss:$2 sm:$0xff] %v3549_v2 }
 0x131   :  { %1382 = vrot.lane.b32.xlu0 %v1378_v62, %s3360_s23  ;;  %1384 = vrot.lane.b32.xlu1 %v1379_v4, %s3360_s23  ;;  %1473 = vst [vmem:[#allocation1 + $0x10] ss:$2 sm:$0xff] %v1468_v0 }
 0x132   :  { %v421_v6 = vpop.permute.xlu2 %420 }
 0x137   :  { %v1569_v8 = vld.sshfl [vmem:[#allocation1] sm:$0xff pattern:$0x75316420]  ;;  %v1570_v9 = vld.sshfl [vmem:[#allocation1 + $0x8] sm:$0xff pattern:$0x75316420] }
 0x138   :  { %v1476_v10 = vld.sshfl [vmem:[#allocation1 + $0x10] sm:$0xff pattern:$0x75316420]  ;;  %1572 = vrot.lane.b32.xlu2 %v1569_v8, %s3361_s26  ;;  %1663 = vst [vmem:[#allocation1] ss:$2 sm:$0xff] %v3564_v15 }
 0x139   :  { %1479 = vrot.lane.b32.xlu0 %v1475_v3, %s3360_s23  ;;  %1481 = vrot.lane.b32.xlu1 %v1476_v10, %s3360_s23  ;;  %1568 = vst [vmem:[#allocation1 + $0x10] ss:$2 sm:$0xff] %v1563_v7  ;;  %v3209_v7 = vld [vmem:[%s4542_s1 + $0x28] sm:$0xff] }
 0x13a   :  { %v520_v12 = vpop.permute.xlu2 %519 }
 0x13f   :  { %v1667_v13 = vld.sshfl [vmem:[#allocation1 + $0x8] sm:$0xff pattern:$0x75316420]  ;;  %v1666_v14 = vld.sshfl [vmem:[#allocation1] sm:$0xff pattern:$0x75316420] }
 0x140   :  { %v1571_v16 = vld.sshfl [vmem:[#allocation1 + $0x10] sm:$0xff pattern:$0x75316420]  ;;  %1671 = vrot.lane.b32.xlu2 %v1667_v13, %s3361_s26  ;;  %1758 = vst [vmem:[#allocation1] ss:$2 sm:$0xff] %v3549_v2  ;;  %v3157_v2 = vld [vmem:[%s4542_s1 + $0x8] sm:$0xff] }
 0x141   :  { %1574 = vrot.lane.b32.xlu0 %v1570_v9, %s3361_s26  ;;  %1576 = vrot.lane.b32.xlu1 %v1571_v16, %s3361_s26  ;;  %1665 = vst [vmem:[#allocation1 + $0x10] ss:$2 sm:$0xff] %v1660_v11 }
 0x142   :  { %v613_v20 = vpop.permute.xlu2 %612 }
 0x147   :  { %v1761_v18 = vld.sshfl [vmem:[#allocation1] sm:$0xff pattern:$0x75316420]  ;;  %v1762_v19 = vld.sshfl [vmem:[#allocation1 + $0x8] sm:$0xff pattern:$0x75316420] }
 0x148   :  { %v1668_v21 = vld.sshfl [vmem:[#allocation1 + $0x10] sm:$0xff pattern:$0x75316420]  ;;  %1764 = vrot.lane.b32.xlu2 %v1761_v18, %s3362_s28  ;;  %1855 = vst [vmem:[#allocation1] ss:$2 sm:$0xff] %v3564_v15 }
 0x149   :  { %1669 = vrot.lane.b32.xlu1 %v1666_v14, %s3361_s26  ;;  %1673 = vrot.lane.b32.xlu0 %v1668_v21, %s3361_s26  ;;  %1760 = vst [vmem:[#allocation1 + $0x10] ss:$2 sm:$0xff] %v1755_v17  ;;  %s3371_s26 = smov 76  }
 0x14a   :  { %v423_v22 = vpop.permute.xlu0 %422  ;;  %v710_v15 = vpop.permute.xlu2 %709 }
 0x14b   :  { %v427_v23 = vsel %vm426_vm8, %v421_v6, %v423_v22 }
 0x14c   :  { %3158 = vmatpush.msk.msrb.mxu2 %vm256_vm3, %v427_v23 }
 0x14d   :  { %3159 = vmatmul.msk.f32.vlgmr.msrb.gmra.mxu2 %vm252_vm7, %v3157_v2 }
 0x14f   :  { %v1858_v24 = vld.sshfl [vmem:[#allocation1] sm:$0xff pattern:$0x75316420]  ;;  %v1859_v29 = vld.sshfl [vmem:[#allocation1 + $0x8] sm:$0xff pattern:$0x75316420] }
 0x150   :  { %v1763_v26 = vld.sshfl [vmem:[#allocation1 + $0x10] sm:$0xff pattern:$0x75316420]  ;;  %1861 = vrot.lane.b32.xlu2 %v1858_v24, %s3362_s28 }
 0x151   :  { %1766 = vrot.lane.b32.xlu0 %v1762_v19, %s3362_s28  ;;  %1768 = vrot.lane.b32.xlu1 %v1763_v26, %s3362_s28  ;;  %1857 = vst [vmem:[#allocation1 + $0x10] ss:$2 sm:$0xff] %v1852_v25  ;;  %v3222_v19 = vld [vmem:[%s4542_s1 + $0x30] sm:$0xff]  ;;  %v3724_v26 = vpop.f32.mrf.mxu1 }
 0x152   :  { %v805_v33 = vpop.permute.xlu2 %804 }
 0x153   :  { %v425_v27 = vpop.permute.xlu1 %424 }
 0x154   :  { %3162 = vmatpush.msk.msra.mxu0 %vm256_vm3, %v425_v27  ;;  %v428_v28 = vsel %vm426_vm8, %v423_v22, %v425_v27 }
 0x155   :  { %3160 = vmatpush.msk.msrb.mxu3 %vm256_vm3, %v428_v28  ;;  %3163 = vmatmul.msk.f32.vlgmr.msra.gmra.mxu0 %vm252_vm7, %v3157_v2  ;;  %v3235_v28 = vld [vmem:[%s4542_s1 + $0x38] sm:$0xff] }
 0x156   :  { %3161 = vmatmul.msk.f32.vlgmr.msrb.gmra.mxu3 %vm252_vm7, %v3157_v2 }
 0x158   :  { %v1860_v30 = vld.sshfl [vmem:[#allocation1 + $0x10] sm:$0xff pattern:$0x75316420] }
 0x159   :  { %1863 = vrot.lane.b32.xlu0 %v1859_v29, %s3362_s28  ;;  %1865 = vrot.lane.b32.xlu1 %v1860_v30, %s3362_s28  ;;  %s3372_s28 = smov 94  }
 0x15a   :  { %v904_v41 = vpop.permute.xlu2 %903 }
 0x15b   :  { %v518_v31 = vpop.permute.xlu1 %517  ;;  %v522_v32 = vpop.permute.xlu0 %521 }
 0x15c   :  { %v523_v34 = vsel %vm426_vm8, %v518_v31, %v520_v12  ;;  %v524_v35 = vsel %vm426_vm8, %v520_v12, %v522_v32  ;;  %3168 = vmatpush.msk.msra.mxu3 %vm256_vm3, %v522_v32  ;;  %v320_v32 = vpop.f32.mrf.mxu2  ;;  %vm2518_vm8 = vcmask 916480  }
 0x15d   :  { %3164 = vmatpush.msk.msra.mxu1 %vm256_vm3, %v523_v34  ;;  %3166 = vmatpush.msk.msra.mxu2 %vm256_vm3, %v524_v35  ;;  %326 = vst.msk [vmem:[#allocation3 + $0x10] sm:$0xff] %vm325_vm15, %v320_v32 }
 0x15e   :  { %3165 = vmatmul.msk.f32.vlgmr.msra.gmra.mxu1 %vm252_vm7, %v3157_v2  ;;  %3167 = vmatmul.msk.f32.vlgmr.msra.gmra.mxu2 %vm252_vm7, %v3157_v2 }
 0x15f   :  { %3169 = vmatmul.msk.f32.vlgmr.msra.gmra.mxu3 %vm252_vm7, %v3157_v2 }
 0x162   :  { %v997_v46 = vpop.permute.xlu2 %996 }
 0x163   :  { %v615_v36 = vpop.permute.xlu0 %614  ;;  %v617_v37 = vpop.permute.xlu1 %616 }
 0x164   :  { %v619_v39 = vsel %vm618_vm9, %v613_v20, %v615_v36  ;;  %v620_v40 = vsel %vm618_vm9, %v615_v36, %v617_v37  ;;  %3175 = vmatpush.msk.msrb.mxu2 %vm256_vm3, %v617_v37 }
 0x165   :  { %3171 = vmatpush.msk.msrb.mxu0 %vm256_vm3, %v619_v39  ;;  %3173 = vmatpush.msk.msrb.mxu1 %vm256_vm3, %v620_v40 }
 0x166   :  { %3172 = vmatmul.msk.f32.vlgmr.msrb.gmra.mxu0 %vm252_vm7, %v3170_v38  ;;  %3176 = vmatmul.msk.f32.vlgmr.msrb.gmra.mxu2 %vm252_vm7, %v3170_v38 }
 0x167   :  { %3174 = vmatmul.msk.f32.vlgmr.msrb.gmra.mxu1 %vm252_vm7, %v3170_v38 }
 0x16a   :  { %v1094_v52 = vpop.permute.xlu2 %1093 }
 0x16b   :  { %v712_v42 = vpop.permute.xlu0 %711  ;;  %v714_v43 = vpop.permute.xlu1 %713 }
 0x16c   :  { %v715_v44 = vsel %vm618_vm9, %v710_v15, %v712_v42  ;;  %v716_v45 = vsel %vm618_vm9, %v712_v42, %v714_v43  ;;  %3181 = vmatpush.msk.msra.mxu1 %vm256_vm3, %v714_v43  ;;  %v3248_v42 = vld [vmem:[%s4542_s1 + $0x40] sm:$0xff] }
 0x16d   :  { %3177 = vmatpush.msk.msrb.mxu3 %vm256_vm3, %v715_v44  ;;  %3179 = vmatpush.msk.msra.mxu0 %vm256_vm3, %v716_v45 }
 0x16e   :  { %3178 = vmatmul.msk.f32.vlgmr.msrb.gmra.mxu3 %vm252_vm7, %v3170_v38  ;;  %3180 = vmatmul.msk.f32.vlgmr.msra.gmra.mxu0 %vm252_vm7, %v3170_v38 }
 0x16f   :  { %3182 = vmatmul.msk.f32.vlgmr.msra.gmra.mxu1 %vm252_vm7, %v3170_v38  ;;  %v280_v38 = vpop.f32.mrf.mxu0 }
 0x172   :  { %v1189_v60 = vpop.permute.xlu2 %1188 }
 0x173   :  { %v807_v47 = vpop.permute.xlu0 %806  ;;  %v809_v48 = vpop.permute.xlu1 %808 }
 0x174   :  { %v811_v50 = vsel %vm810_vm10, %v805_v33, %v807_v47  ;;  %v812_v51 = vsel %vm810_vm10, %v807_v47, %v809_v48  ;;  %3188 = vmatpush.msk.msrb.mxu0 %vm256_vm3, %v809_v48  ;;  %v401_v33 = vpop.f32.mrf.mxu1 }
 0x175   :  { %3184 = vmatpush.msk.msra.mxu2 %vm256_vm3, %v811_v50  ;;  %3186 = vmatpush.msk.msra.mxu3 %vm256_vm3, %v812_v51  ;;  %407 = vst.msk [vmem:[#allocation3 + $0x28] sm:$0xff] %vm325_vm15, %v401_v33  ;;  %v361_v51 = vpop.f32.mrf.mxu3 }
 0x176   :  { %3185 = vmatmul.msk.f32.vlgmr.msra.gmra.mxu2 %vm252_vm7, %v3183_v49  ;;  %3189 = vmatmul.msk.f32.vlgmr.msrb.gmra.mxu0 %vm252_vm7, %v3183_v49 }
 0x177   :  { %3187 = vmatmul.msk.f32.vlgmr.msra.gmra.mxu3 %vm252_vm7, %v3183_v49  ;;  %v381_v45 = vpop.f32.mrf.mxu0 }
 0x17a   :  { %v1288_v4 = vpop.permute.xlu2 %1287 }
 0x17b   :  { %v902_v53 = vpop.permute.xlu1 %901  ;;  %v906_v54 = vpop.permute.xlu0 %905 }
 0x17c   :  { %v907_v55 = vsel %vm810_vm10, %v902_v53, %v904_v41  ;;  %v908_v56 = vsel %vm810_vm10, %v904_v41, %v906_v54  ;;  %3194 = vmatpush.msk.msrb.mxu3 %vm256_vm3, %v906_v54  ;;  %v500_v53 = vld [vmem:[#allocation3 + $0x10] sm:$0xff] }
 0x17d   :  { %3190 = vmatpush.msk.msrb.mxu1 %vm256_vm3, %v907_v55  ;;  %3192 = vmatpush.msk.msrb.mxu2 %vm256_vm3, %v908_v56 }
 0x17e   :  { %3193 = vmatmul.msk.f32.vlgmr.msrb.gmra.mxu2 %vm252_vm7, %v3183_v49  ;;  %3191 = vmatmul.msk.f32.vlgmr.msrb.gmra.mxu1 %vm252_vm7, %v3183_v49 }
 0x17f   :  { %3195 = vmatmul.msk.f32.vlgmr.msrb.gmra.mxu3 %vm252_vm7, %v3183_v49 }
 0x182   :  { %v1381_v10 = vpop.permute.xlu2 %1380 }
 0x183   :  { %v999_v57 = vpop.permute.xlu0 %998  ;;  %v1001_v58 = vpop.permute.xlu1 %1000 }
 0x184   :  { %v1003_v61 = vsel %vm1002_vm11, %v997_v46, %v999_v57  ;;  %v1004_v62 = vsel %vm1002_vm11, %v999_v57, %v1001_v58  ;;  %3201 = vmatpush.msk.msra.mxu2 %vm256_vm3, %v1001_v58 }
 0x185   :  { %3197 = vmatpush.msk.msra.mxu0 %vm256_vm3, %v1003_v61  ;;  %3199 = vmatpush.msk.msra.mxu1 %vm256_vm3, %v1004_v62  ;;  %v593_v61 = vld [vmem:[#allocation3 + $0x28] sm:$0xff] }
 0x186   :  { %3198 = vmatmul.msk.f32.vlgmr.msra.gmra.mxu0 %vm252_vm7, %v3196_v59  ;;  %3202 = vmatmul.msk.f32.vlgmr.msra.gmra.mxu2 %vm252_vm7, %v3196_v59 }
 0x187   :  { %3200 = vmatmul.msk.f32.vlgmr.msra.gmra.mxu1 %vm252_vm7, %v3196_v59 }
 0x18a   :  { %v1478_v16 = vpop.permute.xlu2 %1477 }
 0x18b   :  { %v1096_v63 = vpop.permute.xlu0 %1095  ;;  %v1098_v0 = vpop.permute.xlu1 %1097 }
 0x18c   :  { %v1099_v1 = vsel %vm1002_vm11, %v1094_v52, %v1096_v63  ;;  %v1100_v3 = vsel %vm1002_vm11, %v1096_v63, %v1098_v0  ;;  %3207 = vmatpush.msk.msrb.mxu1 %vm256_vm3, %v1098_v0 }
 0x18d   :  { %3203 = vmatpush.msk.msra.mxu3 %vm256_vm3, %v1099_v1  ;;  %3205 = vmatpush.msk.msrb.mxu0 %vm256_vm3, %v1100_v3 }
 0x18e   :  { %3206 = vmatmul.msk.f32.vlgmr.msrb.gmra.mxu0 %vm252_vm7, %v3196_v59  ;;  %3204 = vmatmul.msk.f32.vlgmr.msra.gmra.mxu3 %vm252_vm7, %v3196_v59 }
 0x18f   :  { %3208 = vmatmul.msk.f32.vlgmr.msrb.gmra.mxu1 %vm252_vm7, %v3196_v59 }
 0x192   :  { %v1573_v23 = vpop.permute.xlu2 %1572 }
 0x193   :  { %v1191_v5 = vpop.permute.xlu0 %1190  ;;  %v1193_v6 = vpop.permute.xlu1 %1192 }
 0x194   :  { %v1195_v8 = vsel %vm1194_vm12, %v1189_v60, %v1191_v5  ;;  %v1196_v9 = vsel %vm1194_vm12, %v1191_v5, %v1193_v6  ;;  %3214 = vmatpush.msk.msra.mxu0 %vm256_vm3, %v1193_v6 }
 0x195   :  { %3210 = vmatpush.msk.msrb.mxu2 %vm256_vm3, %v1195_v8  ;;  %3212 = vmatpush.msk.msrb.mxu3 %vm256_vm3, %v1196_v9 }
 0x196   :  { %3211 = vmatmul.msk.f32.vlgmr.msrb.gmra.mxu2 %vm252_vm7, %v3209_v7  ;;  %3215 = vmatmul.msk.f32.vlgmr.msra.gmra.mxu0 %vm252_vm7, %v3209_v7 }
 0x197   :  { %3213 = vmatmul.msk.f32.vlgmr.msrb.gmra.mxu3 %vm252_vm7, %v3209_v7 }
 0x19a   :  { %v1672_v31 = vpop.permute.xlu2 %1671 }
 0x19b   :  { %v1286_v11 = vpop.permute.xlu1 %1285  ;;  %v1290_v12 = vpop.permute.xlu0 %1289 }
 0x19c   :  { %v1291_v13 = vsel %vm1194_vm12, %v1286_v11, %v1288_v4  ;;  %v1292_v14 = vsel %vm1194_vm12, %v1288_v4, %v1290_v12  ;;  %3220 = vmatpush.msk.msra.mxu3 %vm256_vm3, %v1290_v12 }
 0x19d   :  { %3216 = vmatpush.msk.msra.mxu1 %vm256_vm3, %v1291_v13  ;;  %3218 = vmatpush.msk.msra.mxu2 %vm256_vm3, %v1292_v14 }
 0x19e   :  { %3219 = vmatmul.msk.f32.vlgmr.msra.gmra.mxu2 %vm252_vm7, %v3209_v7  ;;  %3217 = vmatmul.msk.f32.vlgmr.msra.gmra.mxu1 %vm252_vm7, %v3209_v7 }
 0x19f   :  { %3221 = vmatmul.msk.f32.vlgmr.msra.gmra.mxu3 %vm252_vm7, %v3209_v7 }
 0x1a2   :  { %v1765_v39 = vpop.permute.xlu2 %1764 }
 0x1a3   :  { %v1383_v17 = vpop.permute.xlu0 %1382  ;;  %v1385_v18 = vpop.permute.xlu1 %1384 }
 0x1a4   :  { %v1387_v20 = vsel %vm1386_vm13, %v1381_v10, %v1383_v17  ;;  %v1388_v21 = vsel %vm1386_vm13, %v1383_v17, %v1385_v18  ;;  %3227 = vmatpush.msk.msrb.mxu2 %vm256_vm3, %v1385_v18 }
 0x1a5   :  { %3223 = vmatpush.msk.msrb.mxu0 %vm256_vm3, %v1387_v20  ;;  %3225 = vmatpush.msk.msrb.mxu1 %vm256_vm3, %v1388_v21 }
 0x1a6   :  { %3224 = vmatmul.msk.f32.vlgmr.msrb.gmra.mxu0 %vm252_vm7, %v3222_v19  ;;  %3228 = vmatmul.msk.f32.vlgmr.msrb.gmra.mxu2 %vm252_vm7, %v3222_v19 }
 0x1a7   :  { %3226 = vmatmul.msk.f32.vlgmr.msrb.gmra.mxu1 %vm252_vm7, %v3222_v19 }
 0x1aa   :  { %v1862_v46 = vpop.permute.xlu2 %1861 }
 0x1ab   :  { %v1480_v22 = vpop.permute.xlu0 %1479  ;;  %v1482_v2 = vpop.permute.xlu1 %1481 }
 0x1ac   :  { %v1483_v24 = vsel %vm1386_vm13, %v1478_v16, %v1480_v22  ;;  %v1484_v25 = vsel %vm1386_vm13, %v1480_v22, %v1482_v2  ;;  %3233 = vmatpush.msk.msra.mxu1 %vm256_vm3, %v1482_v2 }
 0x1ad   :  { %3229 = vmatpush.msk.msrb.mxu3 %vm256_vm3, %v1483_v24  ;;  %3231 = vmatpush.msk.msra.mxu0 %vm256_vm3, %v1484_v25 }
 0x1ae   :  { %3232 = vmatmul.msk.f32.vlgmr.msra.gmra.mxu0 %vm252_vm7, %v3222_v19  ;;  %3230 = vmatmul.msk.f32.vlgmr.msrb.gmra.mxu3 %vm252_vm7, %v3222_v19 }
 0x1af   :  { %3234 = vmatmul.msk.f32.vlgmr.msra.gmra.mxu1 %vm252_vm7, %v3222_v19 }
 0x1b3   :  { %v1575_v15 = vpop.permute.xlu0 %1574  ;;  %v1577_v27 = vpop.permute.xlu1 %1576 }
 0x1b4   :  { %v1579_v29 = vsel %vm1578_vm14, %v1573_v23, %v1575_v15  ;;  %v1580_v30 = vsel %vm1578_vm14, %v1575_v15, %v1577_v27  ;;  %3240 = vmatpush.msk.msrb.mxu0 %vm256_vm3, %v1577_v27 }
 0x1b5   :  { %3236 = vmatpush.msk.msra.mxu2 %vm256_vm3, %v1579_v29  ;;  %3238 = vmatpush.msk.msra.mxu3 %vm256_vm3, %v1580_v30 }
 0x1b6   :  { %3237 = vmatmul.msk.f32.vlgmr.msra.gmra.mxu2 %vm252_vm7, %v3235_v28  ;;  %3241 = vmatmul.msk.f32.vlgmr.msrb.gmra.mxu0 %vm252_vm7, %v3235_v28 }
 0x1b7   :  { %3239 = vmatmul.msk.f32.vlgmr.msra.gmra.mxu3 %vm252_vm7, %v3235_v28 }
 0x1bb   :  { %v1670_v34 = vpop.permute.xlu1 %1669  ;;  %v1674_v35 = vpop.permute.xlu0 %1673 }
 0x1bc   :  { %v1675_v36 = vsel %vm1578_vm14, %v1670_v34, %v1672_v31  ;;  %v1676_v37 = vsel %vm1578_vm14, %v1672_v31, %v1674_v35  ;;  %3246 = vmatpush.msk.msrb.mxu3 %vm256_vm3, %v1674_v35 }
 0x1bd   :  { %3242 = vmatpush.msk.msrb.mxu1 %vm256_vm3, %v1675_v36  ;;  %3244 = vmatpush.msk.msrb.mxu2 %vm256_vm3, %v1676_v37 }
 0x1be   :  { %3245 = vmatmul.msk.f32.vlgmr.msrb.gmra.mxu2 %vm252_vm7, %v3235_v28  ;;  %3243 = vmatmul.msk.f32.vlgmr.msrb.gmra.mxu1 %vm252_vm7, %v3235_v28 }
 0x1bf   :  { %3247 = vmatmul.msk.f32.vlgmr.msrb.gmra.mxu3 %vm252_vm7, %v3235_v28 }
 0x1c3   :  { %v1767_v40 = vpop.permute.xlu0 %1766  ;;  %v1769_v41 = vpop.permute.xlu1 %1768 }
 0x1c4   :  { %v1771_v43 = vsel %vm1770_vm0, %v1765_v39, %v1767_v40  ;;  %v1772_v44 = vsel %vm1770_vm0, %v1767_v40, %v1769_v41  ;;  %3253 = vmatpush.msk.msra.mxu2 %vm256_vm3, %v1769_v41 }
 0x1c5   :  { %3249 = vmatpush.msk.msra.mxu0 %vm256_vm3, %v1771_v43  ;;  %3251 = vmatpush.msk.msra.mxu1 %vm256_vm3, %v1772_v44 }
 0x1c6   :  { %3250 = vmatmul.msk.f32.vlgmr.msra.gmra.mxu0 %vm252_vm7, %v3248_v42  ;;  %3254 = vmatmul.msk.f32.vlgmr.msra.gmra.mxu2 %vm252_vm7, %v3248_v42 }
 0x1c7   :  { %3252 = vmatmul.msk.f32.vlgmr.msra.gmra.mxu1 %vm252_vm7, %v3248_v42 }
 0x1cb   :  { %v1864_v47 = vpop.permute.xlu0 %1863  ;;  %v1866_v48 = vpop.permute.xlu1 %1865 }
 0x1cc   :  { %v1867_v49 = vsel %vm1770_vm0, %v1862_v46, %v1864_v47  ;;  %v1868_v50 = vsel %vm1770_vm0, %v1864_v47, %v1866_v48  ;;  %3259 = vmatpush.msk.msrb.mxu1 %vm256_vm3, %v1866_v48  ;;  %v3363_v47 = vmov 0   ;;  %v2527_v48 = vld [vmem:[%s4543_s2] sm:$0xff] }
 0x1cd   :  { %3255 = vmatpush.msk.msra.mxu3 %vm256_vm3, %v1867_v49  ;;  %3257 = vmatpush.msk.msrb.mxu0 %vm256_vm3, %v1868_v50  ;;  %vm2512_vm3 = vcmask 523264  }
 0x1ce   :  { %3256 = vmatmul.msk.f32.vlgmr.msra.gmra.mxu3 %vm252_vm7, %v3248_v42  ;;  %3258 = vmatmul.msk.f32.vlgmr.msrb.gmra.mxu0 %vm252_vm7, %v3248_v42 }
 0x1cf   :  { %3260 = vmatmul.msk.f32.vlgmr.msrb.gmra.mxu1 %vm252_vm7, %v3248_v42  ;;  %3310 = vset.pattern.permute.xlu2 %v3363_v47 }
 0x1d0   :  { %v455_v52 = vpop.f32.mrf.mxu2  ;;  %3311 = vset.pattern.permute.xlu0 %v3363_v47  ;;  %2530 = vperm.xlu2 %3310, %v2527_v48  }
 0x1d1   :  { %v501_v54 = vadd.f32 %v455_v52, %v280_v38 }
 0x1d2   :  { %v495_v55 = vpop.f32.mrf.mxu0 }
 0x1d3   :  { %v503_v56 = vadd.f32 %v500_v53, %v495_v55 }
 0x1d5   :  { %506 = vst.msk [vmem:[#allocation3 + $0x10] sm:$0xff] %vm325_vm15, %v503_v56 }
 0x1d9   :  { %v475_v57 = vpop.f32.mrf.mxu3 }
 0x1da   :  { %v502_v58 = vadd.f32 %v475_v57, %v3724_v26 }
 0x1db   :  { %v548_v59 = vpop.f32.mrf.mxu1 }
 0x1dc   :  { %v594_v60 = vadd.f32 %v548_v59, %v361_v51  ;;  %v692_v7 = vld [vmem:[#allocation3 + $0x10] sm:$0xff] }
 0x1e1   :  { %v568_v62 = vpop.f32.mrf.mxu2 }
 0x1e2   :  { %v595_v63 = vadd.f32 %v568_v62, %v381_v45  ;;  %v588_v0 = vpop.f32.mrf.mxu3 }
 0x1e3   :  { %v647_v1 = vpop.f32.mrf.mxu0  ;;  %v596_v3 = vadd.f32 %v593_v61, %v588_v0 }
 0x1e4   :  { %v693_v4 = vadd.f32 %v647_v1, %v501_v54  ;;  %v667_v5 = vpop.f32.mrf.mxu1 }
 0x1e5   :  { %599 = vst.msk [vmem:[#allocation3 + $0x28] sm:$0xff] %vm325_vm15, %v596_v3  ;;  %v694_v6 = vadd.f32 %v667_v5, %v502_v58 }
 0x1e9   :  { %v687_v8 = vpop.f32.mrf.mxu2 }
 0x1ea   :  { %v695_v9 = vadd.f32 %v692_v7, %v687_v8 }
 0x1eb   :  { %v760_v10 = vpop.f32.mrf.mxu0 }
 0x1ec   :  { %698 = vst.msk [vmem:[#allocation3 + $0x10] sm:$0xff] %vm325_vm15, %v695_v9  ;;  %v787_v11 = vadd.f32 %v760_v10, %v595_v63  ;;  %v780_v12 = vpop.f32.mrf.mxu1  ;;  %v785_v13 = vld [vmem:[#allocation3 + $0x28] sm:$0xff] }
 0x1ed   :  { %v788_v14 = vadd.f32 %v785_v13, %v780_v12 }
 0x1ef   :  { %791 = vst.msk [vmem:[#allocation3 + $0x28] sm:$0xff] %vm325_vm15, %v788_v14 }
 0x1f1   :  { %v740_v16 = vpop.f32.mrf.mxu3 }
 0x1f2   :  { %v786_v17 = vadd.f32 %v740_v16, %v594_v60 }
 0x1f3   :  { %v879_v18 = vpop.f32.mrf.mxu0  ;;  %v884_v19 = vld [vmem:[#allocation3 + $0x10] sm:$0xff] }
 0x1f4   :  { %v887_v20 = vadd.f32 %v884_v19, %v879_v18 }
 0x1f6   :  { %890 = vst.msk [vmem:[#allocation3 + $0x10] sm:$0xff] %vm325_vm15, %v887_v20  ;;  %v977_v26 = vld [vmem:[#allocation3 + $0x28] sm:$0xff] }
 0x1f9   :  { %v839_v21 = vpop.f32.mrf.mxu2 }
 0x1fa   :  { %v885_v22 = vadd.f32 %v839_v21, %v693_v4  ;;  %v859_v2 = vpop.f32.mrf.mxu3 }
 0x1fb   :  { %v886_v23 = vadd.f32 %v859_v2, %v694_v6  ;;  %v932_v24 = vpop.f32.mrf.mxu1 }
 0x1fc   :  { %v3772_v25 = vadd.f32 %v932_v24, %v786_v17 }
 0x1fd   :  { %v1076_v32 = vld [vmem:[#allocation3 + $0x10] sm:$0xff] }
 0x201   :  { %v952_v15 = vpop.f32.mrf.mxu2 }
 0x202   :  { %v3774_v27 = vadd.f32 %v952_v15, %v787_v11  ;;  %v972_v28 = vpop.f32.mrf.mxu3 }
 0x203   :  { %v1031_v29 = vpop.f32.mrf.mxu0  ;;  %v980_v30 = vadd.f32 %v977_v26, %v972_v28 }
 0x204   :  { %v1051_v31 = vpop.f32.mrf.mxu1  ;;  %v1077_v5 = vadd.f32 %v1031_v29, %v885_v22 }
 0x205   :  { %983 = vst.msk [vmem:[#allocation3 + $0x28] sm:$0xff] %vm325_vm15, %v980_v30  ;;  %v1078_v6 = vadd.f32 %v1051_v31, %v886_v23 }
 0x209   :  { %v1071_v33 = vpop.f32.mrf.mxu2 }
 0x20a   :  { %v1079_v34 = vadd.f32 %v1076_v32, %v1071_v33 }
 0x20b   :  { %v1144_v35 = vpop.f32.mrf.mxu0 }
 0x20c   :  { %1082 = vst.msk [vmem:[#allocation3 + $0x10] sm:$0xff] %vm325_vm15, %v1079_v34  ;;  %v1164_v36 = vpop.f32.mrf.mxu1  ;;  %v1169_v37 = vld [vmem:[#allocation3 + $0x28] sm:$0xff]  ;;  %v1171_v19 = vadd.f32 %v1144_v35, %v3774_v27 }
 0x20d   :  { %v1172_v38 = vadd.f32 %v1169_v37, %v1164_v36 }
 0x20f   :  { %1175 = vst.msk [vmem:[#allocation3 + $0x28] sm:$0xff] %vm325_vm15, %v1172_v38 }
 0x211   :  { %v3779_v39 = vpop.f32.mrf.mxu3 }
 0x212   :  { %v1170_v15 = vadd.f32 %v3779_v39, %v3772_v25 }
 0x213   :  { %v1263_v40 = vpop.f32.mrf.mxu0  ;;  %v1268_v41 = vld [vmem:[#allocation3 + $0x10] sm:$0xff] }
 0x214   :  { %v1271_v42 = vadd.f32 %v1268_v41, %v1263_v40 }
 0x216   :  { %1274 = vst.msk [vmem:[#allocation3 + $0x10] sm:$0xff] %vm325_vm15, %v1271_v42  ;;  %v1361_v46 = vld [vmem:[#allocation3 + $0x28] sm:$0xff] }
 0x219   :  { %v1223_v43 = vpop.f32.mrf.mxu2 }
 0x21a   :  { %v1243_v44 = vpop.f32.mrf.mxu3  ;;  %v1269_v7 = vadd.f32 %v1223_v43, %v1077_v5 }
 0x21b   :  { %v1316_v45 = vpop.f32.mrf.mxu1  ;;  %v1270_v8 = vadd.f32 %v1243_v44, %v1078_v6  ;;  %v3377_v44 = vmov 1983009808  }
 0x21c   :  { %v1362_v30 = vadd.f32 %v1316_v45, %v1170_v15  ;;  %v2008_v45 = vunpack.c.l.s4 %v3377_v44 }
 0x21d   :  { %v1460_v55 = vld [vmem:[#allocation3 + $0x10] sm:$0xff] }
 0x221   :  { %v1336_v49 = vpop.f32.mrf.mxu2 }
 0x222   :  { %v1356_v50 = vpop.f32.mrf.mxu3  ;;  %v1363_v2 = vadd.f32 %v1336_v49, %v1171_v19 }
 0x223   :  { %v1415_v51 = vpop.f32.mrf.mxu0  ;;  %v1364_v52 = vadd.f32 %v1361_v46, %v1356_v50 }
 0x224   :  { %v1435_v53 = vpop.f32.mrf.mxu1  ;;  %v1461_v9 = vadd.f32 %v1415_v51, %v1269_v7 }
 0x225   :  { %1367 = vst.msk [vmem:[#allocation3 + $0x28] sm:$0xff] %vm325_vm15, %v1364_v52  ;;  %v1462_v10 = vadd.f32 %v1435_v53, %v1270_v8  ;;  %v3836_v53 = vunpack.c.0.s8 %v2008_v45 }
 0x229   :  { %v1455_v54 = vpop.f32.mrf.mxu2 }
 0x22a   :  { %v1463_v56 = vadd.f32 %v1460_v55, %v1455_v54  ;;  %v3829_v40 = vpop.permute.xlu2 %2530 }
 0x22b   :  { %v1528_v57 = vpop.f32.mrf.mxu0 }
 0x22c   :  { %1466 = vst.msk [vmem:[#allocation3 + $0x10] sm:$0xff] %vm325_vm15, %v1463_v56  ;;  %v1548_v58 = vpop.f32.mrf.mxu1  ;;  %v1553_v59 = vld [vmem:[#allocation3 + $0x28] sm:$0xff]  ;;  %v1555_v23 = vadd.f32 %v1528_v57, %v1363_v2 }
 0x22d   :  { %v1556_v60 = vadd.f32 %v1553_v59, %v1548_v58 }
 0x22f   :  { %1559 = vst.msk [vmem:[#allocation3 + $0x28] sm:$0xff] %vm325_vm15, %v1556_v60 }
 0x231   :  { %v1508_v61 = vpop.f32.mrf.mxu3 }
 0x232   :  { %v1554_v35 = vadd.f32 %v1508_v61, %v1362_v30 }
 0x233   :  { %v1647_v62 = vpop.f32.mrf.mxu0  ;;  %v1652_v63 = vld [vmem:[#allocation3 + $0x10] sm:$0xff] }
 0x234   :  { %v1655_v0 = vadd.f32 %v1652_v63, %v1647_v62 }
 0x236   :  { %1658 = vst.msk [vmem:[#allocation3 + $0x10] sm:$0xff] %vm325_vm15, %v1655_v0  ;;  %v1745_v14 = vld [vmem:[#allocation3 + $0x28] sm:$0xff] }
 0x239   :  { %v1607_v1 = vpop.f32.mrf.mxu2 }
 0x23a   :  { %v1627_v3 = vpop.f32.mrf.mxu3  ;;  %v1653_v12 = vadd.f32 %v1607_v1, %v1461_v9 }
 0x23b   :  { %v1700_v4 = vpop.f32.mrf.mxu1  ;;  %v1654_v16 = vadd.f32 %v1627_v3, %v1462_v10  ;;  %v3378_v3 = vmov 1934713408  }
 0x23c   :  { %v1746_v25 = vadd.f32 %v1700_v4, %v1554_v35  ;;  %v2056_v4 = vunpack.c.l.s4 %v3378_v3 }
 0x23d   :  { %v1844_v26 = vld [vmem:[#allocation3 + $0x10] sm:$0xff] }
 0x241   :  { %v1720_v11 = vpop.f32.mrf.mxu2 }
 0x242   :  { %v1740_v13 = vpop.f32.mrf.mxu3  ;;  %v1747_v27 = vadd.f32 %v1720_v11, %v1555_v23  ;;  %v3850_v11 = vunpack.c.0.s8 %v2056_v4 }
 0x243   :  { %v1799_v17 = vpop.f32.mrf.mxu0  ;;  %v1748_v18 = vadd.f32 %v1745_v14, %v1740_v13 }
 0x244   :  { %v3790_v20 = vadd.f32 %v1799_v17, %v1653_v12  ;;  %v1819_v21 = vpop.f32.mrf.mxu1 }
 0x245   :  { %1751 = vst.msk [vmem:[#allocation3 + $0x28] sm:$0xff] %vm325_vm15, %v1748_v18  ;;  %v1846_v22 = vadd.f32 %v1819_v21, %v1654_v16 }
 0x246   :  { %1954 = vrot.lane.b32.xlu1 %v3790_v20, %s3364_s22  ;;  %1951 = vrot.lane.b32.xlu0 %v3790_v20, %s3360_s23  ;;  %v2005_v52 = vrot.slane %v3790_v20, 4 }
 0x247   :  { %1948 = vrot.lane.b32.xlu2 %v3790_v20, %s3357_s19 }
 0x249   :  { %v1839_v24 = vpop.f32.mrf.mxu2 }
 0x24a   :  { %v1847_v28 = vadd.f32 %v1844_v26, %v1839_v24 }
 0x24b   :  { %v1912_v29 = vpop.f32.mrf.mxu0 }
 0x24c   :  { %1850 = vst.msk [vmem:[#allocation3 + $0x10] sm:$0xff] %vm325_vm15, %v1847_v28  ;;  %v1939_v31 = vadd.f32 %v1912_v29, %v1747_v27  ;;  %v1932_v32 = vpop.f32.mrf.mxu1  ;;  %v1937_v33 = vld [vmem:[#allocation3 + $0x28] sm:$0xff] }
 0x24d   :  { %v1940_v34 = vadd.f32 %v1937_v33, %v1932_v32 }
 0x24e   :  { %1963 = vrot.lane.b32.xlu1 %v3790_v20, %s3365_s0  ;;  %1960 = vrot.lane.b32.xlu0 %v3790_v20, %s3366_s11 }
 0x24f   :  { %1943 = vst.msk [vmem:[#allocation3 + $0x28] sm:$0xff] %vm325_vm15, %v1940_v34  ;;  %1957 = vrot.lane.b32.xlu2 %v3790_v20, %s3367_s25 }
 0x251   :  { %v1892_v36 = vpop.f32.mrf.mxu3 }
 0x252   :  { %v3809_v37 = vadd.f32 %v1892_v36, %v1746_v25 }
 0x253   :  { %v1946_v38 = vld [vmem:[#allocation3 + $0x10] sm:$0xff] }
 0x256   :  { %1974 = vrot.lane.b32.xlu1 %v1846_v22, %s3368_s21  ;;  %1969 = vrot.lane.b32.xlu0 %v1846_v22, %s3369_s17  ;;  %v2541_v39 = vld [vmem:[#allocation3 + $0x28] sm:$0xff] }
 0x257   :  { %1967 = vrot.lane.b32.xlu2 %v3790_v20, %s3369_s17 }
 0x25e   :  { %1983 = vrot.lane.b32.xlu1 %v1846_v22, %s3370_s24  ;;  %1980 = vrot.lane.b32.xlu0 %v1846_v22, %s3371_s26 }
 0x25f   :  { %1977 = vrot.lane.b32.xlu2 %v1846_v22, %s3372_s28 }
 0x266   :  { %1993 = vrot.lane.b32.xlu1 %v1846_v22, %s3373_s29  ;;  %1989 = vrot.lane.b32.xlu0 %v1846_v22, %s3374_s4 }
 0x267   :  { %1986 = vrot.lane.b32.xlu2 %v1846_v22, %s3375_s8 }
 0x26e   :  { %2574 = vrot.lane.b32.xlu1 %v1939_v31, %s3371_s26  ;;  %1999 = vrot.lane.b32.xlu0 %v1946_v38, %s3376_s5 }
 0x26f   :  { %1995 = vrot.lane.b32.xlu2 %v1946_v38, %s3373_s29 }
 0x276   :  { %2587 = vrot.lane.b32.xlu1 %v1939_v31, %s3373_s29  ;;  %2580 = vrot.lane.b32.xlu0 %v1939_v31, %s3375_s8 }
 0x277   :  { %2589 = vrot.lane.b32.xlu2 %v2541_v39, %s3373_s29 }
 0x27e   :  { %2564 = vrot.lane.b32.xlu1 %v1939_v31, %s3369_s17  ;;  %2577 = vrot.lane.b32.xlu0 %v1939_v31, %s3370_s24 }
 0x27f   :  { %2568 = vrot.lane.b32.xlu2 %v1939_v31, %s3368_s21 }
 0x286   :  { %2593 = vrot.lane.b32.xlu1 %v2541_v39, %s3376_s5  ;;  %2583 = vrot.lane.b32.xlu0 %v1939_v31, %s3374_s4 }
 0x287   :  { %2571 = vrot.lane.b32.xlu2 %v1939_v31, %s3372_s28 }
 0x28e   :  { %2558 = vrot.lane.b32.xlu1 %v3809_v37, %s3365_s0  ;;  %2546 = vrot.lane.b32.xlu0 %v3809_v37, %s3360_s23  ;;  %s3380_s23 = smov 48  }
 0x28f   :  { %2552 = vrot.lane.b32.xlu2 %v3809_v37, %s3367_s25 }
 0x296   :  { %2543 = vrot.lane.b32.xlu1 %v3809_v37, %s3357_s19  ;;  %2549 = vrot.lane.b32.xlu0 %v3809_v37, %s3364_s22  ;;  %s3379_s19 = smov 16  }
 0x297   :  { %2555 = vrot.lane.b32.xlu2 %v3809_v37, %s3366_s11 }
 0x29e   :  { %2562 = vrot.lane.b32.xlu0 %v3809_v37, %s3369_s17 }
 0x2a1   :  { %v1949_v41 = vpop.permute.xlu2 %1948 }
 0x2a2   :  { %v2017_v49 = vrot.slane %v1949_v41, 4 }
 0x2a9   :  { %v1958_v42 = vpop.permute.xlu2 %1957 }
 0x2aa   :  { %v2029_v1 = vrot.slane %v1958_v42, 4 }
 0x2b1   :  { %v1968_v43 = vpop.permute.xlu2 %1967 }
 0x2b8   :  { %v1955_v46 = vpop.permute.xlu1 %1954  ;;  %v1952_v47 = vpop.permute.xlu0 %1951 }
 0x2b9   :  { %v3833_v48 = vpop.permute.xlu2 %1977  ;;  %v2015_v50 = vrot.slane %v1955_v46, 4  ;;  %v2002_v51 = vrot.slane %v1952_v47, 4  ;;  %v2018_v54 = vsel %vm2003_vm1, %v1955_v46, %v2017_v49  ;;  %v2006_v55 = vsel %vm2003_vm1, %v1952_v47, %v2005_v52 }
 0x2ba   :  { %v2026_v58 = vperm.slane %v2018_v54, %v3836_v53  ;;  %v2014_v59 = vperm.slane %v2006_v55, %v3836_v53  ;;  %v2129_v39 = vrot.slane %v3833_v48, 4 }
 0x2bb   :  { %v2016_v56 = vsel %vm2003_vm1, %v2015_v50, %v1949_v41  ;;  %v2004_v57 = vsel %vm2003_vm1, %v2002_v51, %v3790_v20  ;;  %v2598_v41 = vrot.slane %v3809_v37, 4 }
 0x2bc   :  { %v2022_v62 = vperm.slane %v2016_v56, %v3836_v53  ;;  %v2010_v63 = vperm.slane %v2004_v57, %v3836_v53  ;;  %v2063_v6 = vrot.slane %v2026_v58, 4  ;;  %v2065_v7 = vrot.slane %v2014_v59, 4 }
 0x2be   :  { %v2051_v9 = vrot.slane %v2022_v62, 4  ;;  %v2053_v10 = vrot.slane %v2010_v63, 4  ;;  %v2064_v13 = vsel %vm2003_vm1, %v2063_v6, %v2014_v59  ;;  %v2066_v14 = vsel %vm2003_vm1, %v2026_v58, %v2065_v7 }
 0x2bf   :  { %v3863_v24 = vperm.slane %v2064_v13, %v3850_v11  ;;  %v2074_v26 = vperm.slane %v2066_v14, %v3850_v11 }
 0x2c0   :  { %v1964_v60 = vpop.permute.xlu1 %1963  ;;  %v1961_v61 = vpop.permute.xlu0 %1960  ;;  %v2052_v20 = vsel %vm2003_vm1, %v2051_v9, %v2010_v63  ;;  %v2054_v21 = vsel %vm2003_vm1, %v2022_v62, %v2053_v10 }
 0x2c1   :  { %v3847_v0 = vpop.permute.xlu2 %1986  ;;  %v2027_v5 = vrot.slane %v1964_v60, 4  ;;  %v2030_v8 = vsel %vm2003_vm1, %v1964_v60, %v2029_v1  ;;  %v2041_v17 = vrot.slane %v1961_v61, 4  ;;  %v2058_v30 = vperm.slane %v2052_v20, %v3850_v11 }
 0x2c2   :  { %v2038_v16 = vperm.slane %v2030_v8, %v3836_v53  ;;  %v2062_v31 = vperm.slane %v2054_v21, %v3850_v11  ;;  %v2109_v36 = vrot.slane %v3863_v24, 4  ;;  %v2113_v38 = vrot.slane %v2074_v26, 4 }
 0x2c3   :  { %v2028_v12 = vsel %vm2003_vm1, %v2027_v5, %v1958_v42  ;;  %v2101_v46 = vrot.slane %v2058_v30, 4  ;;  %v2141_v49 = vrot.slane %v3847_v0, 4 }
 0x2c4   :  { %v2034_v22 = vperm.slane %v2028_v12, %v3836_v53  ;;  %v2089_v28 = vrot.slane %v2038_v16, 4  ;;  %v2105_v47 = vrot.slane %v2062_v31, 4 }
 0x2c6   :  { %v2077_v33 = vrot.slane %v2034_v22, 4 }
 0x2c8   :  { %v1975_v18 = vpop.permute.xlu1 %1974  ;;  %v1970_v19 = vpop.permute.xlu0 %1969 }
 0x2c9   :  { %v1972_v2 = vsel %vm1971_vm5, %v1968_v43, %v1970_v19  ;;  %v3860_v23 = vpop.permute.xlu2 %1995  ;;  %v2117_v54 = vrot.slane %v1975_v18, 4 }
 0x2ca   :  { %v2039_v15 = vrot.slane %v1972_v2, 4  ;;  %v2042_v27 = vsel %vm2003_vm1, %v1972_v2, %v2041_v17 }
 0x2cb   :  { %v2050_v29 = vperm.slane %v2042_v27, %v3836_v53 }
 0x2cc   :  { %v2040_v32 = vsel %vm2003_vm1, %v2039_v15, %v1961_v61 }
 0x2cd   :  { %v2046_v34 = vperm.slane %v2040_v32, %v3836_v53  ;;  %v2087_v35 = vrot.slane %v2050_v29, 4  ;;  %v2090_v25 = vsel %vm2003_vm1, %v2050_v29, %v2089_v28 }
 0x2ce   :  { %v2098_v45 = vperm.slane %v2090_v25, %v3850_v11 }
 0x2cf   :  { %v2075_v42 = vrot.slane %v2046_v34, 4  ;;  %v2078_v43 = vsel %vm2003_vm1, %v2046_v34, %v2077_v33  ;;  %v2088_v44 = vsel %vm2003_vm1, %v2087_v35, %v2038_v16 }
 0x2d0   :  { %v2086_v50 = vperm.slane %v2078_v43, %v3850_v11  ;;  %v1984_v51 = vpop.permute.xlu1 %1983  ;;  %v1981_v52 = vpop.permute.xlu0 %1980  ;;  %v2094_v60 = vperm.slane %v2088_v44, %v3850_v11  ;;  %v2111_v63 = vrot.slane %v2098_v45, 4 }
 0x2d1   :  { %v2076_v55 = vsel %vm2003_vm1, %v2075_v42, %v2034_v22  ;;  %v2127_v56 = vrot.slane %v1984_v51, 4  ;;  %v2130_v57 = vsel %vm2003_vm1, %v1984_v51, %v2129_v39  ;;  %v3883_v58 = vpop.permute.xlu2 %2589  ;;  %v2115_v7 = vrot.slane %v1981_v52, 4 }
 0x2d2   :  { %v2082_v59 = vperm.slane %v2076_v55, %v3850_v11  ;;  %v2103_v61 = vrot.slane %v2086_v50, 4  ;;  %v3888_v62 = vsel %vm2003_vm1, %v2086_v50, %v2105_v47  ;;  %v2138_v4 = vperm.slane %v2130_v57, %v3836_v53 }
 0x2d3   :  { %v2239_v1 = vrot.slane %v3888_v62, 4  ;;  %v2128_v3 = vsel %vm2003_vm1, %v2127_v56, %v3833_v48  ;;  %v2118_v8 = vsel %vm2003_vm1, %v1981_v52, %v2117_v54  ;;  %v2107_v14 = vrot.slane %v2094_v60, 4 }
 0x2d4   :  { %v2099_v5 = vrot.slane %v2082_v59, 4  ;;  %v2134_v6 = vperm.slane %v2128_v3, %v3836_v53  ;;  %v2175_v9 = vrot.slane %v2138_v4, 4  ;;  %v2126_v10 = vperm.slane %v2118_v8, %v3836_v53 }
 0x2d5   :  { %v3898_v12 = vsel %vm2003_vm1, %v2082_v59, %v2101_v46  ;;  %v3901_v13 = vsel %vm2003_vm1, %v2103_v61, %v2062_v31  ;;  %v3904_v48 = vsel %vm2003_vm1, %v2098_v45, %v2113_v38  ;;  %v2116_v17 = vsel %vm2003_vm1, %v2115_v7, %v1975_v18 }
 0x2d6   :  { %v2163_v16 = vrot.slane %v2134_v6, 4  ;;  %v3908_v19 = vsel %vm2003_vm1, %v2111_v63, %v2074_v26  ;;  %v2122_v20 = vperm.slane %v2116_v17, %v3836_v53  ;;  %v2176_v21 = vsel %vm2003_vm1, %v2175_v9, %v2126_v10 }
 0x2d7   :  { %v2177_v22 = vrot.slane %v2126_v10, 4  ;;  %v3913_v2 = vperm.slane %v2176_v21, %v3850_v11  ;;  %v3916_v28 = vsel %vm2003_vm1, %v2099_v5, %v2058_v30  ;;  %v2227_v29 = vrot.slane %v3901_v13, 4 }
 0x2d8   :  { %v1994_v15 = vpop.permute.xlu1 %1993  ;;  %v1990_v27 = vpop.permute.xlu0 %1989  ;;  %v2240_v18 = vsel %vm2003_vm1, %v2239_v1, %v3898_v12  ;;  %v2164_v26 = vsel %vm2003_vm1, %v2163_v16, %v2122_v20  ;;  %v2165_v31 = vrot.slane %v2122_v20, 4  ;;  %v2251_v38 = vrot.slane %v3908_v19, 4 }
 0x2d9   :  { %v2178_v32 = vsel %vm2003_vm1, %v2138_v4, %v2177_v22  ;;  %v1997_v33 = vsel %vm252_vm7, %v1994_v15, %v3860_v23  ;;  %v3926_v34 = vperm.slane %v2164_v26, %v3850_v11  ;;  %v2569_v25 = vpop.permute.xlu2 %2568  ;;  %v2263_v39 = vrot.slane %v3904_v48, 4 }
 0x2da   :  { %v3929_v35 = vperm.slane %v2178_v32, %v3850_v11  ;;  %v2139_v30 = vrot.slane %v1997_v33, 4  ;;  %v2166_v42 = vsel %vm2003_vm1, %v2134_v6, %v2165_v31  ;;  %v3936_v43 = vsel %vm2003_vm1, %v2107_v14, %v3863_v24 }
 0x2db   :  { %v3939_v23 = vsel %vm2003_vm1, %v2094_v60, %v2109_v36  ;;  %v3942_v44 = vperm.slane %v2166_v42, %v3850_v11  ;;  %v2221_v45 = vrot.slane %v3913_v2, 4  ;;  %v2142_v47 = vsel %vm2003_vm1, %v1997_v33, %v2141_v49 }
 0x2dc   :  { %v2140_v46 = vsel %vm2003_vm1, %v2139_v30, %v3847_v0  ;;  %v2153_v50 = vrot.slane %v1990_v27, 4  ;;  %v2710_v51 = vrot.slane %v2569_v25, 4  ;;  %v2228_v52 = vsel %vm2003_vm1, %v2227_v29, %v3916_v28 }
 0x2dd   :  { %v2246_v24 = vperm.slane %v2240_v18, %v3836_v53  ;;  %v2213_v36 = vrot.slane %v3926_v34, 4  ;;  %v2225_v54 = vrot.slane %v3929_v35, 4  ;;  %v2234_v55 = vperm.slane %v2228_v52, %v3836_v53 }
 0x2de   :  { %v2252_v56 = vsel %vm2003_vm1, %v2251_v38, %v3936_v43  ;;  %v2217_v0 = vrot.slane %v3942_v44, 4  ;;  %v2146_v49 = vperm.slane %v2140_v46, %v3836_v53  ;;  %v2150_v57 = vperm.slane %v2142_v47, %v3836_v53 }
 0x2df   :  { %v2264_v59 = vsel %vm2003_vm1, %v2263_v39, %v3939_v23  ;;  %v2253_v61 = vrot.slane %v3936_v43, 4  ;;  %v2258_v63 = vperm.slane %v2252_v56, %v3836_v53  ;;  %v2275_v3 = vrot.slane %v2246_v24, 4 }
 0x2e0   :  { %v2575_v60 = vpop.permute.xlu1 %2574  ;;  %v2270_v1 = vperm.slane %v2264_v59, %v3836_v53  ;;  %v2000_v4 = vpop.permute.xlu0 %1999  ;;  %v2277_v16 = vrot.slane %v2234_v55, 4  ;;  %v2189_v17 = vrot.slane %v2146_v49, 4  ;;  %v2201_v20 = vrot.slane %v2150_v57, 4 }
 0x2e1   :  { %v2708_v5 = vrot.slane %v2575_v60, 4  ;;  %v2711_v6 = vsel %vm2003_vm1, %v2575_v60, %v2710_v51  ;;  %v2151_v7 = vrot.slane %v2000_v4, 4  ;;  %v2154_v8 = vsel %vm2003_vm1, %v2000_v4, %v2153_v50  ;;  %v3983_v38 = vpop.permute.xlu2 %2571 }
 0x2e2   :  { %v2276_v9 = vsel %vm2003_vm1, %v2275_v3, %v2234_v55  ;;  %v2299_v10 = vrot.slane %v2270_v1, 4  ;;  %v2162_v14 = vperm.slane %v2154_v8, %v3836_v53  ;;  %v3974_v29 = vperm.slane %v2711_v6, %v3836_v53 }
 0x2e3   :  { %v3969_v21 = vperm.slane %v2276_v9, %v3850_v11  ;;  %v2152_v22 = vsel %vm2003_vm1, %v2151_v7, %v1990_v27  ;;  %v2709_v15 = vsel %vm2003_vm1, %v2708_v5, %v2569_v25  ;;  %v2278_v42 = vsel %vm2003_vm1, %v2246_v24, %v2277_v16 }
 0x2e4   :  { %v2300_v18 = vsel %vm2003_vm1, %v2299_v10, %v2258_v63  ;;  %v2158_v26 = vperm.slane %v2152_v22, %v3836_v53  ;;  %v2199_v33 = vrot.slane %v2162_v14, 4  ;;  %v2202_v30 = vsel %vm2003_vm1, %v2162_v14, %v2201_v20 }
 0x2e5   :  { %v3979_v31 = vperm.slane %v2300_v18, %v3850_v11  ;;  %v2325_v32 = vrot.slane %v3969_v21, 4  ;;  %v2210_v39 = vperm.slane %v2202_v30, %v3850_v11  ;;  %v3989_v46 = vperm.slane %v2709_v15, %v3836_v53 }
 0x2e6   :  { %v2187_v27 = vrot.slane %v2158_v26, 4  ;;  %v2190_v25 = vsel %vm2003_vm1, %v2158_v26, %v2189_v17  ;;  %v2200_v51 = vsel %vm2003_vm1, %v2199_v33, %v2150_v57  ;;  %v2770_v3 = vrot.slane %v3974_v29, 4 }
 0x2e7   :  { %v2326_v47 = vsel %vm2003_vm1, %v3979_v31, %v2325_v32  ;;  %v3994_v50 = vperm.slane %v2190_v25, %v3850_v11  ;;  %v2206_v55 = vperm.slane %v2200_v51, %v3850_v11  ;;  %v2223_v56 = vrot.slane %v2210_v39, 4 }
 0x2e8   :  { %2452 = vrot.lane.b32.xlu1 %v2326_v47, %s3379_s19  ;;  %v2188_v52 = vsel %vm2003_vm1, %v2187_v27, %v2146_v49  ;;  %v4001_v24 = vsel %vm2003_vm1, %v2210_v39, %v2225_v54  ;;  %v2588_v59 = vpop.permute.xlu1 %2587  ;;  %v2581_v60 = vpop.permute.xlu0 %2580  ;;  %v2265_v4 = vrot.slane %v3939_v23, 4  ;;  %v2286_v57 = vperm.slane %v2278_v42, %v3850_v11 }
 0x2e9   :  { %v4006_v5 = vperm.slane %v2188_v52, %v3850_v11  ;;  %v2219_v6 = vrot.slane %v2206_v55, 4  ;;  %v4012_v49 = vsel %vm2003_vm1, %v2206_v55, %v2221_v45  ;;  %v4016_v54 = vsel %vm2003_vm1, %v2223_v56, %v3929_v35  ;;  %v4048_v30 = vpop.permute.xlu2 %2552 }
 0x2ea   :  { %v2301_v7 = vrot.slane %v2258_v63, 4  ;;  %v2758_v8 = vrot.slane %v3989_v46, 4  ;;  %v2215_v9 = vrot.slane %v3994_v50, 4  ;;  %v2375_v10 = vrot.slane %v4001_v24, 4 }
 0x2eb   :  { %v2211_v23 = vrot.slane %v4006_v5, 4  ;;  %v4026_v14 = vsel %vm2003_vm1, %v4006_v5, %v2213_v36  ;;  %v2363_v45 = vrot.slane %v4016_v54, 4  ;;  %v2329_v16 = vrot.slane %v2286_v57, 4 }
 0x2ec   :  { %v2302_v35 = vsel %vm2003_vm1, %v2270_v1, %v2301_v7  ;;  %v4032_v63 = vsel %vm2003_vm1, %v2219_v6, %v3913_v2  ;;  %v2377_v17 = vrot.slane %v4012_v49, 4  ;;  %v2591_v22 = vsel %vm252_vm7, %v2588_v59, %v3883_v58 }
 0x2ed   :  { %v2310_v20 = vperm.slane %v2302_v35, %v3850_v11  ;;  %v2732_v15 = vrot.slane %v2591_v22, 4  ;;  %v2229_v36 = vrot.slane %v3916_v28, 4  ;;  %v2241_v18 = vrot.slane %v3898_v12, 4 }
 0x2ee   :  { %v2254_v1 = vsel %vm2003_vm1, %v3908_v19, %v2253_v61  ;;  %v2266_v33 = vsel %vm2003_vm1, %v3904_v48, %v2265_v4  ;;  %v2734_v39 = vrot.slane %v2581_v60, 4  ;;  %v2365_v42 = vrot.slane %v4032_v63, 4 }
 0x2ef   :  { %v2327_v26 = vrot.slane %v2310_v20, 4  ;;  %v2330_v2 = vsel %vm2003_vm1, %v2310_v20, %v2329_v16  ;;  %v2262_v32 = vperm.slane %v2254_v1, %v3836_v53  ;;  %v2230_v58 = vsel %vm2003_vm1, %v3901_v13, %v2229_v36 }
 0x2f0   :  { %2460 = vrot.lane.b32.xlu0 %v2330_v2, %s3380_s23  ;;  %v2242_v12 = vsel %vm2003_vm1, %v3888_v62, %v2241_v18  ;;  %v2274_v19 = vperm.slane %v2266_v33, %v3836_v53  ;;  %v2733_v28 = vsel %vm2003_vm1, %v2732_v15, %v2581_v60  ;;  %v4057_v43 = vpop.permute.xlu1 %2564  ;;  %v2578_v61 = vpop.permute.xlu0 %2577  ;;  %v2238_v27 = vperm.slane %v2230_v58, %v3836_v53 }
 0x2f1   :  { %v2328_v48 = vsel %vm2003_vm1, %v2327_v26, %v2286_v57  ;;  %v2250_v25 = vperm.slane %v2242_v12, %v3836_v53  ;;  %v2722_v62 = vrot.slane %v3983_v38, 4  ;;  %v2313_v47 = vrot.slane %v2262_v32, 4 }
 0x2f2   :  { %2456 = vrot.lane.b32.xlu2 %v2328_v48, %s3381_s6  ;;  %v2311_v13 = vrot.slane %v2274_v19, 4  ;;  %v2735_v52 = vsel %vm2003_vm1, %v2591_v22, %v2734_v39  ;;  %v2289_v55 = vrot.slane %v2238_v27, 4  ;;  %v2720_v56 = vrot.slane %v2578_v61, 4 }
 0x2f3   :  { %v2287_v51 = vrot.slane %v2250_v25, 4  ;;  %v2378_v59 = vsel %vm2003_vm1, %v4001_v24, %v2377_v17  ;;  %v4070_v60 = vperm.slane %v2733_v28, %v3836_v53  ;;  %v2314_v57 = vsel %vm2003_vm1, %v2274_v19, %v2313_v47 }
 0x2f4   :  { %v2312_v4 = vsel %vm2003_vm1, %v2311_v13, %v2262_v32  ;;  %v2290_v35 = vsel %vm2003_vm1, %v2250_v25, %v2289_v55  ;;  %v2322_v16 = vperm.slane %v2314_v57, %v3850_v11  ;;  %v4079_v22 = vperm.slane %v2735_v52, %v3836_v53 }
 0x2f5   :  { %v2288_v6 = vsel %vm2003_vm1, %v2287_v51, %v2238_v27  ;;  %v2318_v7 = vperm.slane %v2312_v4, %v3850_v11  ;;  %v2298_v17 = vperm.slane %v2290_v35, %v3850_v11  ;;  %v2721_v15 = vsel %vm2003_vm1, %v2720_v56, %v3983_v38  ;;  %v4093_v27 = vpop.permute.xlu2 %2555 }
 0x2f6   :  { %v2294_v20 = vperm.slane %v2288_v6, %v3850_v11  ;;  %v2335_v18 = vrot.slane %v2322_v16, 4  ;;  %v2723_v1 = vsel %vm2003_vm1, %v2578_v61, %v2722_v62  ;;  %v2727_v26 = vperm.slane %v2721_v15, %v3836_v53 }
 0x2f7   :  { %v2331_v36 = vrot.slane %v2318_v7, 4  ;;  %v2622_v32 = vrot.slane %v4048_v30, 4  ;;  %v2337_v33 = vrot.slane %v2298_v17, 4  ;;  %v2731_v58 = vperm.slane %v2723_v1, %v3836_v53 }
 0x2f8   :  { %v2333_v2 = vrot.slane %v2294_v20, 4  ;;  %v2594_v12 = vpop.permute.xlu1 %2593  ;;  %v2336_v28 = vsel %vm2003_vm1, %v2335_v18, %v2298_v17  ;;  %v2756_v48 = vrot.slane %v2727_v26, 4  ;;  %v2759_v38 = vsel %vm2003_vm1, %v2727_v26, %v2758_v8 }
 0x2f9   :  { %v2332_v19 = vsel %vm2003_vm1, %v2331_v36, %v2294_v20  ;;  %v2782_v61 = vrot.slane %v4070_v60, 4  ;;  %2472 = vrot.lane.b32.xlu0 %v2336_v28, %s3383_s7  ;;  %v4100_v39 = vperm.slane %v2759_v38, %v3850_v11  ;;  %v2768_v62 = vrot.slane %v2731_v58, 4 }
 0x2fa   :  { %2464 = vrot.lane.b32.xlu1 %v2332_v19, %s3382_s9  ;;  %v2334_v25 = vsel %vm2003_vm1, %v2318_v7, %v2333_v2  ;;  %v2794_v13 = vrot.slane %v4079_v22, 4  ;;  %v2757_v8 = vsel %vm2003_vm1, %v2756_v48, %v3989_v46  ;;  %v2771_v47 = vsel %vm2003_vm1, %v2731_v58, %v2770_v3  ;;  %v2584_v3 = vpop.permute.xlu0 %2583 }
 0x2fb   :  { %2468 = vrot.lane.b32.xlu2 %v2334_v25, %s3384_s15  ;;  %v4113_v51 = vsel %vm2003_vm1, %v2211_v23, %v3926_v34  ;;  %v2338_v52 = vsel %vm2003_vm1, %v2322_v16, %v2337_v33  ;;  %v2769_v55 = vsel %vm2003_vm1, %v2768_v62, %v3974_v29  ;;  %v2634_v56 = vrot.slane %v4093_v27, 4 }
 0x2fc   :  { %v4123_v46 = vsel %vm2003_vm1, %v2215_v9, %v3942_v44  ;;  %v4126_v4 = vperm.slane %v2757_v8, %v3850_v11  ;;  %v4129_v34 = vperm.slane %v2771_v47, %v3850_v11  ;;  %v2810_v5 = vrot.slane %v4100_v39, 4 }
 0x2fd   :  { %v2341_v23 = vrot.slane %v4113_v51, 4  ;;  %v4134_v29 = vperm.slane %v2769_v55, %v3850_v11  ;;  %v4140_v9 = vsel %vm2003_vm1, %v3994_v50, %v2217_v0  ;;  %v2353_v57 = vrot.slane %v4026_v14, 4 }
 0x2fe   :  { %v2366_v6 = vsel %vm2003_vm1, %v4016_v54, %v2365_v42  ;;  %v2339_v7 = vrot.slane %v4123_v46, 4  ;;  %v2386_v44 = vperm.slane %v2378_v59, %v3836_v53  ;;  %v2744_v50 = vrot.slane %v2594_v12, 4 }
 0x2ff   :  { %v2342_v35 = vsel %vm2003_vm1, %v4123_v46, %v2341_v23  ;;  %v2374_v16 = vperm.slane %v2366_v6, %v3836_v53  ;;  %v2354_v0 = vsel %vm2003_vm1, %v4140_v9, %v2353_v57  ;;  %v2746_v17 = vrot.slane %v2584_v3, 4 }
 0x300   :  { %v2350_v20 = vperm.slane %v2342_v35, %v3836_v53  ;;  %v2806_v15 = vrot.slane %v4126_v4, 4  ;;  %v2362_v42 = vperm.slane %v2354_v0, %v3836_v53  ;;  %v2423_v36 = vrot.slane %v2386_v44, 4  ;;  %v2559_v1 = vpop.permute.xlu1 %2558 }
 0x301   :  { %v2425_v18 = vrot.slane %v2374_v16, 4  ;;  %v2818_v26 = vrot.slane %v4129_v34, 4  ;;  %v2745_v59 = vsel %vm2003_vm1, %v2744_v50, %v2584_v3  ;;  %v2747_v2 = vsel %vm2003_vm1, %v2594_v12, %v2746_v17 }
 0x302   :  { %2476 = vrot.lane.b32.xlu1 %v2338_v52, %s3368_s21  ;;  %v2401_v33 = vrot.slane %v2350_v20, 4  ;;  %v2399_v58 = vrot.slane %v2362_v42, 4  ;;  %v2424_v19 = vsel %vm2003_vm1, %v2423_v36, %v2374_v16  ;;  %v2751_v28 = vperm.slane %v2745_v59, %v3836_v53  ;;  %v2547_v35 = vpop.permute.xlu0 %2546 }
 0x303   :  { %v2755_v48 = vperm.slane %v2747_v2, %v3836_v53  ;;  %v2430_v38 = vperm.slane %v2424_v19, %v3850_v11  ;;  %v2426_v62 = vsel %vm2003_vm1, %v2386_v44, %v2425_v18  ;;  %v2620_v8 = vrot.slane %v2559_v1, 4 }
 0x304   :  { %v2402_v25 = vsel %vm2003_vm1, %v2362_v42, %v2401_v33  ;;  %v2400_v47 = vsel %vm2003_vm1, %v2399_v58, %v2350_v20  ;;  %v2780_v52 = vrot.slane %v2751_v28, 4  ;;  %v2783_v12 = vsel %vm2003_vm1, %v2751_v28, %v2782_v61 }
 0x305   :  { %v2792_v55 = vrot.slane %v2755_v48, 4  ;;  %v2406_v3 = vperm.slane %v2400_v47, %v3850_v11  ;;  %v2443_v23 = vrot.slane %v2430_v38, 4  ;;  %v2791_v57 = vperm.slane %v2783_v12, %v3850_v11 }
 0x306   :  { %v2795_v6 = vsel %vm2003_vm1, %v2755_v48, %v2794_v13  ;;  %v2781_v16 = vsel %vm2003_vm1, %v2780_v52, %v4070_v60  ;;  %v2410_v61 = vperm.slane %v2402_v25, %v3850_v11  ;;  %v2814_v42 = vrot.slane %v4134_v29, 4 }
 0x307   :  { %v2793_v44 = vsel %vm2003_vm1, %v2792_v55, %v4079_v22  ;;  %v4177_v20 = vperm.slane %v2795_v6, %v3850_v11  ;;  %v2444_v0 = vsel %vm2003_vm1, %v2443_v23, %v2406_v3  ;;  %v2787_v50 = vperm.slane %v2781_v16, %v3850_v11 }
 0x308   :  { %v4183_v17 = vperm.slane %v2793_v44, %v3850_v11  ;;  %v2808_v13 = vrot.slane %v2791_v57, 4  ;;  %2492 = vrot.lane.b32.xlu2 %v2444_v0, %s3382_s9  ;;  %v4188_v60 = vsel %vm2003_vm1, %v2791_v57, %v2810_v5  ;;  %v2434_v22 = vperm.slane %v2426_v62, %v3850_v11  ;;  %v2544_v23 = vpop.permute.xlu1 %2543 }
 0x309   :  { %v2623_v36 = vsel %vm2003_vm1, %v2559_v1, %v2622_v32  ;;  %v2804_v18 = vrot.slane %v2787_v50, 4  ;;  %v4195_v59 = vsel %vm2003_vm1, %v2787_v50, %v2806_v15  ;;  %v4203_v33 = vsel %vm2003_vm1, %v4177_v20, %v2818_v26 }
 0x30a   :  { %v4199_v2 = vsel %vm2003_vm1, %v2808_v13, %v4100_v39  ;;  %v2812_v5 = vrot.slane %v4183_v17, 4  ;;  %v2816_v58 = vrot.slane %v4177_v20, 4  ;;  %v2621_v32 = vsel %vm2003_vm1, %v2620_v8, %v4048_v30 }
 0x30b   :  { %v2932_v19 = vrot.slane %v4199_v2, 4  ;;  %v4212_v15 = vsel %vm2003_vm1, %v2804_v18, %v4126_v4  ;;  %v2447_v1 = vrot.slane %v2434_v22, 4  ;;  %v2449_v39 = vrot.slane %v2410_v61, 4 }
 0x30c   :  { %v2445_v28 = vrot.slane %v2406_v3, 4  ;;  %v2944_v48 = vrot.slane %v4188_v60, 4  ;;  %v2946_v26 = vrot.slane %v4195_v59, 4  ;;  %v2968_v25 = vrot.slane %v4203_v33, 4 }
 0x30d   :  { %v2596_v62 = vrot.slane %v2547_v35, 4  ;;  %v2448_v47 = vsel %vm2003_vm1, %v2447_v1, %v2410_v61  ;;  %v2450_v52 = vsel %vm2003_vm1, %v2434_v22, %v2449_v39  ;;  %v4220_v30 = vperm.slane %v2621_v32, %v3836_v53 }
 0x30e   :  { %v2599_v4 = vsel %vm2003_vm1, %v2547_v35, %v2598_v41  ;;  %v2934_v8 = vrot.slane %v4212_v15, 4  ;;  %2500 = vrot.lane.b32.xlu0 %v2448_v47, %s3383_s7  ;;  %2504 = vrot.lane.b32.xlu1 %v2450_v52, %s3368_s21  ;;  %v2446_v12 = vsel %vm2003_vm1, %v2430_v38, %v2445_v28  ;;  %v2340_v41 = vsel %vm2003_vm1, %v2339_v7, %v4113_v51  ;;  %v2550_v35 = vpop.permute.xlu0 %2549 }
 0x30f   :  { %v2597_v55 = vsel %vm2003_vm1, %v2596_v62, %v3809_v37  ;;  %v2607_v3 = vperm.slane %v2599_v4, %v3836_v53  ;;  %v2351_v6 = vrot.slane %v4140_v9, 4  ;;  %v2364_v38 = vsel %vm2003_vm1, %v2363_v45, %v4032_v63 }
 0x310   :  { %v2603_v57 = vperm.slane %v2597_v55, %v3836_v53  ;;  %2496 = vrot.lane.b32.xlu2 %v2446_v12, %s3384_s15  ;;  %v4244_v37 = vperm.slane %v2623_v36, %v3836_v53  ;;  %v2346_v16 = vperm.slane %v2340_v41, %v3836_v53  ;;  %v2370_v44 = vperm.slane %v2364_v38, %v3836_v53 }
 0x311   :  { %v2376_v51 = vsel %vm2003_vm1, %v2375_v10, %v4012_v49  ;;  %v2670_v46 = vrot.slane %v4220_v30, 4  ;;  %v2352_v54 = vsel %vm2003_vm1, %v2351_v6, %v4026_v14  ;;  %v2610_v63 = vrot.slane %v2544_v23, 4 }
 0x312   :  { %v2382_v45 = vperm.slane %v2376_v51, %v3836_v53  ;;  %v2358_v9 = vperm.slane %v2352_v54, %v3836_v53  ;;  %v2389_v7 = vrot.slane %v2346_v16, 4  ;;  %v2413_v20 = vrot.slane %v2370_v44, 4 }
 0x313   :  { %v2608_v61 = vrot.slane %v2550_v35, 4  ;;  %v2646_v0 = vrot.slane %v2603_v57, 4  ;;  %v2658_v50 = vrot.slane %v2607_v3, 4  ;;  %v2611_v24 = vsel %vm2003_vm1, %v2550_v35, %v2610_v63 }
 0x314   :  { %v2411_v13 = vrot.slane %v2382_v45, 4  ;;  %v2390_v49 = vsel %vm2003_vm1, %v2358_v9, %v2389_v7  ;;  %v2414_v10 = vsel %vm2003_vm1, %v2382_v45, %v2413_v20  ;;  %v2387_v22 = vrot.slane %v2358_v9, 4 }
 0x315   :  { %v2609_v14 = vsel %vm2003_vm1, %v2608_v61, %v2544_v23  ;;  %v2398_v36 = vperm.slane %v2390_v49, %v3850_v11  ;;  %v2422_v18 = vperm.slane %v2414_v10, %v3850_v11  ;;  %v2619_v28 = vperm.slane %v2611_v24, %v3836_v53 }
 0x316   :  { %v2412_v32 = vsel %vm2003_vm1, %v2411_v13, %v2370_v44  ;;  %v2615_v1 = vperm.slane %v2609_v14, %v3836_v53  ;;  %v2388_v39 = vsel %vm2003_vm1, %v2387_v22, %v2346_v16  ;;  %v4269_v62 = vsel %vm2003_vm1, %v2812_v5, %v4134_v29 }
 0x317   :  { %v4273_v47 = vsel %vm2003_vm1, %v2816_v58, %v4129_v34  ;;  %v2439_v52 = vrot.slane %v2422_v18, 4  ;;  %v2441_v4 = vrot.slane %v2398_v36, 4  ;;  %v4276_v12 = vperm.slane %v2388_v39, %v3850_v11 }
 0x318   :  { %v2644_v55 = vrot.slane %v2615_v1, 4  ;;  %v4279_v23 = vperm.slane %v2412_v32, %v3850_v11  ;;  %v2647_v41 = vsel %vm2003_vm1, %v2615_v1, %v2646_v0  ;;  %v2656_v6 = vrot.slane %v2619_v28, 4 }
 0x319   :  { %v2659_v38 = vsel %vm2003_vm1, %v2619_v28, %v2658_v50  ;;  %v2440_v5 = vsel %vm2003_vm1, %v2439_v52, %v2398_v36  ;;  %v2442_v35 = vsel %vm2003_vm1, %v2422_v18, %v2441_v4  ;;  %v2437_v34 = vrot.slane %v4276_v12, 4 }
 0x31a   :  { %v2645_v58 = vsel %vm2003_vm1, %v2644_v55, %v2603_v57  ;;  %2484 = vrot.lane.b32.xlu0 %v2440_v5, %s3381_s6  ;;  %2488 = vrot.lane.b32.xlu1 %v2442_v35, %s3380_s23  ;;  %v4293_v44 = vperm.slane %v2647_v41, %v3850_v11  ;;  %v2657_v51 = vsel %vm2003_vm1, %v2656_v6, %v2607_v3  ;;  %v2956_v54 = vrot.slane %v4273_v47, 4 }
 0x31b   :  { %v4290_v16 = vperm.slane %v2645_v58, %v3850_v11  ;;  %v2438_v45 = vsel %vm2003_vm1, %v4279_v23, %v2437_v34  ;;  %v2667_v63 = vperm.slane %v2659_v38, %v3850_v11  ;;  %v4304_v57 = vsel %vm2003_vm1, %v4183_v17, %v2814_v42  ;;  %v2563_v17 = vpop.permute.xlu0 %2562 }
 0x31c   :  { %v2933_v9 = vsel %vm2003_vm1, %v2932_v19, %v4212_v15  ;;  %v2682_v3 = vrot.slane %v4244_v37, 4  ;;  %2480 = vrot.lane.b32.xlu2 %v2438_v45, %s3379_s19  ;;  %v4313_v7 = vperm.slane %v2657_v51, %v3850_v11  ;;  %v2945_v29 = vsel %vm2003_vm1, %v2944_v48, %v4195_v59 }
 0x31d   :  { %v2939_v20 = vperm.slane %v2933_v9, %v3836_v53  ;;  %v2694_v42 = vrot.slane %v4290_v16, 4  ;;  %v2698_v61 = vrot.slane %v4293_v44, 4  ;;  %v2951_v19 = vperm.slane %v2945_v29, %v3836_v53 }
 0x31e   :  { %v2957_v0 = vsel %vm2003_vm1, %v2956_v54, %v4269_v62  ;;  %v2706_v50 = vrot.slane %v2667_v63, 4  ;;  %v2958_v13 = vrot.slane %v4269_v62, 4  ;;  %v2969_v48 = vsel %vm2003_vm1, %v2968_v25, %v4304_v57 }
 0x31f   :  { %v2963_v24 = vperm.slane %v2957_v0, %v3836_v53  ;;  %v2975_v49 = vperm.slane %v2969_v48, %v3836_v53  ;;  %v2980_v10 = vrot.slane %v2951_v19, 4  ;;  %v2566_v22 = vsel %vm1971_vm5, %v2563_v17, %v4057_v43 }
 0x320   :  { %v2982_v14 = vrot.slane %v2939_v20, 4  ;;  %v2970_v36 = vrot.slane %v4304_v57, 4  ;;  %v2632_v18 = vrot.slane %v2566_v22, 4  ;;  %v2635_v32 = vsel %vm2003_vm1, %v2566_v22, %v2634_v56 }
 0x321   :  { %v3006_v1 = vrot.slane %v2963_v24, 4  ;;  %v2981_v39 = vsel %vm2003_vm1, %v2980_v10, %v2939_v20  ;;  %v3004_v28 = vrot.slane %v2975_v49, 4  ;;  %v2643_v25 = vperm.slane %v2635_v32, %v3836_v53 }
 0x322   :  { %v2935_v62 = vsel %vm2003_vm1, %v4199_v2, %v2934_v8  ;;  %v4345_v43 = vperm.slane %v2981_v39, %v3850_v11  ;;  %v2633_v52 = vsel %vm2003_vm1, %v2632_v18, %v4093_v27  ;;  %v2983_v4 = vsel %vm2003_vm1, %v2951_v19, %v2982_v14 }
 0x323   :  { %v3007_v56 = vsel %vm2003_vm1, %v2975_v49, %v3006_v1  ;;  %v3005_v55 = vsel %vm2003_vm1, %v3004_v28, %v2963_v24  ;;  %v2639_v41 = vperm.slane %v2633_v52, %v3836_v53  ;;  %v2680_v6 = vrot.slane %v2643_v25, 4 }
 0x324   :  { %v2683_v15 = vsel %vm2003_vm1, %v2643_v25, %v2682_v3  ;;  %v4355_v38 = vperm.slane %v3005_v55, %v3850_v11  ;;  %v3030_v2 = vrot.slane %v4345_v43, 4  ;;  %v4360_v27 = vperm.slane %v3007_v56, %v3850_v11 }
 0x325   :  { %v2691_v8 = vperm.slane %v2683_v15, %v3850_v11  ;;  %v2668_v5 = vrot.slane %v2639_v41, 4  ;;  %v2671_v35 = vsel %vm2003_vm1, %v2639_v41, %v2670_v46  ;;  %v2681_v34 = vsel %vm2003_vm1, %v2680_v6, %v4244_v37 }
 0x326   :  { %v4368_v58 = vperm.slane %v2983_v4, %v3850_v11  ;;  %v3031_v51 = vsel %vm2003_vm1, %v4355_v38, %v3030_v2  ;;  %v2679_v54 = vperm.slane %v2671_v35, %v3850_v11  ;;  %v2687_v45 = vperm.slane %v2681_v34, %v3850_v11 }
 0x327   :  { %v2943_v57 = vperm.slane %v2935_v62, %v3836_v53  ;;  %3073 = vrot.lane.b32.xlu1 %v3031_v51, %s3379_s19  ;;  %v2669_v46 = vsel %vm2003_vm1, %v2668_v5, %v4220_v30  ;;  %v2704_v9 = vrot.slane %v2691_v8, 4  ;;  %v4379_v37 = vsel %vm2003_vm1, %v2691_v8, %v2706_v50 }
 0x328   :  { %v3032_v3 = vrot.slane %v4360_v27, 4  ;;  %v2702_v20 = vrot.slane %v4313_v7, 4  ;;  %v2675_v29 = vperm.slane %v2669_v46, %v3850_v11  ;;  %v2696_v17 = vrot.slane %v2679_v54, 4 }
 0x329   :  { %v2700_v19 = vrot.slane %v2687_v45, 4  ;;  %v4385_v0 = vsel %vm2003_vm1, %v2704_v9, %v2667_v63  ;;  %v2947_v30 = vsel %vm2003_vm1, %v4188_v60, %v2946_v26  ;;  %v2959_v50 = vsel %vm2003_vm1, %v4273_v47, %v2958_v13 }
 0x32a   :  { %v3033_v24 = vsel %vm2003_vm1, %v3032_v3, %v4368_v58  ;;  %v2692_v48 = vrot.slane %v2675_v29, 4  ;;  %v2856_v49 = vrot.slane %v4379_v37, 4  ;;  %v2955_v10 = vperm.slane %v2947_v30, %v3836_v53 }
 0x32b   :  { %3077 = vrot.lane.b32.xlu0 %v3033_v24, %s3381_s6  ;;  %v2967_v63 = vperm.slane %v2959_v50, %v3836_v53  ;;  %v2844_v22 = vrot.slane %v4385_v0, 4  ;;  %v2971_v59 = vsel %vm2003_vm1, %v4203_v33, %v2970_v36  ;;  %v2994_v14 = vrot.slane %v2943_v57, 4 }
 0x32c   :  { %v3034_v60 = vrot.slane %v4368_v58, 4  ;;  %v2979_v26 = vperm.slane %v2971_v59, %v3836_v53  ;;  %v2992_v13 = vrot.slane %v2955_v10, 4  ;;  %v2695_v18 = vsel %vm2003_vm1, %v2675_v29, %v2694_v42 }
 0x32d   :  { %v3018_v47 = vrot.slane %v2967_v63, 4  ;;  %v2995_v32 = vsel %vm2003_vm1, %v2955_v10, %v2994_v14  ;;  %v2693_v1 = vsel %vm2003_vm1, %v2692_v48, %v4290_v16  ;;  %v2697_v39 = vsel %vm2003_vm1, %v2696_v17, %v4293_v44 }
 0x32e   :  { %v2699_v33 = vsel %vm2003_vm1, %v2679_v54, %v2698_v61  ;;  %v4416_v36 = vperm.slane %v2995_v32, %v3850_v11  ;;  %v2993_v25 = vsel %vm2003_vm1, %v2992_v13, %v2943_v57  ;;  %v3016_v42 = vrot.slane %v2979_v26, 4 }
 0x32f   :  { %v3019_v28 = vsel %vm2003_vm1, %v2979_v26, %v3018_v47  ;;  %v2999_v16 = vperm.slane %v2993_v25, %v3850_v11  ;;  %v2701_v52 = vsel %vm2003_vm1, %v2700_v19, %v4313_v7  ;;  %v2703_v44 = vsel %vm2003_vm1, %v2687_v45, %v2702_v20 }
 0x330   :  { %v4421_v62 = vperm.slane %v3019_v28, %v3850_v11  ;;  %v3017_v61 = vsel %vm2003_vm1, %v3016_v42, %v2967_v63  ;;  %v2820_v4 = vrot.slane %v2697_v39, 4  ;;  %v2822_v56 = vrot.slane %v2693_v1, 4 }
 0x331   :  { %v2832_v55 = vrot.slane %v2699_v33, 4  ;;  %v3023_v6 = vperm.slane %v3017_v61, %v3850_v11  ;;  %v3038_v15 = vrot.slane %v2999_v16, 4  ;;  %v2834_v2 = vrot.slane %v2695_v18, 4 }
 0x332   :  { %v3040_v41 = vrot.slane %v4421_v62, 4  ;;  %v2821_v8 = vsel %vm2003_vm1, %v2820_v4, %v2693_v1  ;;  %v2845_v35 = vsel %vm2003_vm1, %v2844_v22, %v2701_v52  ;;  %v2857_v7 = vsel %vm2003_vm1, %v2856_v49, %v2703_v44 }
 0x333   :  { %v2833_v5 = vsel %vm2003_vm1, %v2832_v55, %v2695_v18  ;;  %v3036_v51 = vrot.slane %v3023_v6, 4  ;;  %v3039_v54 = vsel %vm2003_vm1, %v3023_v6, %v3038_v15  ;;  %v2827_v45 = vperm.slane %v2821_v8, %v3836_v53 }
 0x334   :  { %v3041_v34 = vsel %vm2003_vm1, %v3040_v41, %v4416_v36  ;;  %3089 = vrot.lane.b32.xlu0 %v3039_v54, %s3384_s15  ;;  %v2839_v57 = vperm.slane %v2833_v5, %v3836_v53  ;;  %v2851_v46 = vperm.slane %v2845_v35, %v3836_v53  ;;  %v2858_v9 = vrot.slane %v2703_v44, 4 }
 0x335   :  { %3093 = vrot.lane.b32.xlu2 %v3041_v34, %s3383_s7  ;;  %v2863_v3 = vperm.slane %v2857_v7, %v3836_v53  ;;  %v3037_v20 = vsel %vm2003_vm1, %v3036_v51, %v2999_v16  ;;  %v2870_v29 = vrot.slane %v2827_v45, 4  ;;  %v2823_v17 = vsel %vm2003_vm1, %v2697_v39, %v2822_v56 }
 0x336   :  { %v2835_v19 = vsel %vm2003_vm1, %v2699_v33, %v2834_v2  ;;  %3085 = vrot.lane.b32.xlu1 %v3037_v20, %s3382_s9  ;;  %v2894_v24 = vrot.slane %v2851_v46, 4  ;;  %v2868_v30 = vrot.slane %v2839_v57, 4  ;;  %v2831_v48 = vperm.slane %v2823_v17, %v3836_v53 }
 0x337   :  { %v2892_v50 = vrot.slane %v2863_v3, 4  ;;  %v2871_v49 = vsel %vm2003_vm1, %v2839_v57, %v2870_v29  ;;  %v2843_v10 = vperm.slane %v2835_v19, %v3836_v53  ;;  %v2846_v63 = vrot.slane %v2701_v52, 4 }
 0x338   :  { %v2859_v22 = vsel %vm2003_vm1, %v4379_v37, %v2858_v9  ;;  %v2879_v59 = vperm.slane %v2871_v49, %v3850_v11  ;;  %v2895_v14 = vsel %vm2003_vm1, %v2863_v3, %v2894_v24  ;;  %v2869_v26 = vsel %vm2003_vm1, %v2868_v30, %v2827_v45 }
 0x339   :  { %v2893_v47 = vsel %vm2003_vm1, %v2892_v50, %v2851_v46  ;;  %v2435_v13 = vrot.slane %v4279_v23, 4  ;;  %v2903_v18 = vperm.slane %v2895_v14, %v3850_v11  ;;  %v2875_v32 = vperm.slane %v2869_v26, %v3850_v11 }
 0x33a   :  { %v2847_v1 = vsel %vm2003_vm1, %v4385_v0, %v2846_v63  ;;  %v2922_v39 = vrot.slane %v2879_v59, 4  ;;  %v2867_v33 = vperm.slane %v2859_v22, %v3836_v53  ;;  %v2880_v28 = vrot.slane %v2843_v10, 4 }
 0x33b   :  { %v2855_v37 = vperm.slane %v2847_v1, %v3836_v53  ;;  %v3035_v25 = vsel %vm2003_vm1, %v4360_v27, %v3034_v60  ;;  %v2899_v23 = vperm.slane %v2893_v47, %v3850_v11  ;;  %v2918_v42 = vrot.slane %v2875_v32, 4 }
 0x33c   :  { %v2882_v16 = vrot.slane %v2831_v48, 4  ;;  %v2920_v52 = vrot.slane %v2903_v18, 4  ;;  %v2923_v0 = vsel %vm2003_vm1, %v2903_v18, %v2922_v39  ;;  %v2904_v44 = vrot.slane %v2867_v33, 4 }
 0x33d   :  { %3081 = vrot.lane.b32.xlu2 %v3035_v25, %s3380_s23  ;;  %v2906_v61 = vrot.slane %v2855_v37, 4  ;;  %v2919_v4 = vsel %vm2003_vm1, %v2899_v23, %v2918_v42  ;;  %v2881_v53 = vsel %vm2003_vm1, %v2880_v28, %v2831_v48  ;;  %v2436_v6 = vsel %vm2003_vm1, %v2435_v13, %v4276_v12 }
 0x33e   :  { %3045 = vrot.lane.b32.xlu0 %v2919_v4, %s3379_s19  ;;  %3053 = vrot.lane.b32.xlu1 %v2923_v0, %s3380_s23  ;;  %v2905_v27 = vsel %vm2003_vm1, %v2904_v44, %v2855_v37  ;;  %v2883_v58 = vsel %vm2003_vm1, %v2843_v10, %v2882_v16  ;;  %v2921_v41 = vsel %vm2003_vm1, %v2920_v52, %v2879_v59  ;;  %v3042_v12 = vrot.slane %v4416_v36, 4  ;;  %v3114_v36 = vld [vmem:[%s4543_s2] sm:$0xff] }
 0x33f   :  { %v2907_v60 = vsel %vm2003_vm1, %v2867_v33, %v2906_v61  ;;  %v2911_v56 = vperm.slane %v2905_v27, %v3850_v11  ;;  %v2887_v15 = vperm.slane %v2881_v53, %v3850_v11  ;;  %v2891_v8 = vperm.slane %v2883_v58, %v3850_v11 }
 0x340   :  { %v2915_v55 = vperm.slane %v2907_v60, %v3850_v11  ;;  %v3028_v45 = vrot.slane %v4355_v38, 4  ;;  %v3043_v57 = vsel %vm2003_vm1, %v4421_v62, %v3042_v12  ;;  %v2323_v38 = vrot.slane %v3979_v31, 4 }
 0x341   :  { %v2924_v2 = vrot.slane %v2911_v56, 4  ;;  %v2926_v34 = vrot.slane %v2887_v15, 4  ;;  %v2930_v51 = vrot.slane %v2891_v8, 4  ;;  %v2916_v3 = vrot.slane %v2899_v23, 4 }
 0x342   :  { %v2928_v5 = vrot.slane %v2915_v55, 4  ;;  %v3029_v46 = vsel %vm2003_vm1, %v3028_v45, %v4345_v43  ;;  %v2324_v62 = vsel %vm2003_vm1, %v2323_v38, %v3969_v21  ;;  %vm2516_vm7 = vcmask 785408  }
 0x343   :  { %v2925_v35 = vsel %vm2003_vm1, %v2924_v2, %v2887_v15  ;;  %v2927_v54 = vsel %vm2003_vm1, %v2911_v56, %v2926_v34  ;;  %v2931_v11 = vsel %vm2003_vm1, %v2915_v55, %v2930_v51  ;;  %v2917_v19 = vsel %vm2003_vm1, %v2916_v3, %v2875_v32 }
 0x344   :  { %v2929_v7 = vsel %vm2003_vm1, %v2928_v5, %v2891_v8 }
 0x345   :  { %3049 = vrot.lane.b32.xlu2 %v2921_v41, %s3381_s6 }
 0x346   :  { %3057 = vrot.lane.b32.xlu0 %v2925_v35, %s3382_s9  ;;  %3065 = vrot.lane.b32.xlu1 %v2929_v7, %s3383_s7 }
 0x34c   :  { %v2457_v20 = vpop.permute.xlu2 %2456 }
 0x34d   :  { %3061 = vrot.lane.b32.xlu2 %v2927_v54, %s3384_s15 }
 0x34e   :  { %3069 = vrot.lane.b32.xlu0 %v2931_v11, %s3368_s21  ;;  %3097 = vrot.lane.b32.xlu1 %v3043_v57, %s3368_s21 }
 0x355   :  { %3117 = vperm.xlu2 %3310, %v3114_v36   ;;  %v2469_v31 = vpop.permute.xlu2 %2468 }
 0x35a   :  { %v2453_v9 = vpop.permute.xlu1 %2452 }
 0x35b   :  { %v2508_v29 = vsel %vm2507_vm6, %v2324_v62, %v2453_v9 }
 0x35c   :  { %v2509_v43 = vsel %vm325_vm15, %v2508_v29, %v2457_v20 }
 0x362   :  { %v2461_v17 = vpop.permute.xlu0 %2460  ;;  %v2493_v22 = vpop.permute.xlu2 %2492 }
 0x363   :  { %v2511_v30 = vsel %vm2510_vm2, %v2509_v43, %v2461_v17 }
 0x36a   :  { %v2497_v26 = vpop.permute.xlu2 %2496 }
 0x36b   :  { %v2473_v48 = vpop.permute.xlu0 %2472 }
 0x36c   :  { %v2465_v24 = vpop.permute.xlu1 %2464 }
 0x36d   :  { %v2513_v50 = vsel %vm2512_vm3, %v2511_v30, %v2465_v24 }
 0x36e   :  { %v2515_v21 = vsel %vm2514_vm4, %v2513_v50, %v2469_v31 }
 0x36f   :  { %v2517_v49 = vsel %vm2516_vm7, %v2515_v21, %v2473_v48 }
 0x374   :  { %v2477_v10 = vpop.permute.xlu1 %2476 }
 0x375   :  { %v2519_v63 = vsel %vm2518_vm8, %v2517_v49, %v2477_v10 }
 0x376   :  { %v2533_v59 = vadd.f32 %v3829_v40, %v2519_v63  ;;  %v2481_v18 = vpop.permute.xlu2 %2480 }
 0x377   :  { %v2520_v32 = vsel %vm2507_vm6, %v2436_v6, %v2481_v18 }
 0x378   :  { %v2535_v14 = vmax.f32 %v2533_v59, 0.0 }
 0x37a   :  { %2537 = vst [vmem:[#allocation4] sm:$0xff] %v2535_v14 }
 0x380   :  { %v2501_v47 = vpop.permute.xlu0 %2500  ;;  %v2505_v13 = vpop.permute.xlu1 %2504 }
 0x38c   :  { %v2485_v1 = vpop.permute.xlu0 %2484  ;;  %v2489_v39 = vpop.permute.xlu1 %2488 }
 0x38d   :  { %v2521_v37 = vsel %vm325_vm15, %v2520_v32, %v2485_v1 }
 0x38e   :  { %v2522_v33 = vsel %vm2510_vm2, %v2521_v37, %v2489_v39 }
 0x38f   :  { %v2523_v28 = vsel %vm2512_vm3, %v2522_v33, %v2493_v22  ;;  %v3094_v0 = vpop.permute.xlu2 %3093 }
 0x390   :  { %v2524_v25 = vsel %vm2514_vm4, %v2523_v28, %v2497_v26 }
 0x391   :  { %v2525_v23 = vsel %vm2516_vm7, %v2524_v25, %v2501_v47 }
 0x392   :  { %v2526_v42 = vsel %vm2518_vm8, %v2525_v23, %v2505_v13 }
 0x393   :  { %v2534_v16 = vadd.f32 %v3829_v40, %v2526_v42 }
 0x395   :  { %v2536_v52 = vmax.f32 %v2534_v16, 0.0 }
 0x397   :  { %2538 = vst [vmem:[#allocation4 + $0x8] sm:$0xff] %v2536_v52  ;;  %v3082_v4 = vpop.permute.xlu2 %3081 }
 0x399   :  { %v3074_v44 = vpop.permute.xlu1 %3073 }
 0x39a   :  { %v3107_v55 = vsel %vm2507_vm6, %v3029_v46, %v3074_v44 }
 0x39d   :  { %v3078_v61 = vpop.permute.xlu0 %3077 }
 0x39e   :  { %v3108_v6 = vsel %vm325_vm15, %v3107_v55, %v3078_v61 }
 0x39f   :  { %v3050_v58 = vpop.permute.xlu2 %3049  ;;  %v3109_v5 = vsel %vm2510_vm2, %v3108_v6, %v3082_v4 }
 0x3a6   :  { %v3090_v27 = vpop.permute.xlu0 %3089 }
 0x3a7   :  { %v3062_v40 = vpop.permute.xlu2 %3061 }
 0x3a8   :  { %v3086_v53 = vpop.permute.xlu1 %3085 }
 0x3a9   :  { %v3110_v7 = vsel %vm2512_vm3, %v3109_v5, %v3086_v53 }
 0x3aa   :  { %v3111_v51 = vsel %vm2514_vm4, %v3110_v7, %v3090_v27 }
 0x3ab   :  { %v3112_v57 = vsel %vm2516_vm7, %v3111_v51, %v3094_v0 }
 0x3af   :  { %v3118_v46 = vpop.permute.xlu2 %3117 }
 0x3b0   :  { %v3046_v60 = vpop.permute.xlu0 %3045  ;;  %v3054_v56 = vpop.permute.xlu1 %3053 }
 0x3b1   :  { %v3100_v41 = vsel %vm2507_vm6, %v2917_v19, %v3046_v60 }
 0x3b2   :  { %v3101_v15 = vsel %vm325_vm15, %v3100_v41, %v3050_v58 }
 0x3b3   :  { %v3102_v35 = vsel %vm2510_vm2, %v3101_v15, %v3054_v56 }
 0x3b8   :  { %v3058_v2 = vpop.permute.xlu0 %3057  ;;  %v3066_v8 = vpop.permute.xlu1 %3065 }
 0x3b9   :  { %v3103_v34 = vsel %vm2512_vm3, %v3102_v35, %v3058_v2 }
 0x3ba   :  { %v3104_v12 = vsel %vm2514_vm4, %v3103_v34, %v3062_v40 }
 0x3bb   :  { %v3105_v54 = vsel %vm2516_vm7, %v3104_v12, %v3066_v8 }
 0x3c0   :  { %v3070_v45 = vpop.permute.xlu0 %3069  ;;  %v3098_v11 = vpop.permute.xlu1 %3097 }
 0x3c1   :  { %v3106_v36 = vsel %vm2518_vm8, %v3105_v54, %v3070_v45  ;;  %v3113_v38 = vsel %vm2518_vm8, %v3112_v57, %v3098_v11 }
 0x3c2   :  { %v3120_v9 = vadd.f32 %v3118_v46, %v3106_v36  ;;  %v3121_v3 = vadd.f32 %v3118_v46, %v3113_v38 }
 0x3c4   :  { %v3122_v20 = vmax.f32 %v3120_v9, 0.0  ;;  %v3123_v62 = vmax.f32 %v3121_v3, 0.0 }
 0x3c6   :  { %3125 = vst [vmem:[#allocation4 + $0x10] sm:$0xff] %v3122_v20 }
 0x3c7   :  { %3126 = vst [vmem:[#allocation4 + $0x18] sm:$0xff] %v3123_v62 }
 0x3c8   :  { %3139 = dma.vmem_to_hbm [thread:$0]  %s3132_s30, 512, %s3134_s12, [#allocation5], %s3386_s27, %s3386_s27, %s3379_s19  }
 0x3c9   :  { %3336 = dma.done.wait [#allocation5], 512  }
 0x3ca   :  { %3337 = vsyncadd [#allocation5], 4294966784 }
 0x3cb   :  { %3144 = vsyncpa [#allocation5], 1 }

</bundles_post_ra>
